<compile_context>
chip_gen: v6e
topology: v6e:2x2x1
jax: 0.10.0
libtpu: 0.0.40
codegen_flags: <defaults>
</compile_context>

<pallas_src>
import jax
import jax.numpy as jnp
from jax.experimental import pallas as pl
from jax.experimental.pallas import tpu as pltpu

B = 2
CIN, COUT = 3, 32
H = W = 32
KH = KW = 3
HW = H * W                      # 1024
K_IM2COL = CIN * KH * KW        # 27
KPAD = 32                       # pad 27 -> 32 (sublane-aligned MXU feed)
FC_IN = COUT * HW               # 32768
FC_OUT = 10


# ----------------------------- fused Pallas kernel --------------------------

def fused_kernel(p_ref, wconv_ref, bconv_ref, wfc_ref, bfc_ref, o_ref):
    # p_ref:     [B, KPAD, HW]       im2col patches (feature = cin*9+kh*3+kw, zero padded)
    # wconv_ref: [COUT, KPAD]        conv weight (OIHW reshaped + zero padded)
    # bconv_ref: [COUT, 1]
    # wfc_ref:   [FC_OUT, COUT, HW]  fc weight, lane-dense (last dim = 1024)
    # bfc_ref:   [1, FC_OUT]
    # o_ref:     [B, FC_OUT]
    bi = jax.lax.broadcasted_iota(jnp.int32, (B, FC_OUT), 0)
    fi = jax.lax.broadcasted_iota(jnp.int32, (B, FC_OUT), 1)
    acc = jnp.zeros((B, FC_OUT), jnp.float32) + bfc_ref[...]      # start from fc bias

    for b in range(B):                                            # B=2, static unroll
        # conv + bias + ReLU on the MXU: [32,32] @ [32,1024] -> [32,1024]
        a = jnp.dot(wconv_ref[...], p_ref[b],
                    preferred_element_type=jnp.float32)
        a = jnp.maximum(a + bconv_ref[...], 0.0)                  # [COUT, HW], stays in VMEM

        # fc (GEMV, DMA-bound): per output feature, broadcast-mul + reduce on VPU.
        for f in range(FC_OUT):
            prod = a * wfc_ref[f]                                 # [COUT, HW]
            s_lane = jnp.sum(prod, axis=1, keepdims=True)         # [COUT, 1]
            s = jnp.sum(s_lane, axis=0, keepdims=True)            # [1, 1]
            acc = acc + jnp.where((bi == b) & (fi == f), s, 0.0)

    o_ref[...] = acc


# --------------------------------- wrapper ----------------------------------

def fused_forward_pallas(patches, wconv_p, bconv, wfc_r, bfc):
    return pl.pallas_call(
        fused_kernel,
        out_shape=jax.ShapeDtypeStruct((B, FC_OUT), jnp.float32),
        grid=(1,),
        in_specs=[
            pl.BlockSpec((B, KPAD, HW), lambda i: (0, 0, 0)),
            pl.BlockSpec((COUT, KPAD), lambda i: (0, 0)),
            pl.BlockSpec((COUT, 1), lambda i: (0, 0)),
            pl.BlockSpec((FC_OUT, COUT, HW), lambda i: (0, 0, 0)),
            pl.BlockSpec((1, FC_OUT), lambda i: (0, 0)),
        ],
        out_specs=pl.BlockSpec((B, FC_OUT), lambda i: (0, 0)),
        compiler_params=pltpu.CompilerParams(
            dimension_semantics=("arbitrary",)),
    )(patches, wconv_p, bconv, wfc_r, bfc)


def im2col_kmajor(x):
    # x: [B, CIN, H, W] -> patches [B, KPAD, HW]; feature k = cin*9 + kh*3 + kw,
    # spatial index hw = h*W + w (matches PyTorch conv output flatten order).
    xp = jnp.pad(x, ((0, 0), (0, 0), (1, 1), (1, 1)))
    taps = []
    for cin in range(CIN):
        for kh in range(KH):
            for kw in range(KW):
                taps.append(xp[:, cin, kh:kh + H, kw:kw + W].reshape(B, HW))
    p = jnp.stack(taps, axis=1)                                    # [B, 27, HW]
    pad = jnp.zeros((B, KPAD - K_IM2COL, HW), x.dtype)
    return jnp.concatenate([p, pad], axis=1)                       # [B, 32, HW]


def victim_model_forward(x, w_conv, b_conv, w_fc, b_fc):
    """x: [B, 3, 32, 32] NCHW; params in PyTorch layouts:
       w_conv [32,3,3,3] OIHW, b_conv [32], w_fc [10, 32768], b_fc [10]."""
    patches = im2col_kmajor(x)                                     # [B, KPAD, HW]
    wconv_p = jnp.concatenate(
        [w_conv.reshape(COUT, K_IM2COL),
         jnp.zeros((COUT, KPAD - K_IM2COL), w_conv.dtype)], axis=1)  # [32, 32]
    wfc_r = w_fc.reshape(FC_OUT, COUT, HW)                         # [10, 32, 1024] (lane-dense)
    return fused_forward_pallas(patches, wconv_p,
                                b_conv.reshape(COUT, 1),
                                wfc_r, b_fc.reshape(1, FC_OUT))    # [B, 10]


def reference_forward(x, w_conv, b_conv, w_fc, b_fc):
    y = jax.lax.conv_general_dilated(
        x, w_conv, window_strides=(1, 1), padding=((1, 1), (1, 1)),
        dimension_numbers=("NCHW", "OIHW", "NCHW"))
    y = jnp.maximum(y + b_conv.reshape(1, COUT, 1, 1), 0.0)
    y = y.reshape(B, -1)                                           # channel-major flatten
    return y @ w_fc.T + b_fc


if __name__ == "__main__":
    key = jax.random.PRNGKey(0)
    kx, kw1, kb1, kw2, kb2 = jax.random.split(key, 5)

    x = jax.random.normal(kx, (B, CIN, H, W), jnp.float32)

    conv_fan_in = CIN * KH * KW
    w_conv = jax.random.uniform(kw1, (COUT, CIN, KH, KW), jnp.float32,
                                -1.0, 1.0) / jnp.sqrt(conv_fan_in)
    b_conv = jax.random.uniform(kb1, (COUT,), jnp.float32,
                                -1.0, 1.0) / jnp.sqrt(conv_fan_in)
    w_fc = jax.random.uniform(kw2, (FC_OUT, FC_IN), jnp.float32,
                              -1.0, 1.0) / jnp.sqrt(FC_IN)
    b_fc = jax.random.uniform(kb2, (FC_OUT,), jnp.float32,
                              -1.0, 1.0) / jnp.sqrt(FC_IN)

    out = jax.jit(victim_model_forward)(x, w_conv, b_conv, w_fc, b_fc)
    out = jax.block_until_ready(out)

    ref = jax.block_until_ready(reference_forward(x, w_conv, b_conv, w_fc, b_fc))
    assert out.shape == (B, FC_OUT)
    assert jnp.allclose(out, ref, rtol=1e-2, atol=1e-2), (out, ref)

    print("KERNEL_OK")
</pallas_src>

<mosaic_0001>
module attributes {stable_mosaic.version = 11 : i64} {
  func.func @fused_kernel(%arg0: i32, %arg1: memref<2x32x1024xf32, #tpu.memory_space<vmem>>, %arg2: memref<32x32xf32, #tpu.memory_space<vmem>>, %arg3: memref<32x1xf32, #tpu.memory_space<vmem>>, %arg4: memref<10x32x1024xf32, #tpu.memory_space<vmem>>, %arg5: memref<1x10xf32, #tpu.memory_space<vmem>>, %arg6: memref<2x10xf32, #tpu.memory_space<vmem>>) attributes {dimension_semantics = [#tpu.dimension_semantics<arbitrary>], iteration_bounds = array<i64: 1>, scalar_prefetch = 0 : i64, scratch_operands = 0 : i64, tpu.core_type = #tpu.core_type<tc>, window_params = [{pipeline_mode = #tpu.pipeline_mode<synchronous>, transform_indices = @transform_0, window_bounds = array<i64: 2, 32, 1024>}, {pipeline_mode = #tpu.pipeline_mode<synchronous>, transform_indices = @transform_1, window_bounds = array<i64: 32, 32>}, {pipeline_mode = #tpu.pipeline_mode<synchronous>, transform_indices = @transform_2, window_bounds = array<i64: 32, 1>}, {pipeline_mode = #tpu.pipeline_mode<synchronous>, transform_indices = @transform_3, window_bounds = array<i64: 10, 32, 1024>}, {pipeline_mode = #tpu.pipeline_mode<synchronous>, transform_indices = @transform_4, window_bounds = array<i64: 1, 10>}, {pipeline_mode = #tpu.pipeline_mode<synchronous>, transform_indices = @transform_5, window_bounds = array<i64: 2, 10>}]} {
    %0 = tpu.iota {dimensions = array<i32: 0>} : vector<2x10xi32>
    %1 = tpu.iota {dimensions = array<i32: 1>} : vector<2x10xi32>
    %cst = arith.constant 0.000000e+00 : f32
    %2 = vector.broadcast %cst : f32 to vector<2x10xf32>
    %c0 = arith.constant 0 : index
    %c0_0 = arith.constant 0 : index
    %3 = vector.load %arg5[%c0, %c0_0] : memref<1x10xf32, #tpu.memory_space<vmem>>, vector<1x10xf32>
    %4 = vector.broadcast %3 : vector<1x10xf32> to vector<2x10xf32>
    %5 = arith.addf %2, %4 : vector<2x10xf32>
    %c0_1 = arith.constant 0 : index
    %c0_2 = arith.constant 0 : index
    %6 = vector.load %arg2[%c0_1, %c0_2] : memref<32x32xf32, #tpu.memory_space<vmem>>, vector<32x32xf32>
    %c0_3 = arith.constant 0 : index
    %c0_4 = arith.constant 0 : index
    %c0_5 = arith.constant 0 : index
    %7 = vector.load %arg1[%c0_3, %c0_4, %c0_5] : memref<2x32x1024xf32, #tpu.memory_space<vmem>>, vector<1x32x1024xf32>
    %8 = vector.shape_cast %7 : vector<1x32x1024xf32> to vector<32x1024xf32>
    %cst_6 = arith.constant dense<0.000000e+00> : vector<32x1024xf32>
    %9 = tpu.matmul %6, %8, %cst_6 {dimension_numbers = #tpu.dot_dimension_numbers<[1], [0], [0], [1], [0, 0, 1, 1], [], []>} : vector<32x32xf32>, vector<32x1024xf32>, vector<32x1024xf32> -> vector<32x1024xf32>
    %c0_7 = arith.constant 0 : index
    %c0_8 = arith.constant 0 : index
    %10 = vector.load %arg3[%c0_7, %c0_8] : memref<32x1xf32, #tpu.memory_space<vmem>>, vector<32x1xf32>
    %11 = vector.broadcast %10 : vector<32x1xf32> to vector<32x1024xf32>
    %12 = arith.addf %9, %11 : vector<32x1024xf32>
    %cst_9 = arith.constant 0.000000e+00 : f32
    %13 = vector.broadcast %cst_9 : f32 to vector<32x1024xf32>
    %14 = arith.maximumf %12, %13 : vector<32x1024xf32>
    %c0_10 = arith.constant 0 : index
    %c0_11 = arith.constant 0 : index
    %c0_12 = arith.constant 0 : index
    %15 = vector.load %arg4[%c0_10, %c0_11, %c0_12] : memref<10x32x1024xf32, #tpu.memory_space<vmem>>, vector<1x32x1024xf32>
    %16 = vector.shape_cast %15 : vector<1x32x1024xf32> to vector<32x1024xf32>
    %17 = arith.mulf %14, %16 : vector<32x1024xf32>
    %cst_13 = arith.constant dense<0.000000e+00> : vector<32xf32>
    %18 = vector.multi_reduction <add>, %17, %cst_13 [1] : vector<32x1024xf32> to vector<32xf32>
    %19 = vector.shape_cast %18 : vector<32xf32> to vector<32x1xf32>
    %cst_14 = arith.constant dense<0.000000e+00> : vector<1xf32>
    %20 = vector.multi_reduction <add>, %19, %cst_14 [0] : vector<32x1xf32> to vector<1xf32>
    %21 = vector.shape_cast %20 : vector<1xf32> to vector<1x1xf32>
    %c0_i32 = arith.constant 0 : i32
    %22 = vector.broadcast %c0_i32 : i32 to vector<2x10xi32>
    %23 = arith.cmpi eq, %0, %22 : vector<2x10xi32>
    %c0_i32_15 = arith.constant 0 : i32
    %24 = vector.broadcast %c0_i32_15 : i32 to vector<2x10xi32>
    %25 = arith.cmpi eq, %1, %24 : vector<2x10xi32>
    %26 = arith.andi %23, %25 : vector<2x10xi1>
    %cst_16 = arith.constant 0.000000e+00 : f32
    %27 = vector.shape_cast %21 : vector<1x1xf32> to vector<1x1xf32>
    %28 = vector.broadcast %27 : vector<1x1xf32> to vector<2x10xf32>
    %29 = vector.broadcast %cst_16 : f32 to vector<2x10xf32>
    %30 = arith.select %26, %28, %29 : vector<2x10xi1>, vector<2x10xf32>
    %31 = arith.addf %5, %30 : vector<2x10xf32>
    %c1 = arith.constant 1 : index
    %c0_17 = arith.constant 0 : index
    %c0_18 = arith.constant 0 : index
    %32 = vector.load %arg4[%c1, %c0_17, %c0_18] : memref<10x32x1024xf32, #tpu.memory_space<vmem>>, vector<1x32x1024xf32>
    %33 = vector.shape_cast %32 : vector<1x32x1024xf32> to vector<32x1024xf32>
    %34 = arith.mulf %14, %33 : vector<32x1024xf32>
    %cst_19 = arith.constant dense<0.000000e+00> : vector<32xf32>
    %35 = vector.multi_reduction <add>, %34, %cst_19 [1] : vector<32x1024xf32> to vector<32xf32>
    %36 = vector.shape_cast %35 : vector<32xf32> to vector<32x1xf32>
    %cst_20 = arith.constant dense<0.000000e+00> : vector<1xf32>
    %37 = vector.multi_reduction <add>, %36, %cst_20 [0] : vector<32x1xf32> to vector<1xf32>
    %38 = vector.shape_cast %37 : vector<1xf32> to vector<1x1xf32>
    %c0_i32_21 = arith.constant 0 : i32
    %39 = vector.broadcast %c0_i32_21 : i32 to vector<2x10xi32>
    %40 = arith.cmpi eq, %0, %39 : vector<2x10xi32>
    %c1_i32 = arith.constant 1 : i32
    %41 = vector.broadcast %c1_i32 : i32 to vector<2x10xi32>
    %42 = arith.cmpi eq, %1, %41 : vector<2x10xi32>
    %43 = arith.andi %40, %42 : vector<2x10xi1>
    %cst_22 = arith.constant 0.000000e+00 : f32
    %44 = vector.shape_cast %38 : vector<1x1xf32> to vector<1x1xf32>
    %45 = vector.broadcast %44 : vector<1x1xf32> to vector<2x10xf32>
    %46 = vector.broadcast %cst_22 : f32 to vector<2x10xf32>
    %47 = arith.select %43, %45, %46 : vector<2x10xi1>, vector<2x10xf32>
    %48 = arith.addf %31, %47 : vector<2x10xf32>
    %c2 = arith.constant 2 : index
    %c0_23 = arith.constant 0 : index
    %c0_24 = arith.constant 0 : index
    %49 = vector.load %arg4[%c2, %c0_23, %c0_24] : memref<10x32x1024xf32, #tpu.memory_space<vmem>>, vector<1x32x1024xf32>
    %50 = vector.shape_cast %49 : vector<1x32x1024xf32> to vector<32x1024xf32>
    %51 = arith.mulf %14, %50 : vector<32x1024xf32>
    %cst_25 = arith.constant dense<0.000000e+00> : vector<32xf32>
    %52 = vector.multi_reduction <add>, %51, %cst_25 [1] : vector<32x1024xf32> to vector<32xf32>
    %53 = vector.shape_cast %52 : vector<32xf32> to vector<32x1xf32>
    %cst_26 = arith.constant dense<0.000000e+00> : vector<1xf32>
    %54 = vector.multi_reduction <add>, %53, %cst_26 [0] : vector<32x1xf32> to vector<1xf32>
    %55 = vector.shape_cast %54 : vector<1xf32> to vector<1x1xf32>
    %c0_i32_27 = arith.constant 0 : i32
    %56 = vector.broadcast %c0_i32_27 : i32 to vector<2x10xi32>
    %57 = arith.cmpi eq, %0, %56 : vector<2x10xi32>
    %c2_i32 = arith.constant 2 : i32
    %58 = vector.broadcast %c2_i32 : i32 to vector<2x10xi32>
    %59 = arith.cmpi eq, %1, %58 : vector<2x10xi32>
    %60 = arith.andi %57, %59 : vector<2x10xi1>
    %cst_28 = arith.constant 0.000000e+00 : f32
    %61 = vector.shape_cast %55 : vector<1x1xf32> to vector<1x1xf32>
    %62 = vector.broadcast %61 : vector<1x1xf32> to vector<2x10xf32>
    %63 = vector.broadcast %cst_28 : f32 to vector<2x10xf32>
    %64 = arith.select %60, %62, %63 : vector<2x10xi1>, vector<2x10xf32>
    %65 = arith.addf %48, %64 : vector<2x10xf32>
    %c3 = arith.constant 3 : index
    %c0_29 = arith.constant 0 : index
    %c0_30 = arith.constant 0 : index
    %66 = vector.load %arg4[%c3, %c0_29, %c0_30] : memref<10x32x1024xf32, #tpu.memory_space<vmem>>, vector<1x32x1024xf32>
    %67 = vector.shape_cast %66 : vector<1x32x1024xf32> to vector<32x1024xf32>
    %68 = arith.mulf %14, %67 : vector<32x1024xf32>
    %cst_31 = arith.constant dense<0.000000e+00> : vector<32xf32>
    %69 = vector.multi_reduction <add>, %68, %cst_31 [1] : vector<32x1024xf32> to vector<32xf32>
    %70 = vector.shape_cast %69 : vector<32xf32> to vector<32x1xf32>
    %cst_32 = arith.constant dense<0.000000e+00> : vector<1xf32>
    %71 = vector.multi_reduction <add>, %70, %cst_32 [0] : vector<32x1xf32> to vector<1xf32>
    %72 = vector.shape_cast %71 : vector<1xf32> to vector<1x1xf32>
    %c0_i32_33 = arith.constant 0 : i32
    %73 = vector.broadcast %c0_i32_33 : i32 to vector<2x10xi32>
    %74 = arith.cmpi eq, %0, %73 : vector<2x10xi32>
    %c3_i32 = arith.constant 3 : i32
    %75 = vector.broadcast %c3_i32 : i32 to vector<2x10xi32>
    %76 = arith.cmpi eq, %1, %75 : vector<2x10xi32>
    %77 = arith.andi %74, %76 : vector<2x10xi1>
    %cst_34 = arith.constant 0.000000e+00 : f32
    %78 = vector.shape_cast %72 : vector<1x1xf32> to vector<1x1xf32>
    %79 = vector.broadcast %78 : vector<1x1xf32> to vector<2x10xf32>
    %80 = vector.broadcast %cst_34 : f32 to vector<2x10xf32>
    %81 = arith.select %77, %79, %80 : vector<2x10xi1>, vector<2x10xf32>
    %82 = arith.addf %65, %81 : vector<2x10xf32>
    %c4 = arith.constant 4 : index
    %c0_35 = arith.constant 0 : index
    %c0_36 = arith.constant 0 : index
    %83 = vector.load %arg4[%c4, %c0_35, %c0_36] : memref<10x32x1024xf32, #tpu.memory_space<vmem>>, vector<1x32x1024xf32>
    %84 = vector.shape_cast %83 : vector<1x32x1024xf32> to vector<32x1024xf32>
    %85 = arith.mulf %14, %84 : vector<32x1024xf32>
    %cst_37 = arith.constant dense<0.000000e+00> : vector<32xf32>
    %86 = vector.multi_reduction <add>, %85, %cst_37 [1] : vector<32x1024xf32> to vector<32xf32>
    %87 = vector.shape_cast %86 : vector<32xf32> to vector<32x1xf32>
    %cst_38 = arith.constant dense<0.000000e+00> : vector<1xf32>
    %88 = vector.multi_reduction <add>, %87, %cst_38 [0] : vector<32x1xf32> to vector<1xf32>
    %89 = vector.shape_cast %88 : vector<1xf32> to vector<1x1xf32>
    %c0_i32_39 = arith.constant 0 : i32
    %90 = vector.broadcast %c0_i32_39 : i32 to vector<2x10xi32>
    %91 = arith.cmpi eq, %0, %90 : vector<2x10xi32>
    %c4_i32 = arith.constant 4 : i32
    %92 = vector.broadcast %c4_i32 : i32 to vector<2x10xi32>
    %93 = arith.cmpi eq, %1, %92 : vector<2x10xi32>
    %94 = arith.andi %91, %93 : vector<2x10xi1>
    %cst_40 = arith.constant 0.000000e+00 : f32
    %95 = vector.shape_cast %89 : vector<1x1xf32> to vector<1x1xf32>
    %96 = vector.broadcast %95 : vector<1x1xf32> to vector<2x10xf32>
    %97 = vector.broadcast %cst_40 : f32 to vector<2x10xf32>
    %98 = arith.select %94, %96, %97 : vector<2x10xi1>, vector<2x10xf32>
    %99 = arith.addf %82, %98 : vector<2x10xf32>
    %c5 = arith.constant 5 : index
    %c0_41 = arith.constant 0 : index
    %c0_42 = arith.constant 0 : index
    %100 = vector.load %arg4[%c5, %c0_41, %c0_42] : memref<10x32x1024xf32, #tpu.memory_space<vmem>>, vector<1x32x1024xf32>
    %101 = vector.shape_cast %100 : vector<1x32x1024xf32> to vector<32x1024xf32>
    %102 = arith.mulf %14, %101 : vector<32x1024xf32>
    %cst_43 = arith.constant dense<0.000000e+00> : vector<32xf32>
    %103 = vector.multi_reduction <add>, %102, %cst_43 [1] : vector<32x1024xf32> to vector<32xf32>
    %104 = vector.shape_cast %103 : vector<32xf32> to vector<32x1xf32>
    %cst_44 = arith.constant dense<0.000000e+00> : vector<1xf32>
    %105 = vector.multi_reduction <add>, %104, %cst_44 [0] : vector<32x1xf32> to vector<1xf32>
    %106 = vector.shape_cast %105 : vector<1xf32> to vector<1x1xf32>
    %c0_i32_45 = arith.constant 0 : i32
    %107 = vector.broadcast %c0_i32_45 : i32 to vector<2x10xi32>
    %108 = arith.cmpi eq, %0, %107 : vector<2x10xi32>
    %c5_i32 = arith.constant 5 : i32
    %109 = vector.broadcast %c5_i32 : i32 to vector<2x10xi32>
    %110 = arith.cmpi eq, %1, %109 : vector<2x10xi32>
    %111 = arith.andi %108, %110 : vector<2x10xi1>
    %cst_46 = arith.constant 0.000000e+00 : f32
    %112 = vector.shape_cast %106 : vector<1x1xf32> to vector<1x1xf32>
    %113 = vector.broadcast %112 : vector<1x1xf32> to vector<2x10xf32>
    %114 = vector.broadcast %cst_46 : f32 to vector<2x10xf32>
    %115 = arith.select %111, %113, %114 : vector<2x10xi1>, vector<2x10xf32>
    %116 = arith.addf %99, %115 : vector<2x10xf32>
    %c6 = arith.constant 6 : index
    %c0_47 = arith.constant 0 : index
    %c0_48 = arith.constant 0 : index
    %117 = vector.load %arg4[%c6, %c0_47, %c0_48] : memref<10x32x1024xf32, #tpu.memory_space<vmem>>, vector<1x32x1024xf32>
    %118 = vector.shape_cast %117 : vector<1x32x1024xf32> to vector<32x1024xf32>
    %119 = arith.mulf %14, %118 : vector<32x1024xf32>
    %cst_49 = arith.constant dense<0.000000e+00> : vector<32xf32>
    %120 = vector.multi_reduction <add>, %119, %cst_49 [1] : vector<32x1024xf32> to vector<32xf32>
    %121 = vector.shape_cast %120 : vector<32xf32> to vector<32x1xf32>
    %cst_50 = arith.constant dense<0.000000e+00> : vector<1xf32>
    %122 = vector.multi_reduction <add>, %121, %cst_50 [0] : vector<32x1xf32> to vector<1xf32>
    %123 = vector.shape_cast %122 : vector<1xf32> to vector<1x1xf32>
    %c0_i32_51 = arith.constant 0 : i32
    %124 = vector.broadcast %c0_i32_51 : i32 to vector<2x10xi32>
    %125 = arith.cmpi eq, %0, %124 : vector<2x10xi32>
    %c6_i32 = arith.constant 6 : i32
    %126 = vector.broadcast %c6_i32 : i32 to vector<2x10xi32>
    %127 = arith.cmpi eq, %1, %126 : vector<2x10xi32>
    %128 = arith.andi %125, %127 : vector<2x10xi1>
    %cst_52 = arith.constant 0.000000e+00 : f32
    %129 = vector.shape_cast %123 : vector<1x1xf32> to vector<1x1xf32>
    %130 = vector.broadcast %129 : vector<1x1xf32> to vector<2x10xf32>
    %131 = vector.broadcast %cst_52 : f32 to vector<2x10xf32>
    %132 = arith.select %128, %130, %131 : vector<2x10xi1>, vector<2x10xf32>
    %133 = arith.addf %116, %132 : vector<2x10xf32>
    %c7 = arith.constant 7 : index
    %c0_53 = arith.constant 0 : index
    %c0_54 = arith.constant 0 : index
    %134 = vector.load %arg4[%c7, %c0_53, %c0_54] : memref<10x32x1024xf32, #tpu.memory_space<vmem>>, vector<1x32x1024xf32>
    %135 = vector.shape_cast %134 : vector<1x32x1024xf32> to vector<32x1024xf32>
    %136 = arith.mulf %14, %135 : vector<32x1024xf32>
    %cst_55 = arith.constant dense<0.000000e+00> : vector<32xf32>
    %137 = vector.multi_reduction <add>, %136, %cst_55 [1] : vector<32x1024xf32> to vector<32xf32>
    %138 = vector.shape_cast %137 : vector<32xf32> to vector<32x1xf32>
    %cst_56 = arith.constant dense<0.000000e+00> : vector<1xf32>
    %139 = vector.multi_reduction <add>, %138, %cst_56 [0] : vector<32x1xf32> to vector<1xf32>
    %140 = vector.shape_cast %139 : vector<1xf32> to vector<1x1xf32>
    %c0_i32_57 = arith.constant 0 : i32
    %141 = vector.broadcast %c0_i32_57 : i32 to vector<2x10xi32>
    %142 = arith.cmpi eq, %0, %141 : vector<2x10xi32>
    %c7_i32 = arith.constant 7 : i32
    %143 = vector.broadcast %c7_i32 : i32 to vector<2x10xi32>
    %144 = arith.cmpi eq, %1, %143 : vector<2x10xi32>
    %145 = arith.andi %142, %144 : vector<2x10xi1>
    %cst_58 = arith.constant 0.000000e+00 : f32
    %146 = vector.shape_cast %140 : vector<1x1xf32> to vector<1x1xf32>
    %147 = vector.broadcast %146 : vector<1x1xf32> to vector<2x10xf32>
    %148 = vector.broadcast %cst_58 : f32 to vector<2x10xf32>
    %149 = arith.select %145, %147, %148 : vector<2x10xi1>, vector<2x10xf32>
    %150 = arith.addf %133, %149 : vector<2x10xf32>
    %c8 = arith.constant 8 : index
    %c0_59 = arith.constant 0 : index
    %c0_60 = arith.constant 0 : index
    %151 = vector.load %arg4[%c8, %c0_59, %c0_60] : memref<10x32x1024xf32, #tpu.memory_space<vmem>>, vector<1x32x1024xf32>
    %152 = vector.shape_cast %151 : vector<1x32x1024xf32> to vector<32x1024xf32>
    %153 = arith.mulf %14, %152 : vector<32x1024xf32>
    %cst_61 = arith.constant dense<0.000000e+00> : vector<32xf32>
    %154 = vector.multi_reduction <add>, %153, %cst_61 [1] : vector<32x1024xf32> to vector<32xf32>
    %155 = vector.shape_cast %154 : vector<32xf32> to vector<32x1xf32>
    %cst_62 = arith.constant dense<0.000000e+00> : vector<1xf32>
    %156 = vector.multi_reduction <add>, %155, %cst_62 [0] : vector<32x1xf32> to vector<1xf32>
    %157 = vector.shape_cast %156 : vector<1xf32> to vector<1x1xf32>
    %c0_i32_63 = arith.constant 0 : i32
    %158 = vector.broadcast %c0_i32_63 : i32 to vector<2x10xi32>
    %159 = arith.cmpi eq, %0, %158 : vector<2x10xi32>
    %c8_i32 = arith.constant 8 : i32
    %160 = vector.broadcast %c8_i32 : i32 to vector<2x10xi32>
    %161 = arith.cmpi eq, %1, %160 : vector<2x10xi32>
    %162 = arith.andi %159, %161 : vector<2x10xi1>
    %cst_64 = arith.constant 0.000000e+00 : f32
    %163 = vector.shape_cast %157 : vector<1x1xf32> to vector<1x1xf32>
    %164 = vector.broadcast %163 : vector<1x1xf32> to vector<2x10xf32>
    %165 = vector.broadcast %cst_64 : f32 to vector<2x10xf32>
    %166 = arith.select %162, %164, %165 : vector<2x10xi1>, vector<2x10xf32>
    %167 = arith.addf %150, %166 : vector<2x10xf32>
    %c9 = arith.constant 9 : index
    %c0_65 = arith.constant 0 : index
    %c0_66 = arith.constant 0 : index
    %168 = vector.load %arg4[%c9, %c0_65, %c0_66] : memref<10x32x1024xf32, #tpu.memory_space<vmem>>, vector<1x32x1024xf32>
    %169 = vector.shape_cast %168 : vector<1x32x1024xf32> to vector<32x1024xf32>
    %170 = arith.mulf %14, %169 : vector<32x1024xf32>
    %cst_67 = arith.constant dense<0.000000e+00> : vector<32xf32>
    %171 = vector.multi_reduction <add>, %170, %cst_67 [1] : vector<32x1024xf32> to vector<32xf32>
    %172 = vector.shape_cast %171 : vector<32xf32> to vector<32x1xf32>
    %cst_68 = arith.constant dense<0.000000e+00> : vector<1xf32>
    %173 = vector.multi_reduction <add>, %172, %cst_68 [0] : vector<32x1xf32> to vector<1xf32>
    %174 = vector.shape_cast %173 : vector<1xf32> to vector<1x1xf32>
    %c0_i32_69 = arith.constant 0 : i32
    %175 = vector.broadcast %c0_i32_69 : i32 to vector<2x10xi32>
    %176 = arith.cmpi eq, %0, %175 : vector<2x10xi32>
    %c9_i32 = arith.constant 9 : i32
    %177 = vector.broadcast %c9_i32 : i32 to vector<2x10xi32>
    %178 = arith.cmpi eq, %1, %177 : vector<2x10xi32>
    %179 = arith.andi %176, %178 : vector<2x10xi1>
    %cst_70 = arith.constant 0.000000e+00 : f32
    %180 = vector.shape_cast %174 : vector<1x1xf32> to vector<1x1xf32>
    %181 = vector.broadcast %180 : vector<1x1xf32> to vector<2x10xf32>
    %182 = vector.broadcast %cst_70 : f32 to vector<2x10xf32>
    %183 = arith.select %179, %181, %182 : vector<2x10xi1>, vector<2x10xf32>
    %184 = arith.addf %167, %183 : vector<2x10xf32>
    %c0_71 = arith.constant 0 : index
    %c0_72 = arith.constant 0 : index
    %185 = vector.load %arg2[%c0_71, %c0_72] : memref<32x32xf32, #tpu.memory_space<vmem>>, vector<32x32xf32>
    %c1_73 = arith.constant 1 : index
    %c0_74 = arith.constant 0 : index
    %c0_75 = arith.constant 0 : index
    %186 = vector.load %arg1[%c1_73, %c0_74, %c0_75] : memref<2x32x1024xf32, #tpu.memory_space<vmem>>, vector<1x32x1024xf32>
    %187 = vector.shape_cast %186 : vector<1x32x1024xf32> to vector<32x1024xf32>
    %cst_76 = arith.constant dense<0.000000e+00> : vector<32x1024xf32>
    %188 = tpu.matmul %185, %187, %cst_76 {dimension_numbers = #tpu.dot_dimension_numbers<[1], [0], [0], [1], [0, 0, 1, 1], [], []>} : vector<32x32xf32>, vector<32x1024xf32>, vector<32x1024xf32> -> vector<32x1024xf32>
    %c0_77 = arith.constant 0 : index
    %c0_78 = arith.constant 0 : index
    %189 = vector.load %arg3[%c0_77, %c0_78] : memref<32x1xf32, #tpu.memory_space<vmem>>, vector<32x1xf32>
    %190 = vector.broadcast %189 : vector<32x1xf32> to vector<32x1024xf32>
    %191 = arith.addf %188, %190 : vector<32x1024xf32>
    %cst_79 = arith.constant 0.000000e+00 : f32
    %192 = vector.broadcast %cst_79 : f32 to vector<32x1024xf32>
    %193 = arith.maximumf %191, %192 : vector<32x1024xf32>
    %c0_80 = arith.constant 0 : index
    %c0_81 = arith.constant 0 : index
    %c0_82 = arith.constant 0 : index
    %194 = vector.load %arg4[%c0_80, %c0_81, %c0_82] : memref<10x32x1024xf32, #tpu.memory_space<vmem>>, vector<1x32x1024xf32>
    %195 = vector.shape_cast %194 : vector<1x32x1024xf32> to vector<32x1024xf32>
    %196 = arith.mulf %193, %195 : vector<32x1024xf32>
    %cst_83 = arith.constant dense<0.000000e+00> : vector<32xf32>
    %197 = vector.multi_reduction <add>, %196, %cst_83 [1] : vector<32x1024xf32> to vector<32xf32>
    %198 = vector.shape_cast %197 : vector<32xf32> to vector<32x1xf32>
    %cst_84 = arith.constant dense<0.000000e+00> : vector<1xf32>
    %199 = vector.multi_reduction <add>, %198, %cst_84 [0] : vector<32x1xf32> to vector<1xf32>
    %200 = vector.shape_cast %199 : vector<1xf32> to vector<1x1xf32>
    %c1_i32_85 = arith.constant 1 : i32
    %201 = vector.broadcast %c1_i32_85 : i32 to vector<2x10xi32>
    %202 = arith.cmpi eq, %0, %201 : vector<2x10xi32>
    %c0_i32_86 = arith.constant 0 : i32
    %203 = vector.broadcast %c0_i32_86 : i32 to vector<2x10xi32>
    %204 = arith.cmpi eq, %1, %203 : vector<2x10xi32>
    %205 = arith.andi %202, %204 : vector<2x10xi1>
    %cst_87 = arith.constant 0.000000e+00 : f32
    %206 = vector.shape_cast %200 : vector<1x1xf32> to vector<1x1xf32>
    %207 = vector.broadcast %206 : vector<1x1xf32> to vector<2x10xf32>
    %208 = vector.broadcast %cst_87 : f32 to vector<2x10xf32>
    %209 = arith.select %205, %207, %208 : vector<2x10xi1>, vector<2x10xf32>
    %210 = arith.addf %184, %209 : vector<2x10xf32>
    %c1_88 = arith.constant 1 : index
    %c0_89 = arith.constant 0 : index
    %c0_90 = arith.constant 0 : index
    %211 = vector.load %arg4[%c1_88, %c0_89, %c0_90] : memref<10x32x1024xf32, #tpu.memory_space<vmem>>, vector<1x32x1024xf32>
    %212 = vector.shape_cast %211 : vector<1x32x1024xf32> to vector<32x1024xf32>
    %213 = arith.mulf %193, %212 : vector<32x1024xf32>
    %cst_91 = arith.constant dense<0.000000e+00> : vector<32xf32>
    %214 = vector.multi_reduction <add>, %213, %cst_91 [1] : vector<32x1024xf32> to vector<32xf32>
    %215 = vector.shape_cast %214 : vector<32xf32> to vector<32x1xf32>
    %cst_92 = arith.constant dense<0.000000e+00> : vector<1xf32>
    %216 = vector.multi_reduction <add>, %215, %cst_92 [0] : vector<32x1xf32> to vector<1xf32>
    %217 = vector.shape_cast %216 : vector<1xf32> to vector<1x1xf32>
    %c1_i32_93 = arith.constant 1 : i32
    %218 = vector.broadcast %c1_i32_93 : i32 to vector<2x10xi32>
    %219 = arith.cmpi eq, %0, %218 : vector<2x10xi32>
    %c1_i32_94 = arith.constant 1 : i32
    %220 = vector.broadcast %c1_i32_94 : i32 to vector<2x10xi32>
    %221 = arith.cmpi eq, %1, %220 : vector<2x10xi32>
    %222 = arith.andi %219, %221 : vector<2x10xi1>
    %cst_95 = arith.constant 0.000000e+00 : f32
    %223 = vector.shape_cast %217 : vector<1x1xf32> to vector<1x1xf32>
    %224 = vector.broadcast %223 : vector<1x1xf32> to vector<2x10xf32>
    %225 = vector.broadcast %cst_95 : f32 to vector<2x10xf32>
    %226 = arith.select %222, %224, %225 : vector<2x10xi1>, vector<2x10xf32>
    %227 = arith.addf %210, %226 : vector<2x10xf32>
    %c2_96 = arith.constant 2 : index
    %c0_97 = arith.constant 0 : index
    %c0_98 = arith.constant 0 : index
    %228 = vector.load %arg4[%c2_96, %c0_97, %c0_98] : memref<10x32x1024xf32, #tpu.memory_space<vmem>>, vector<1x32x1024xf32>
    %229 = vector.shape_cast %228 : vector<1x32x1024xf32> to vector<32x1024xf32>
    %230 = arith.mulf %193, %229 : vector<32x1024xf32>
    %cst_99 = arith.constant dense<0.000000e+00> : vector<32xf32>
    %231 = vector.multi_reduction <add>, %230, %cst_99 [1] : vector<32x1024xf32> to vector<32xf32>
    %232 = vector.shape_cast %231 : vector<32xf32> to vector<32x1xf32>
    %cst_100 = arith.constant dense<0.000000e+00> : vector<1xf32>
    %233 = vector.multi_reduction <add>, %232, %cst_100 [0] : vector<32x1xf32> to vector<1xf32>
    %234 = vector.shape_cast %233 : vector<1xf32> to vector<1x1xf32>
    %c1_i32_101 = arith.constant 1 : i32
    %235 = vector.broadcast %c1_i32_101 : i32 to vector<2x10xi32>
    %236 = arith.cmpi eq, %0, %235 : vector<2x10xi32>
    %c2_i32_102 = arith.constant 2 : i32
    %237 = vector.broadcast %c2_i32_102 : i32 to vector<2x10xi32>
    %238 = arith.cmpi eq, %1, %237 : vector<2x10xi32>
    %239 = arith.andi %236, %238 : vector<2x10xi1>
    %cst_103 = arith.constant 0.000000e+00 : f32
    %240 = vector.shape_cast %234 : vector<1x1xf32> to vector<1x1xf32>
    %241 = vector.broadcast %240 : vector<1x1xf32> to vector<2x10xf32>
    %242 = vector.broadcast %cst_103 : f32 to vector<2x10xf32>
    %243 = arith.select %239, %241, %242 : vector<2x10xi1>, vector<2x10xf32>
    %244 = arith.addf %227, %243 : vector<2x10xf32>
    %c3_104 = arith.constant 3 : index
    %c0_105 = arith.constant 0 : index
    %c0_106 = arith.constant 0 : index
    %245 = vector.load %arg4[%c3_104, %c0_105, %c0_106] : memref<10x32x1024xf32, #tpu.memory_space<vmem>>, vector<1x32x1024xf32>
    %246 = vector.shape_cast %245 : vector<1x32x1024xf32> to vector<32x1024xf32>
    %247 = arith.mulf %193, %246 : vector<32x1024xf32>
    %cst_107 = arith.constant dense<0.000000e+00> : vector<32xf32>
    %248 = vector.multi_reduction <add>, %247, %cst_107 [1] : vector<32x1024xf32> to vector<32xf32>
    %249 = vector.shape_cast %248 : vector<32xf32> to vector<32x1xf32>
    %cst_108 = arith.constant dense<0.000000e+00> : vector<1xf32>
    %250 = vector.multi_reduction <add>, %249, %cst_108 [0] : vector<32x1xf32> to vector<1xf32>
    %251 = vector.shape_cast %250 : vector<1xf32> to vector<1x1xf32>
    %c1_i32_109 = arith.constant 1 : i32
    %252 = vector.broadcast %c1_i32_109 : i32 to vector<2x10xi32>
    %253 = arith.cmpi eq, %0, %252 : vector<2x10xi32>
    %c3_i32_110 = arith.constant 3 : i32
    %254 = vector.broadcast %c3_i32_110 : i32 to vector<2x10xi32>
    %255 = arith.cmpi eq, %1, %254 : vector<2x10xi32>
    %256 = arith.andi %253, %255 : vector<2x10xi1>
    %cst_111 = arith.constant 0.000000e+00 : f32
    %257 = vector.shape_cast %251 : vector<1x1xf32> to vector<1x1xf32>
    %258 = vector.broadcast %257 : vector<1x1xf32> to vector<2x10xf32>
    %259 = vector.broadcast %cst_111 : f32 to vector<2x10xf32>
    %260 = arith.select %256, %258, %259 : vector<2x10xi1>, vector<2x10xf32>
    %261 = arith.addf %244, %260 : vector<2x10xf32>
    %c4_112 = arith.constant 4 : index
    %c0_113 = arith.constant 0 : index
    %c0_114 = arith.constant 0 : index
    %262 = vector.load %arg4[%c4_112, %c0_113, %c0_114] : memref<10x32x1024xf32, #tpu.memory_space<vmem>>, vector<1x32x1024xf32>
    %263 = vector.shape_cast %262 : vector<1x32x1024xf32> to vector<32x1024xf32>
    %264 = arith.mulf %193, %263 : vector<32x1024xf32>
    %cst_115 = arith.constant dense<0.000000e+00> : vector<32xf32>
    %265 = vector.multi_reduction <add>, %264, %cst_115 [1] : vector<32x1024xf32> to vector<32xf32>
    %266 = vector.shape_cast %265 : vector<32xf32> to vector<32x1xf32>
    %cst_116 = arith.constant dense<0.000000e+00> : vector<1xf32>
    %267 = vector.multi_reduction <add>, %266, %cst_116 [0] : vector<32x1xf32> to vector<1xf32>
    %268 = vector.shape_cast %267 : vector<1xf32> to vector<1x1xf32>
    %c1_i32_117 = arith.constant 1 : i32
    %269 = vector.broadcast %c1_i32_117 : i32 to vector<2x10xi32>
    %270 = arith.cmpi eq, %0, %269 : vector<2x10xi32>
    %c4_i32_118 = arith.constant 4 : i32
    %271 = vector.broadcast %c4_i32_118 : i32 to vector<2x10xi32>
    %272 = arith.cmpi eq, %1, %271 : vector<2x10xi32>
    %273 = arith.andi %270, %272 : vector<2x10xi1>
    %cst_119 = arith.constant 0.000000e+00 : f32
    %274 = vector.shape_cast %268 : vector<1x1xf32> to vector<1x1xf32>
    %275 = vector.broadcast %274 : vector<1x1xf32> to vector<2x10xf32>
    %276 = vector.broadcast %cst_119 : f32 to vector<2x10xf32>
    %277 = arith.select %273, %275, %276 : vector<2x10xi1>, vector<2x10xf32>
    %278 = arith.addf %261, %277 : vector<2x10xf32>
    %c5_120 = arith.constant 5 : index
    %c0_121 = arith.constant 0 : index
    %c0_122 = arith.constant 0 : index
    %279 = vector.load %arg4[%c5_120, %c0_121, %c0_122] : memref<10x32x1024xf32, #tpu.memory_space<vmem>>, vector<1x32x1024xf32>
    %280 = vector.shape_cast %279 : vector<1x32x1024xf32> to vector<32x1024xf32>
    %281 = arith.mulf %193, %280 : vector<32x1024xf32>
    %cst_123 = arith.constant dense<0.000000e+00> : vector<32xf32>
    %282 = vector.multi_reduction <add>, %281, %cst_123 [1] : vector<32x1024xf32> to vector<32xf32>
    %283 = vector.shape_cast %282 : vector<32xf32> to vector<32x1xf32>
    %cst_124 = arith.constant dense<0.000000e+00> : vector<1xf32>
    %284 = vector.multi_reduction <add>, %283, %cst_124 [0] : vector<32x1xf32> to vector<1xf32>
    %285 = vector.shape_cast %284 : vector<1xf32> to vector<1x1xf32>
    %c1_i32_125 = arith.constant 1 : i32
    %286 = vector.broadcast %c1_i32_125 : i32 to vector<2x10xi32>
    %287 = arith.cmpi eq, %0, %286 : vector<2x10xi32>
    %c5_i32_126 = arith.constant 5 : i32
    %288 = vector.broadcast %c5_i32_126 : i32 to vector<2x10xi32>
    %289 = arith.cmpi eq, %1, %288 : vector<2x10xi32>
    %290 = arith.andi %287, %289 : vector<2x10xi1>
    %cst_127 = arith.constant 0.000000e+00 : f32
    %291 = vector.shape_cast %285 : vector<1x1xf32> to vector<1x1xf32>
    %292 = vector.broadcast %291 : vector<1x1xf32> to vector<2x10xf32>
    %293 = vector.broadcast %cst_127 : f32 to vector<2x10xf32>
    %294 = arith.select %290, %292, %293 : vector<2x10xi1>, vector<2x10xf32>
    %295 = arith.addf %278, %294 : vector<2x10xf32>
    %c6_128 = arith.constant 6 : index
    %c0_129 = arith.constant 0 : index
    %c0_130 = arith.constant 0 : index
    %296 = vector.load %arg4[%c6_128, %c0_129, %c0_130] : memref<10x32x1024xf32, #tpu.memory_space<vmem>>, vector<1x32x1024xf32>
    %297 = vector.shape_cast %296 : vector<1x32x1024xf32> to vector<32x1024xf32>
    %298 = arith.mulf %193, %297 : vector<32x1024xf32>
    %cst_131 = arith.constant dense<0.000000e+00> : vector<32xf32>
    %299 = vector.multi_reduction <add>, %298, %cst_131 [1] : vector<32x1024xf32> to vector<32xf32>
    %300 = vector.shape_cast %299 : vector<32xf32> to vector<32x1xf32>
    %cst_132 = arith.constant dense<0.000000e+00> : vector<1xf32>
    %301 = vector.multi_reduction <add>, %300, %cst_132 [0] : vector<32x1xf32> to vector<1xf32>
    %302 = vector.shape_cast %301 : vector<1xf32> to vector<1x1xf32>
    %c1_i32_133 = arith.constant 1 : i32
    %303 = vector.broadcast %c1_i32_133 : i32 to vector<2x10xi32>
    %304 = arith.cmpi eq, %0, %303 : vector<2x10xi32>
    %c6_i32_134 = arith.constant 6 : i32
    %305 = vector.broadcast %c6_i32_134 : i32 to vector<2x10xi32>
    %306 = arith.cmpi eq, %1, %305 : vector<2x10xi32>
    %307 = arith.andi %304, %306 : vector<2x10xi1>
    %cst_135 = arith.constant 0.000000e+00 : f32
    %308 = vector.shape_cast %302 : vector<1x1xf32> to vector<1x1xf32>
    %309 = vector.broadcast %308 : vector<1x1xf32> to vector<2x10xf32>
    %310 = vector.broadcast %cst_135 : f32 to vector<2x10xf32>
    %311 = arith.select %307, %309, %310 : vector<2x10xi1>, vector<2x10xf32>
    %312 = arith.addf %295, %311 : vector<2x10xf32>
    %c7_136 = arith.constant 7 : index
    %c0_137 = arith.constant 0 : index
    %c0_138 = arith.constant 0 : index
    %313 = vector.load %arg4[%c7_136, %c0_137, %c0_138] : memref<10x32x1024xf32, #tpu.memory_space<vmem>>, vector<1x32x1024xf32>
    %314 = vector.shape_cast %313 : vector<1x32x1024xf32> to vector<32x1024xf32>
    %315 = arith.mulf %193, %314 : vector<32x1024xf32>
    %cst_139 = arith.constant dense<0.000000e+00> : vector<32xf32>
    %316 = vector.multi_reduction <add>, %315, %cst_139 [1] : vector<32x1024xf32> to vector<32xf32>
    %317 = vector.shape_cast %316 : vector<32xf32> to vector<32x1xf32>
    %cst_140 = arith.constant dense<0.000000e+00> : vector<1xf32>
    %318 = vector.multi_reduction <add>, %317, %cst_140 [0] : vector<32x1xf32> to vector<1xf32>
    %319 = vector.shape_cast %318 : vector<1xf32> to vector<1x1xf32>
    %c1_i32_141 = arith.constant 1 : i32
    %320 = vector.broadcast %c1_i32_141 : i32 to vector<2x10xi32>
    %321 = arith.cmpi eq, %0, %320 : vector<2x10xi32>
    %c7_i32_142 = arith.constant 7 : i32
    %322 = vector.broadcast %c7_i32_142 : i32 to vector<2x10xi32>
    %323 = arith.cmpi eq, %1, %322 : vector<2x10xi32>
    %324 = arith.andi %321, %323 : vector<2x10xi1>
    %cst_143 = arith.constant 0.000000e+00 : f32
    %325 = vector.shape_cast %319 : vector<1x1xf32> to vector<1x1xf32>
    %326 = vector.broadcast %325 : vector<1x1xf32> to vector<2x10xf32>
    %327 = vector.broadcast %cst_143 : f32 to vector<2x10xf32>
    %328 = arith.select %324, %326, %327 : vector<2x10xi1>, vector<2x10xf32>
    %329 = arith.addf %312, %328 : vector<2x10xf32>
    %c8_144 = arith.constant 8 : index
    %c0_145 = arith.constant 0 : index
    %c0_146 = arith.constant 0 : index
    %330 = vector.load %arg4[%c8_144, %c0_145, %c0_146] : memref<10x32x1024xf32, #tpu.memory_space<vmem>>, vector<1x32x1024xf32>
    %331 = vector.shape_cast %330 : vector<1x32x1024xf32> to vector<32x1024xf32>
    %332 = arith.mulf %193, %331 : vector<32x1024xf32>
    %cst_147 = arith.constant dense<0.000000e+00> : vector<32xf32>
    %333 = vector.multi_reduction <add>, %332, %cst_147 [1] : vector<32x1024xf32> to vector<32xf32>
    %334 = vector.shape_cast %333 : vector<32xf32> to vector<32x1xf32>
    %cst_148 = arith.constant dense<0.000000e+00> : vector<1xf32>
    %335 = vector.multi_reduction <add>, %334, %cst_148 [0] : vector<32x1xf32> to vector<1xf32>
    %336 = vector.shape_cast %335 : vector<1xf32> to vector<1x1xf32>
    %c1_i32_149 = arith.constant 1 : i32
    %337 = vector.broadcast %c1_i32_149 : i32 to vector<2x10xi32>
    %338 = arith.cmpi eq, %0, %337 : vector<2x10xi32>
    %c8_i32_150 = arith.constant 8 : i32
    %339 = vector.broadcast %c8_i32_150 : i32 to vector<2x10xi32>
    %340 = arith.cmpi eq, %1, %339 : vector<2x10xi32>
    %341 = arith.andi %338, %340 : vector<2x10xi1>
    %cst_151 = arith.constant 0.000000e+00 : f32
    %342 = vector.shape_cast %336 : vector<1x1xf32> to vector<1x1xf32>
    %343 = vector.broadcast %342 : vector<1x1xf32> to vector<2x10xf32>
    %344 = vector.broadcast %cst_151 : f32 to vector<2x10xf32>
    %345 = arith.select %341, %343, %344 : vector<2x10xi1>, vector<2x10xf32>
    %346 = arith.addf %329, %345 : vector<2x10xf32>
    %c9_152 = arith.constant 9 : index
    %c0_153 = arith.constant 0 : index
    %c0_154 = arith.constant 0 : index
    %347 = vector.load %arg4[%c9_152, %c0_153, %c0_154] : memref<10x32x1024xf32, #tpu.memory_space<vmem>>, vector<1x32x1024xf32>
    %348 = vector.shape_cast %347 : vector<1x32x1024xf32> to vector<32x1024xf32>
    %349 = arith.mulf %193, %348 : vector<32x1024xf32>
    %cst_155 = arith.constant dense<0.000000e+00> : vector<32xf32>
    %350 = vector.multi_reduction <add>, %349, %cst_155 [1] : vector<32x1024xf32> to vector<32xf32>
    %351 = vector.shape_cast %350 : vector<32xf32> to vector<32x1xf32>
    %cst_156 = arith.constant dense<0.000000e+00> : vector<1xf32>
    %352 = vector.multi_reduction <add>, %351, %cst_156 [0] : vector<32x1xf32> to vector<1xf32>
    %353 = vector.shape_cast %352 : vector<1xf32> to vector<1x1xf32>
    %c1_i32_157 = arith.constant 1 : i32
    %354 = vector.broadcast %c1_i32_157 : i32 to vector<2x10xi32>
    %355 = arith.cmpi eq, %0, %354 : vector<2x10xi32>
    %c9_i32_158 = arith.constant 9 : i32
    %356 = vector.broadcast %c9_i32_158 : i32 to vector<2x10xi32>
    %357 = arith.cmpi eq, %1, %356 : vector<2x10xi32>
    %358 = arith.andi %355, %357 : vector<2x10xi1>
    %cst_159 = arith.constant 0.000000e+00 : f32
    %359 = vector.shape_cast %353 : vector<1x1xf32> to vector<1x1xf32>
    %360 = vector.broadcast %359 : vector<1x1xf32> to vector<2x10xf32>
    %361 = vector.broadcast %cst_159 : f32 to vector<2x10xf32>
    %362 = arith.select %358, %360, %361 : vector<2x10xi1>, vector<2x10xf32>
    %363 = arith.addf %346, %362 : vector<2x10xf32>
    %c0_160 = arith.constant 0 : index
    %c0_161 = arith.constant 0 : index
    %364 = vector.load %arg6[%c0_160, %c0_161] : memref<2x10xf32, #tpu.memory_space<vmem>>, vector<2x10xf32>
    tpu.vector_store %arg6[%c0_160, %c0_161], %363 {strides = array<i32>} : memref<2x10xf32, #tpu.memory_space<vmem>>, vector<2x10xf32>,
    return
  }
  func.func @transform_0(%arg0: i32) -> (i32, i32, i32) {
    %c0_i32 = arith.constant 0 : i32
    %c0_i32_0 = arith.constant 0 : i32
    %c0_i32_1 = arith.constant 0 : i32
    %c0_i32_2 = arith.constant 0 : i32
    return %c0_i32, %c0_i32_0, %c0_i32_1 : i32, i32, i32
  }
  func.func @transform_1(%arg0: i32) -> (i32, i32) {
    %c0_i32 = arith.constant 0 : i32
    %c0_i32_0 = arith.constant 0 : i32
    %c0_i32_1 = arith.constant 0 : i32
    return %c0_i32, %c0_i32_0 : i32, i32
  }
  func.func @transform_2(%arg0: i32) -> (i32, i32) {
    %c0_i32 = arith.constant 0 : i32
    %c0_i32_0 = arith.constant 0 : i32
    %c0_i32_1 = arith.constant 0 : i32
    return %c0_i32, %c0_i32_0 : i32, i32
  }
  func.func @transform_3(%arg0: i32) -> (i32, i32, i32) {
    %c0_i32 = arith.constant 0 : i32
    %c0_i32_0 = arith.constant 0 : i32
    %c0_i32_1 = arith.constant 0 : i32
    %c0_i32_2 = arith.constant 0 : i32
    return %c0_i32, %c0_i32_0, %c0_i32_1 : i32, i32, i32
  }
  func.func @transform_4(%arg0: i32) -> (i32, i32) {
    %c0_i32 = arith.constant 0 : i32
    %c0_i32_0 = arith.constant 0 : i32
    %c0_i32_1 = arith.constant 0 : i32
    return %c0_i32, %c0_i32_0 : i32, i32
  }
  func.func @transform_5(%arg0: i32) -> (i32, i32) {
    %c0_i32 = arith.constant 0 : i32
    %c0_i32_0 = arith.constant 0 : i32
    %c0_i32_1 = arith.constant 0 : i32
    return %c0_i32, %c0_i32_0 : i32, i32
  }
}

</mosaic_0001>

<bundles_post_ra>
// kernel: squeeze.28
= control target key start
LH: loop header
LB: loop body
LE: loop exit
PB: predicated region body
PF: predicated region fallthrough
CT: control target
= control target key end

     0   :  { %s212_s10 = smov 64   ;;  %s213_s11 = smov 96   ;;  %vm3_vm0 = vcmask 261120   ;;  %vm17_vm1 = vcmask 1048320   ;;  %vm33_vm2 = vcmask 785920   ;;  %vm49_vm3 = vcmask 523520   ;;  %s297_s0 = inlined_call_operand.vmem [shape: f32[2,1,32,32], index: 0, kind: input, shape index: {}]   ;;  %s298_s1 = inlined_call_operand.vmem [shape: f32[2,1,1024], index: 1, kind: output, shape index: {}]  }
   0x1   :  { %v190_v0 = vld [vmem:[%s297_s0 + $0x2] ss:$4 sm:$0xff]   ;;  %v188_v1 = vld [vmem:[%s297_s0 + $0x3] ss:$4 sm:$0xff]   ;;  %v2_v4 = vld [vmem:[%s297_s0] ss:$4 sm:$0xff]  }
   0x2   :  { %31 = vrot.lane.b32.xlu1 %v190_v0, %s212_s10  ;;  %15 = vrot.lane.b32.xlu0 %v188_v1, %s213_s11  ;;  %v191_v2 = vld [vmem:[%s297_s0 + $0x22] ss:$4 sm:$0xff]   ;;  %v189_v3 = vld [vmem:[%s297_s0 + $0x23] ss:$4 sm:$0xff]  }
   0x3   :  { %v187_v5 = vld [vmem:[%s297_s0 + $0x20] ss:$4 sm:$0xff]   ;;  %4 = vst.msk [vmem:[#allocation0] ss:$8 sm:$0xf] %vm3_vm0, %v2_v4  }
   0x4   :  { %5 = vst.msk [vmem:[#allocation0] ss:$8 sm:$0xf0] %vm3_vm0, %v2_v4   ;;  %10 = vst.msk [vmem:[#allocation0 + $0x40] ss:$8 sm:$0xf] %vm3_vm0, %v187_v5  }
   0x5   :  { %12 = vst.msk [vmem:[#allocation0 + $0x40] ss:$8 sm:$0xf0] %vm3_vm0, %v187_v5   ;;  %v193_v6 = vld [vmem:[%s297_s0 + $0x21] ss:$4 sm:$0xff]  }
   0x6   :  { %38 = vrot.lane.b32.xlu1 %v191_v2, %s212_s10  ;;  %22 = vrot.lane.b32.xlu0 %v189_v3, %s213_s11  ;;  %v192_v7 = vld [vmem:[%s297_s0 + $0x1] ss:$4 sm:$0xff]   ;;  %s214_s0 = smov 32  }
   0xa   :  { %54 = vrot.lane.b32.xlu1 %v193_v6, %s214_s0  ;;  %47 = vrot.lane.b32.xlu0 %v192_v7, %s214_s0 }
  0x74   :  { %v32_v8 = vpop.permute.xlu1 %31   ;;  %v16_v9 = vpop.permute.xlu0 %15  }
  0x75   :  { %18 = vst.msk [vmem:[#allocation0] ss:$8 sm:$0xf] %vm17_vm1, %v16_v9   ;;  %19 = vst.msk [vmem:[#allocation0] ss:$8 sm:$0xf0] %vm17_vm1, %v16_v9  }
  0x76   :  { %34 = vst.msk [vmem:[#allocation0] ss:$8 sm:$0xf] %vm33_vm2, %v32_v8   ;;  %35 = vst.msk [vmem:[#allocation0] ss:$8 sm:$0xf0] %vm33_vm2, %v32_v8  }
  0x78   :  { %v39_v10 = vpop.permute.xlu1 %38   ;;  %v23_v11 = vpop.permute.xlu0 %22  }
  0x79   :  { %26 = vst.msk [vmem:[#allocation0 + $0x40] ss:$8 sm:$0xf] %vm17_vm1, %v23_v11   ;;  %28 = vst.msk [vmem:[#allocation0 + $0x40] ss:$8 sm:$0xf0] %vm17_vm1, %v23_v11  }
  0x7a   :  { %42 = vst.msk [vmem:[#allocation0 + $0x40] ss:$8 sm:$0xf] %vm33_vm2, %v39_v10   ;;  %44 = vst.msk [vmem:[#allocation0 + $0x40] ss:$8 sm:$0xf0] %vm33_vm2, %v39_v10  }
  0x7c   :  { %v55_v12 = vpop.permute.xlu1 %54   ;;  %v48_v13 = vpop.permute.xlu0 %47  }
  0x7d   :  { %58 = vst.msk [vmem:[#allocation0 + $0x40] ss:$8 sm:$0xf] %vm49_vm3, %v55_v12   ;;  %60 = vst.msk [vmem:[#allocation0 + $0x40] ss:$8 sm:$0xf0] %vm49_vm3, %v55_v12  }
  0x7e   :  { %50 = vst.msk [vmem:[#allocation0] ss:$8 sm:$0xf] %vm49_vm3, %v48_v13   ;;  %51 = vst.msk [vmem:[#allocation0] ss:$8 sm:$0xf0] %vm49_vm3, %v48_v13  }
  0x84   :  { %v118_v14 = vld [vmem:[#allocation0 + $0x40] sm:$0x1]  ;;  %v125_v15 = vld [vmem:[#allocation0 + $0x48] sm:$0x1]  ;;  %v132_v16 = vld [vmem:[#allocation0 + $0x50] sm:$0x1] }
  0x85   :  { %201 = vst [vmem:[%s298_s1 + $0x8] sm:$0x1] %v118_v14  ;;  %202 = vst [vmem:[%s298_s1 + $0x9] sm:$0x1] %v125_v15  ;;  %v139_v17 = vld [vmem:[#allocation0 + $0x58] sm:$0x1] }
  0x86   :  { %203 = vst [vmem:[%s298_s1 + $0xa] sm:$0x1] %v132_v16  ;;  %v146_v18 = vld [vmem:[#allocation0 + $0x60] sm:$0x1]  ;;  %v153_v19 = vld [vmem:[#allocation0 + $0x68] sm:$0x1] }
  0x87   :  { %204 = vst [vmem:[%s298_s1 + $0xb] sm:$0x1] %v139_v17  ;;  %205 = vst [vmem:[%s298_s1 + $0xc] sm:$0x1] %v146_v18  ;;  %v160_v20 = vld [vmem:[#allocation0 + $0x70] sm:$0x1] }
  0x88   :  { %206 = vst [vmem:[%s298_s1 + $0xd] sm:$0x1] %v153_v19  ;;  %v167_v21 = vld [vmem:[#allocation0 + $0x78] sm:$0x1]  ;;  %v65_v22 = vld [vmem:[#allocation0] sm:$0x1] }
  0x89   :  { %207 = vst [vmem:[%s298_s1 + $0xe] sm:$0x1] %v160_v20  ;;  %208 = vst [vmem:[%s298_s1 + $0xf] sm:$0x1] %v167_v21  ;;  %v70_v23 = vld [vmem:[#allocation0 + $0x8] sm:$0x1] }
  0x8a   :  { %68 = vst [vmem:[%s298_s1] sm:$0x1] %v65_v22  ;;  %v76_v24 = vld [vmem:[#allocation0 + $0x10] sm:$0x1]  ;;  %v83_v25 = vld [vmem:[#allocation0 + $0x18] sm:$0x1] }
  0x8b   :  { %194 = vst [vmem:[%s298_s1 + $0x1] sm:$0x1] %v70_v23  ;;  %195 = vst [vmem:[%s298_s1 + $0x2] sm:$0x1] %v76_v24  ;;  %v90_v26 = vld [vmem:[#allocation0 + $0x20] sm:$0x1] }
  0x8c   :  { %196 = vst [vmem:[%s298_s1 + $0x3] sm:$0x1] %v83_v25  ;;  %v97_v27 = vld [vmem:[#allocation0 + $0x28] sm:$0x1]  ;;  %v104_v28 = vld [vmem:[#allocation0 + $0x30] sm:$0x1] }
  0x8d   :  { %197 = vst [vmem:[%s298_s1 + $0x4] sm:$0x1] %v90_v26  ;;  %198 = vst [vmem:[%s298_s1 + $0x5] sm:$0x1] %v97_v27  ;;  %v111_v29 = vld [vmem:[#allocation0 + $0x38] sm:$0x1] }
  0x8e   :  { %199 = vst [vmem:[%s298_s1 + $0x6] sm:$0x1] %v104_v28  ;;  %200 = vst [vmem:[%s298_s1 + $0x7] sm:$0x1] %v111_v29 }

// kernel: victim_model_forward.1
= control target key start
LH: loop header
LB: loop body
LE: loop exit
PB: predicated region body
PF: predicated region fallthrough
CT: control target
= control target key end

     0   :  { %vm93_vm0 = vcmask 261120   ;;  %v3572_v17 = vmov 0.0   ;;  %s7039_s0 = inlined_call_operand.vmem [shape: f32[2,32,1024], index: 0, kind: input, shape index: {}]   ;;  %s7040_s1 = inlined_call_operand.vmem [shape: f32[32,32], index: 1, kind: input, shape index: {}]   ;;  %s7041_s2 = inlined_call_operand.vmem [shape: f32[32,1], index: 2, kind: input, shape index: {}]   ;;  %s7042_s3 = inlined_call_operand.vmem [shape: f32[10,32,1024], index: 3, kind: input, shape index: {}]   ;;  %s7043_s4 = inlined_call_operand.vmem [shape: f32[1,10], index: 4, kind: input, shape index: {}]   ;;  %s7044_s5 = inlined_call_operand.hbm [shape: f32[2,10], index: 5, kind: output, shape index: {}]  }
   0x1   :  { %v62_v0 = vld [vmem:[%s7039_s0 + $0xc8] sm:$0xff]  ;;  %v64_v1 = vld [vmem:[%s7039_s0 + $0xd8] sm:$0xff]  ;;  %v61_v2 = vld [vmem:[%s7039_s0 + $0xc0] sm:$0xff]  ;;  %170 = vmatprep.mubr.f32.mxu0 %v3572_v17  ;;  %259 = vmatprep.mubr.f32.mxu1 %v3572_v17 }
   0x2   :  { %130 = vmatprep.subr.mxu0 %v62_v0  ;;  %219 = vmatprep.subr.mxu1 %v64_v1  ;;  %v63_v3 = vld [vmem:[%s7039_s0 + $0xd0] sm:$0xff]  ;;  %v54_v4 = vld [vmem:[%s7039_s0 + $0x88] sm:$0xff]  ;;  %v56_v5 = vld [vmem:[%s7039_s0 + $0x98] sm:$0xff] }
   0x3   :  { %131 = vmatpush1.msra.mxu0 %v61_v2  ;;  %220 = vmatpush1.msra.mxu1 %v63_v3  ;;  %v53_v6 = vld [vmem:[%s7039_s0 + $0x80] sm:$0xff]  ;;  %v55_v7 = vld [vmem:[%s7039_s0 + $0x90] sm:$0xff]  ;;  %v46_v8 = vld [vmem:[%s7039_s0 + $0x48] sm:$0xff] }
   0x4   :  { %132 = vmatprep.subr.mxu0 %v54_v4  ;;  %221 = vmatprep.subr.mxu1 %v56_v5  ;;  %v48_v9 = vld [vmem:[%s7039_s0 + $0x58] sm:$0xff]  ;;  %v45_v10 = vld [vmem:[%s7039_s0 + $0x40] sm:$0xff]  ;;  %v47_v11 = vld [vmem:[%s7039_s0 + $0x50] sm:$0xff] }
   0x5   :  { %133 = vmatpush1.msra.mxu0 %v53_v6  ;;  %222 = vmatpush1.msra.mxu1 %v55_v7  ;;  %v38_v12 = vld [vmem:[%s7039_s0 + $0x8] sm:$0xff]  ;;  %v40_v13 = vld [vmem:[%s7039_s0 + $0x18] sm:$0xff]  ;;  %v37_v14 = vld [vmem:[%s7039_s0] sm:$0xff] }
   0x6   :  { %134 = vmatprep.subr.mxu0 %v46_v8  ;;  %223 = vmatprep.subr.mxu1 %v48_v9  ;;  %v39_v15 = vld [vmem:[%s7039_s0 + $0x10] sm:$0xff]  ;;  %v3656_v16 = vld [vmem:[%s7040_s1] sm:$0xff]  ;;  %v66_v18 = vld [vmem:[%s7039_s0 + $0xe8] sm:$0xff] }
   0x7   :  { %135 = vmatpush1.msra.mxu0 %v45_v10  ;;  %224 = vmatpush1.msra.mxu1 %v47_v11  ;;  %v65_v19 = vld [vmem:[%s7039_s0 + $0xe0] sm:$0xff]  ;;  %v58_v20 = vld [vmem:[%s7039_s0 + $0xa8] sm:$0xff]  ;;  %v68_v21 = vld [vmem:[%s7039_s0 + $0xf8] sm:$0xff] }
   0x8   :  { %136 = vmatprep.subr.mxu0 %v38_v12  ;;  %225 = vmatprep.subr.mxu1 %v40_v13  ;;  %v3680_v22 = vld [vmem:[%s7040_s1 + $0x8] sm:$0xff]  ;;  %v57_v23 = vld [vmem:[%s7039_s0 + $0xa0] sm:$0xff]  ;;  %v67_v24 = vld [vmem:[%s7039_s0 + $0xf0] sm:$0xff] }
   0x9   :  { %137 = vmatpush1.msra.mxu0 %v37_v14  ;;  %226 = vmatpush1.msra.mxu1 %v39_v15  ;;  %v50_v25 = vld [vmem:[%s7039_s0 + $0x68] sm:$0xff]  ;;  %v60_v26 = vld [vmem:[%s7039_s0 + $0xb8] sm:$0xff]  ;;  %v3702_v27 = vld [vmem:[%s7040_s1 + $0x10] sm:$0xff] }
   0xa   :  { %2873 = vmatmul.mubr.msk.f32.vlgmr.msra.gmra.mxu0 %vm93_vm0, %v3656_v16  ;;  %2877 = vmatmul.mubr.msk.f32.vlgmr.msra.gmra.mxu1 %vm93_vm0, %v3656_v16  ;;  %v49_v28 = vld [vmem:[%s7039_s0 + $0x60] sm:$0xff]  ;;  %v59_v29 = vld [vmem:[%s7039_s0 + $0xb0] sm:$0xff]  ;;  %v42_v30 = vld [vmem:[%s7039_s0 + $0x28] sm:$0xff] }
   0xb   :  { %308 = vmatprep.subr.mxu0 %v66_v18  ;;  %176 = vmatprep.mubr.f32.mxu0 %v3572_v17  ;;  %v52_v31 = vld [vmem:[%s7039_s0 + $0x78] sm:$0xff]  ;;  %v41_v33 = vld [vmem:[%s7039_s0 + $0x20] sm:$0xff]  ;;  %v51_v34 = vld [vmem:[%s7039_s0 + $0x70] sm:$0xff] }
   0xc   :  { %309 = vmatpush1.msra.mxu0 %v65_v19  ;;  %265 = vmatprep.mubr.f32.mxu1 %v3572_v17  ;;  %v3725_v32 = vld [vmem:[%s7040_s1 + $0x18] sm:$0xff]  ;;  %v43_v36 = vld [vmem:[%s7039_s0 + $0x30] sm:$0xff] }
   0xd   :  { %310 = vmatprep.subr.mxu0 %v58_v20  ;;  %397 = vmatprep.subr.mxu1 %v68_v21  ;;  %v44_v35 = vld [vmem:[%s7039_s0 + $0x38] sm:$0xff] }
   0xe   :  { %2874 = vmatmul.mubr.msk.f32.gmra.mxu0 %vm93_vm0, %v3680_v22  ;;  %2878 = vmatmul.mubr.msk.f32.gmra.mxu1 %vm93_vm0, %v3680_v22 }
   0xf   :  { %311 = vmatpush1.msra.mxu0 %v57_v23  ;;  %398 = vmatpush1.msra.mxu1 %v67_v24 }
  0x10   :  { %182 = vmatprep.mubr.f32.mxu0 %v3572_v17  ;;  %271 = vmatprep.mubr.f32.mxu1 %v3572_v17 }
  0x11   :  { %312 = vmatprep.subr.mxu0 %v50_v25  ;;  %399 = vmatprep.subr.mxu1 %v60_v26 }
  0x12   :  { %2875 = vmatmul.mubr.msk.f32.gmra.mxu0 %vm93_vm0, %v3702_v27  ;;  %2879 = vmatmul.mubr.msk.f32.gmra.mxu1 %vm93_vm0, %v3702_v27 }
  0x13   :  { %313 = vmatpush1.msra.mxu0 %v49_v28  ;;  %400 = vmatpush1.msra.mxu1 %v59_v29 }
  0x14   :  { %188 = vmatprep.mubr.f32.mxu0 %v3572_v17  ;;  %277 = vmatprep.mubr.f32.mxu1 %v3572_v17 }
  0x15   :  { %314 = vmatprep.subr.mxu0 %v42_v30  ;;  %401 = vmatprep.subr.mxu1 %v52_v31 }
  0x16   :  { %2876 = vmatmul.mubr.msk.f32.gmra.mxu0 %vm93_vm0, %v3725_v32  ;;  %2880 = vmatmul.mubr.msk.f32.gmra.mxu1 %vm93_vm0, %v3725_v32 }
  0x17   :  { %315 = vmatpush1.msra.mxu0 %v41_v33  ;;  %402 = vmatpush1.msra.mxu1 %v51_v34 }
  0x18   :  { %403 = vmatprep.subr.mxu1 %v44_v35  ;;  %348 = vmatprep.mubr.f32.mxu0 %v3572_v17 }
  0x19   :  { %10 = vsyncpa [#allocation3], 0  ;;  %404 = vmatpush1.msra.mxu1 %v43_v36  ;;  %437 = vmatprep.mubr.f32.mxu1 %v3572_v17  ;;  %v3202_v37 = vld [vmem:[%s7039_s0 + $0x1c8] sm:$0xff]  ;;  %v3204_v38 = vld [vmem:[%s7039_s0 + $0x1d8] sm:$0xff]  ;;  %v3573_v7 = vmov 0  }
  0x1a   :  { %2881 = vmatmul.mubr.msk.f32.vlgmr.msra.gmra.mxu0 %vm93_vm0, %v3656_v16  ;;  %2885 = vmatmul.mubr.msk.f32.vlgmr.msra.gmra.mxu1 %vm93_vm0, %v3656_v16  ;;  %v3201_v39 = vld [vmem:[%s7039_s0 + $0x1c0] sm:$0xff]  ;;  %v3203_v40 = vld [vmem:[%s7039_s0 + $0x1d0] sm:$0xff]  ;;  %v3194_v41 = vld [vmem:[%s7039_s0 + $0x188] sm:$0xff] }
  0x1b   :  { %354 = vmatprep.mubr.f32.mxu0 %v3572_v17  ;;  %443 = vmatprep.mubr.f32.mxu1 %v3572_v17  ;;  %v3196_v42 = vld [vmem:[%s7039_s0 + $0x198] sm:$0xff]  ;;  %v3193_v43 = vld [vmem:[%s7039_s0 + $0x180] sm:$0xff]  ;;  %v3195_v44 = vld [vmem:[%s7039_s0 + $0x190] sm:$0xff] }
  0x1c   :  { %1691 = vmatprep.subr.mxu0 %v3202_v37  ;;  %1780 = vmatprep.subr.mxu1 %v3204_v38  ;;  %v3186_v45 = vld [vmem:[%s7039_s0 + $0x148] sm:$0xff]  ;;  %v3188_v46 = vld [vmem:[%s7039_s0 + $0x158] sm:$0xff]  ;;  %v3185_v47 = vld [vmem:[%s7039_s0 + $0x140] sm:$0xff] }
  0x1d   :  { %1692 = vmatpush1.msra.mxu0 %v3201_v39  ;;  %1781 = vmatpush1.msra.mxu1 %v3203_v40  ;;  %v3187_v48 = vld [vmem:[%s7039_s0 + $0x150] sm:$0xff]  ;;  %v3178_v49 = vld [vmem:[%s7039_s0 + $0x108] sm:$0xff]  ;;  %v3180_v50 = vld [vmem:[%s7039_s0 + $0x118] sm:$0xff] }
  0x1e   :  { %2882 = vmatmul.mubr.msk.f32.gmra.mxu0 %vm93_vm0, %v3680_v22  ;;  %2886 = vmatmul.mubr.msk.f32.gmra.mxu1 %vm93_vm0, %v3680_v22  ;;  %v3177_v51 = vld [vmem:[%s7039_s0 + $0x100] sm:$0xff]  ;;  %v3179_v52 = vld [vmem:[%s7039_s0 + $0x110] sm:$0xff]  ;;  %v3206_v53 = vld [vmem:[%s7039_s0 + $0x1e8] sm:$0xff] }
  0x1f   :  { %360 = vmatprep.mubr.f32.mxu0 %v3572_v17  ;;  %449 = vmatprep.mubr.f32.mxu1 %v3572_v17  ;;  %v3208_v54 = vld [vmem:[%s7039_s0 + $0x1f8] sm:$0xff]  ;;  %v3205_v55 = vld [vmem:[%s7039_s0 + $0x1e0] sm:$0xff]  ;;  %v3207_v56 = vld [vmem:[%s7039_s0 + $0x1f0] sm:$0xff] }
  0x20   :  { %1693 = vmatprep.subr.mxu0 %v3194_v41  ;;  %1782 = vmatprep.subr.mxu1 %v3196_v42  ;;  %v3198_v57 = vld [vmem:[%s7039_s0 + $0x1a8] sm:$0xff]  ;;  %v3200_v58 = vld [vmem:[%s7039_s0 + $0x1b8] sm:$0xff]  ;;  %v3197_v59 = vld [vmem:[%s7039_s0 + $0x1a0] sm:$0xff] }
  0x21   :  { %1694 = vmatpush1.msra.mxu0 %v3193_v43  ;;  %1783 = vmatpush1.msra.mxu1 %v3195_v44  ;;  %v3199_v60 = vld [vmem:[%s7039_s0 + $0x1b0] sm:$0xff]  ;;  %v3190_v61 = vld [vmem:[%s7039_s0 + $0x168] sm:$0xff]  ;;  %v3192_v62 = vld [vmem:[%s7039_s0 + $0x178] sm:$0xff] }
  0x22   :  { %2883 = vmatmul.mubr.msk.f32.gmra.mxu0 %vm93_vm0, %v3702_v27  ;;  %2887 = vmatmul.mubr.msk.f32.gmra.mxu1 %vm93_vm0, %v3702_v27  ;;  %v3189_v63 = vld [vmem:[%s7039_s0 + $0x160] sm:$0xff]  ;;  %v3191_v0 = vld [vmem:[%s7039_s0 + $0x170] sm:$0xff]  ;;  %v3182_v1 = vld [vmem:[%s7039_s0 + $0x128] sm:$0xff] }
  0x23   :  { %366 = vmatprep.mubr.f32.mxu0 %v3572_v17  ;;  %455 = vmatprep.mubr.f32.mxu1 %v3572_v17  ;;  %v3184_v2 = vld [vmem:[%s7039_s0 + $0x138] sm:$0xff]  ;;  %v3181_v3 = vld [vmem:[%s7039_s0 + $0x120] sm:$0xff]  ;;  %v3183_v4 = vld [vmem:[%s7039_s0 + $0x130] sm:$0xff] }
  0x24   :  { %1695 = vmatprep.subr.mxu0 %v3186_v45  ;;  %1784 = vmatprep.subr.mxu1 %v3188_v46  ;;  %v69_v5 = vld [vmem:[%s7041_s2] sm:$0xff]  ;;  %v71_v6 = vld [vmem:[%s7041_s2 + $0x10] sm:$0xff]  ;;  %v70_v8 = vld [vmem:[%s7041_s2 + $0x8] sm:$0xff] }
  0x25   :  { %1696 = vmatpush1.msra.mxu0 %v3185_v47  ;;  %1785 = vmatpush1.msra.mxu1 %v3187_v48  ;;  %v72_v9 = vld [vmem:[%s7041_s2 + $0x18] sm:$0xff]  ;;  %v2889_v21 = vld [vmem:[%s7042_s3 + $0x100] sm:$0xff]  ;;  %v2890_v24 = vld [vmem:[%s7042_s3 + $0x108] sm:$0xff] }
  0x26   :  { %2884 = vmatmul.mubr.msk.f32.gmra.mxu0 %vm93_vm0, %v3725_v32  ;;  %2888 = vmatmul.mubr.msk.f32.gmra.mxu1 %vm93_vm0, %v3725_v32  ;;  %v2891_v25 = vld [vmem:[%s7042_s3 + $0x110] sm:$0xff]  ;;  %v494_v26 = vld [vmem:[%s7042_s3] sm:$0xff]  ;;  %v495_v28 = vld [vmem:[%s7042_s3 + $0x8] sm:$0xff] }
  0x27   :  { %1697 = vmatprep.subr.mxu0 %v3178_v49  ;;  %1786 = vmatprep.subr.mxu1 %v3180_v50  ;;  %v2921_v29 = vld [vmem:[%s7042_s3 + $0x200] sm:$0xff]  ;;  %v2922_v30 = vld [vmem:[%s7042_s3 + $0x208] sm:$0xff]  ;;  %v496_v34 = vld [vmem:[%s7042_s3 + $0x10] sm:$0xff] }
  0x28   :  { %1698 = vmatpush1.msra.mxu0 %v3177_v51  ;;  %1731 = vmatprep.mubr.f32.mxu0 %v3572_v17  ;;  %v2923_v35 = vld [vmem:[%s7042_s3 + $0x210] sm:$0xff]  ;;  %v3049_v41 = vld [vmem:[%s7042_s3 + $0x600] sm:$0xff]  ;;  %v3050_v42 = vld [vmem:[%s7042_s3 + $0x608] sm:$0xff] }
  0x29   :  { %1787 = vmatpush1.msra.mxu1 %v3179_v52  ;;  %1820 = vmatprep.mubr.f32.mxu1 %v3572_v17  ;;  %v2892_v46 = vld [vmem:[%s7042_s3 + $0x118] sm:$0xff]  ;;  %v3051_v50 = vld [vmem:[%s7042_s3 + $0x610] sm:$0xff] }
  0x2a   :  { %3209 = vmatmul.mubr.msk.f32.vlgmr.msra.gmra.mxu0 %vm93_vm0, %v3656_v16  ;;  %3213 = vmatmul.mubr.msk.f32.vlgmr.msra.gmra.mxu1 %vm93_vm0, %v3656_v16 }
  0x2b   :  { %1737 = vmatprep.mubr.f32.mxu0 %v3572_v17  ;;  %1826 = vmatprep.mubr.f32.mxu1 %v3572_v17 }
  0x2c   :  { %1869 = vmatprep.subr.mxu0 %v3206_v53  ;;  %1958 = vmatprep.subr.mxu1 %v3208_v54  ;;  %v497_v54 = vld [vmem:[%s7042_s3 + $0x18] sm:$0xff] }
  0x2d   :  { %1870 = vmatpush1.msra.mxu0 %v3205_v55  ;;  %1959 = vmatpush1.msra.mxu1 %v3207_v56  ;;  %v2924_v56 = vld [vmem:[%s7042_s3 + $0x218] sm:$0xff] }
  0x2e   :  { %3210 = vmatmul.mubr.msk.f32.gmra.mxu0 %vm93_vm0, %v3680_v22  ;;  %3214 = vmatmul.mubr.msk.f32.gmra.mxu1 %vm93_vm0, %v3680_v22 }
  0x2f   :  { %1743 = vmatprep.mubr.f32.mxu0 %v3572_v17  ;;  %1832 = vmatprep.mubr.f32.mxu1 %v3572_v17 }
  0x30   :  { %1871 = vmatprep.subr.mxu0 %v3198_v57  ;;  %1960 = vmatprep.subr.mxu1 %v3200_v58 }
  0x31   :  { %1872 = vmatpush1.msra.mxu0 %v3197_v59  ;;  %1961 = vmatpush1.msra.mxu1 %v3199_v60 }
  0x32   :  { %3211 = vmatmul.mubr.msk.f32.gmra.mxu0 %vm93_vm0, %v3702_v27  ;;  %3215 = vmatmul.mubr.msk.f32.gmra.mxu1 %vm93_vm0, %v3702_v27 }
  0x33   :  { %1749 = vmatprep.mubr.f32.mxu0 %v3572_v17  ;;  %1838 = vmatprep.mubr.f32.mxu1 %v3572_v17 }
  0x34   :  { %1873 = vmatprep.subr.mxu0 %v3190_v61  ;;  %1962 = vmatprep.subr.mxu1 %v3192_v62 }
  0x35   :  { %1874 = vmatpush1.msra.mxu0 %v3189_v63  ;;  %1963 = vmatpush1.msra.mxu1 %v3191_v0  ;;  %v2953_v0 = vld [vmem:[%s7042_s3 + $0x300] sm:$0xff] }
  0x36   :  { %3212 = vmatmul.mubr.msk.f32.gmra.mxu0 %vm93_vm0, %v3725_v32  ;;  %3216 = vmatmul.mubr.msk.f32.gmra.mxu1 %vm93_vm0, %v3725_v32 }
  0x37   :  { %1875 = vmatprep.subr.mxu0 %v3182_v1  ;;  %1964 = vmatprep.subr.mxu1 %v3184_v2  ;;  %v2954_v1 = vld [vmem:[%s7042_s3 + $0x308] sm:$0xff] }
  0x38   :  { %1876 = vmatpush1.msra.mxu0 %v3181_v3  ;;  %1909 = vmatprep.mubr.f32.mxu0 %v3572_v17 }
  0x39   :  { %1965 = vmatpush1.msra.mxu1 %v3183_v4  ;;  %1998 = vmatprep.mubr.f32.mxu1 %v3572_v17 }
  0x3a   :  { %3217 = vmatmul.mubr.msk.f32.vlgmr.msra.gmra.mxu0 %vm93_vm0, %v3656_v16  ;;  %3221 = vmatmul.mubr.msk.f32.vlgmr.msra.gmra.mxu1 %vm93_vm0, %v3656_v16 }
  0x3b   :  { %1915 = vmatprep.mubr.f32.mxu0 %v3572_v17  ;;  %2004 = vmatprep.mubr.f32.mxu1 %v3572_v17 }
  0x3c   :  { %3228 = vset.pattern.permute.xlu0 %v3573_v7  ;;  %3229 = vset.pattern.permute.xlu1 %v3573_v7  ;;  %v2955_v7 = vld [vmem:[%s7042_s3 + $0x310] sm:$0xff] }
  0x3d   :  { %75 = vperm.xlu0 %3228, %v69_v5   ;;  %85 = vperm.xlu1 %3229, %v71_v6   ;;  %v3052_v5 = vld [vmem:[%s7042_s3 + $0x618] sm:$0xff] }
  0x3e   :  { %3218 = vmatmul.mubr.msk.f32.gmra.mxu0 %vm93_vm0, %v3680_v22  ;;  %3222 = vmatmul.mubr.msk.f32.gmra.mxu1 %vm93_vm0, %v3680_v22 }
  0x3f   :  { %1921 = vmatprep.mubr.f32.mxu0 %v3572_v17  ;;  %2010 = vmatprep.mubr.f32.mxu1 %v3572_v17 }
  0x41   :  { %80 = vperm.xlu0 %3228, %v70_v8   ;;  %90 = vperm.xlu1 %3229, %v72_v9  }
  0x42   :  { %3219 = vmatmul.mubr.msk.f32.gmra.mxu0 %vm93_vm0, %v3702_v27  ;;  %3223 = vmatmul.mubr.msk.f32.gmra.mxu1 %vm93_vm0, %v3702_v27 }
  0x43   :  { %1927 = vmatprep.mubr.f32.mxu0 %v3572_v17  ;;  %2016 = vmatprep.mubr.f32.mxu1 %v3572_v17 }
  0x46   :  { %3220 = vmatmul.mubr.msk.f32.gmra.mxu0 %vm93_vm0, %v3725_v32  ;;  %3224 = vmatmul.mubr.msk.f32.gmra.mxu1 %vm93_vm0, %v3725_v32 }
  0xb8   :  { %v3925_v10 = vpop.permute.xlu0 %75  ;;  %v3997_v52 = vpop.permute.xlu1 %85 }
  0xbc   :  { %v3970_v36 = vpop.permute.xlu0 %80 }
  0xca   :  { %v172_v11 = vpop.f32.mrf.mxu0  ;;  %v261_v12 = vpop.f32.mrf.mxu1 }
  0xcb   :  { %v173_v13 = vadd.f32 %v172_v11, %v3925_v10  ;;  %v262_v14 = vadd.f32 %v261_v12, %v3925_v10 }
  0xcc   :  { %v174_v15 = vpop.f32.mrf.mxu0  ;;  %v263_v16 = vpop.f32.mrf.mxu1 }
  0xcd   :  { %v175_v18 = vadd.f32 %v174_v15, %v3925_v10  ;;  %v264_v17 = vadd.f32 %v263_v16, %v3925_v10  ;;  %v3931_v19 = vmax.f32 %v173_v13, 0.0  ;;  %v3933_v20 = vmax.f32 %v262_v14, 0.0 }
  0xce   :  { %v3938_v22 = vpop.f32.mrf.mxu0  ;;  %v3940_v23 = vpop.f32.mrf.mxu1 }
  0xcf   :  { %v3951_v27 = vmax.f32 %v175_v18, 0.0  ;;  %v3962_v31 = vmax.f32 %v264_v17, 0.0  ;;  %v641_v37 = vmul.f32 %v2889_v21, %v3931_v19  ;;  %v643_v39 = vmul.f32 %v2891_v25, %v3933_v20  ;;  %v3081_v21 = vld [vmem:[%s7042_s3 + $0x700] sm:$0xff] }
  0xd0   :  { %v180_v32 = vpop.f32.mrf.mxu0  ;;  %v269_v33 = vpop.f32.mrf.mxu1  ;;  %v526_v40 = vmul.f32 %v494_v26, %v3931_v19  ;;  %v755_v48 = vmul.f32 %v2921_v29, %v3931_v19  ;;  %v528_v55 = vmul.f32 %v496_v34, %v3933_v20  ;;  %v757_v57 = vmul.f32 %v2923_v35, %v3933_v20 }
  0xd1   :  { %v642_v38 = vmul.f32 %v2890_v24, %v3951_v27  ;;  %v181_v43 = vadd.f32 %v180_v32, %v3970_v36  ;;  %v527_v47 = vmul.f32 %v495_v28, %v3951_v27  ;;  %v756_v49 = vmul.f32 %v2922_v30, %v3951_v27  ;;  %v3082_v24 = vld [vmem:[%s7042_s3 + $0x708] sm:$0xff]  ;;  %v4049_v35 = vpop.permute.xlu1 %90 }
  0xd2   :  { %v3983_v44 = vpop.f32.mrf.mxu0  ;;  %v3985_v45 = vpop.f32.mrf.mxu1  ;;  %v270_v51 = vadd.f32 %v269_v33, %v3970_v36  ;;  %v1211_v62 = vmul.f32 %v3049_v41, %v3931_v19  ;;  %v1212_v63 = vmul.f32 %v3050_v42, %v3951_v27  ;;  %v644_v4 = vmul.f32 %v2892_v46, %v3962_v31  ;;  %v2956_v46 = vld [vmem:[%s7042_s3 + $0x318] sm:$0xff] }
  0xd3   :  { %v673_v53 = vadd.f32 %v642_v38, %v641_v37  ;;  %v558_v60 = vadd.f32 %v527_v47, %v526_v40  ;;  %v787_v61 = vadd.f32 %v756_v49, %v755_v48  ;;  %v1213_v6 = vmul.f32 %v3051_v50, %v3933_v20 }
  0xd4   :  { %v186_v58 = vpop.f32.mrf.mxu0  ;;  %v275_v59 = vpop.f32.mrf.mxu1  ;;  %v4025_v8 = vmax.f32 %v181_v43, 0.0  ;;  %v529_v12 = vmul.f32 %v497_v54, %v3962_v31  ;;  %v758_v13 = vmul.f32 %v2924_v56, %v3962_v31  ;;  %v1243_v14 = vadd.f32 %v1212_v63, %v1211_v62  ;;  %v3084_v54 = vld [vmem:[%s7042_s3 + $0x718] sm:$0xff] }
  0xd5   :  { %v187_v2 = vadd.f32 %v186_v58, %v3997_v52  ;;  %v276_v3 = vadd.f32 %v275_v59, %v3997_v52  ;;  %v674_v15 = vadd.f32 %v673_v53, %v643_v39  ;;  %v559_v16 = vadd.f32 %v558_v60, %v528_v55  ;;  %v3083_v39 = vld [vmem:[%s7042_s3 + $0x710] sm:$0xff] }
  0xd6   :  { %v4027_v9 = vpop.f32.mrf.mxu0  ;;  %v4029_v11 = vpop.f32.mrf.mxu1  ;;  %v869_v18 = vmul.f32 %v2953_v0, %v3931_v19  ;;  %v870_v17 = vmul.f32 %v2954_v1, %v3951_v27  ;;  %v4041_v25 = vmax.f32 %v270_v51, 0.0  ;;  %v788_v29 = vadd.f32 %v787_v61, %v757_v57  ;;  %v2985_v61 = vld [vmem:[%s7042_s3 + $0x400] sm:$0xff] }
  0xd7   :  { %v1214_v30 = vmul.f32 %v3052_v5, %v3962_v31  ;;  %v871_v32 = vmul.f32 %v2955_v7, %v3933_v20  ;;  %v4045_v33 = vmax.f32 %v187_v2, 0.0  ;;  %v4047_v34 = vmax.f32 %v276_v3, 0.0  ;;  %v2893_v1 = vld [vmem:[%s7042_s3 + $0x120] sm:$0xff] }
  0xd8   :  { %v192_v26 = vpop.f32.mrf.mxu0  ;;  %v281_v28 = vpop.f32.mrf.mxu1  ;;  %v1244_v37 = vadd.f32 %v1243_v14, %v1213_v6  ;;  %v901_v38 = vadd.f32 %v870_v17, %v869_v18  ;;  %v1325_v47 = vmul.f32 %v3081_v21, %v3931_v19  ;;  %v1326_v48 = vmul.f32 %v3082_v24, %v3951_v27  ;;  %v498_v2 = vld [vmem:[%s7042_s3 + $0x20] sm:$0xff]  ;;  %v2894_v18 = vld [vmem:[%s7042_s3 + $0x128] sm:$0xff] }
  0xd9   :  { %v193_v40 = vadd.f32 %v192_v26, %v4049_v35  ;;  %v282_v41 = vadd.f32 %v281_v28, %v4049_v35  ;;  %v675_v51 = vadd.f32 %v674_v15, %v644_v4  ;;  %v560_v53 = vadd.f32 %v559_v16, %v529_v12  ;;  %v2986_v4 = vld [vmem:[%s7042_s3 + $0x408] sm:$0xff] }
  0xda   :  { %v350_v42 = vpop.f32.mrf.mxu0  ;;  %v439_v43 = vpop.f32.mrf.mxu1  ;;  %v4066_v57 = vadd.f32 %v788_v29, %v758_v13  ;;  %v902_v58 = vadd.f32 %v901_v38, %v871_v32  ;;  %v1327_v59 = vmul.f32 %v3083_v39, %v3933_v20  ;;  %v1357_v60 = vadd.f32 %v1326_v48, %v1325_v47  ;;  %v499_v17 = vld [vmem:[%s7042_s3 + $0x28] sm:$0xff]  ;;  %v2895_v29 = vld [vmem:[%s7042_s3 + $0x130] sm:$0xff]  ;;  %v2925_v47 = vld [vmem:[%s7042_s3 + $0x220] sm:$0xff] }
  0xdb   :  { %v351_v49 = vadd.f32 %v350_v42, %v3925_v10  ;;  %v440_v50 = vadd.f32 %v439_v43, %v3925_v10  ;;  %v872_v3 = vmul.f32 %v2956_v46, %v3962_v31  ;;  %v4086_v5 = vmax.f32 %v193_v40, 0.0  ;;  %v500_v32 = vld [vmem:[%s7042_s3 + $0x30] sm:$0xff] }
  0xdc   :  { %v352_v55 = vpop.f32.mrf.mxu0  ;;  %v441_v56 = vpop.f32.mrf.mxu1  ;;  %v4088_v6 = vmax.f32 %v282_v41, 0.0  ;;  %v4090_v13 = vadd.f32 %v1244_v37, %v1214_v30  ;;  %v4093_v14 = vmul.f32 %v3084_v54, %v3962_v31  ;;  %v4108_v24 = vmul.f32 %v2985_v61, %v3931_v19  ;;  %v2987_v39 = vld [vmem:[%s7042_s3 + $0x410] sm:$0xff]  ;;  %v2896_v54 = vld [vmem:[%s7042_s3 + $0x138] sm:$0xff] }
  0xdd   :  { %v4072_v62 = vmax.f32 %v351_v49, 0.0  ;;  %v353_v63 = vadd.f32 %v352_v55, %v3925_v10  ;;  %v442_v0 = vadd.f32 %v441_v56, %v3925_v10  ;;  %7070 = vst [vmem:[#allocation5_spill] sm:$0xff] %v4086_v5  ;;  %v4095_v15 = vmax.f32 %v440_v50, 0.0 }
  0xde   :  { %7071 = vst [vmem:[#allocation6_spill] sm:$0xff] %v4088_v6  ;;  %v356_v7 = vpop.f32.mrf.mxu0  ;;  %v445_v12 = vpop.f32.mrf.mxu1  ;;  %v4105_v21 = vadd.f32 %v902_v58, %v872_v3  ;;  %v4118_v38 = vadd.f32 %v1357_v60, %v1327_v59  ;;  %v4124_v40 = vmul.f32 %v2986_v4, %v3951_v27  ;;  %v501_v4 = vld [vmem:[%s7042_s3 + $0x38] sm:$0xff] }
  0xdf   :  { %v4097_v16 = vmax.f32 %v353_v63, 0.0  ;;  %v645_v30 = vmul.f32 %v2893_v1, %v4072_v62  ;;  %v530_v37 = vmul.f32 %v498_v2, %v4072_v62  ;;  %v4126_v41 = vmax.f32 %v442_v0, 0.0  ;;  %v2926_v63 = vld [vmem:[%s7042_s3 + $0x228] sm:$0xff] }
  0xe0   :  { %v358_v26 = vpop.f32.mrf.mxu0  ;;  %v447_v28 = vpop.f32.mrf.mxu1  ;;  %v357_v42 = vadd.f32 %v356_v7, %v3970_v36  ;;  %v446_v43 = vadd.f32 %v445_v12, %v3970_v36  ;;  %v647_v60 = vmul.f32 %v2895_v29, %v4095_v15  ;;  %v532_v61 = vmul.f32 %v500_v32, %v4095_v15 }
  0xe1   :  { %v359_v46 = vadd.f32 %v358_v26, %v3970_v36  ;;  %v448_v48 = vadd.f32 %v447_v28, %v3970_v36  ;;  %v646_v55 = vmul.f32 %v2894_v18, %v4097_v16  ;;  %v676_v56 = vadd.f32 %v675_v51, %v645_v30 }
  0xe2   :  { %v362_v49 = vpop.f32.mrf.mxu0  ;;  %v451_v50 = vpop.f32.mrf.mxu1  ;;  %v531_v58 = vmul.f32 %v499_v17, %v4097_v16  ;;  %v4147_v0 = vmul.f32 %v2987_v39, %v3933_v20  ;;  %v561_v7 = vadd.f32 %v560_v53, %v530_v37  ;;  %v759_v12 = vmul.f32 %v2925_v47, %v4072_v62  ;;  %v2927_v53 = vld [vmem:[%s7042_s3 + $0x230] sm:$0xff] }
  0xe3   :  { %v363_v59 = vadd.f32 %v362_v49, %v3997_v52  ;;  %v452_v1 = vadd.f32 %v451_v50, %v3997_v52  ;;  %v677_v51 = vadd.f32 %v676_v56, %v646_v55  ;;  %v4154_v18 = vmax.f32 %v357_v42, 0.0  ;;  %v3054_v50 = vld [vmem:[%s7042_s3 + $0x628] sm:$0xff] }
  0xe4   :  { %v364_v2 = vpop.f32.mrf.mxu0  ;;  %v453_v3 = vpop.f32.mrf.mxu1  ;;  %v4156_v17 = vmax.f32 %v446_v43, 0.0  ;;  %v4158_v26 = vmax.f32 %v359_v46, 0.0  ;;  %v648_v28 = vmul.f32 %v2896_v54, %v4126_v41  ;;  %v4161_v29 = vmax.f32 %v448_v48, 0.0  ;;  %v3053_v48 = vld [vmem:[%s7042_s3 + $0x620] sm:$0xff] }
  0xe5   :  { %v678_v39 = vadd.f32 %v677_v51, %v647_v60  ;;  %v562_v49 = vadd.f32 %v561_v7, %v531_v58  ;;  %v760_v37 = vmul.f32 %v2926_v63, %v4097_v16  ;;  %v4167_v42 = vmax.f32 %v363_v59, 0.0  ;;  %v2928_v60 = vld [vmem:[%s7042_s3 + $0x238] sm:$0xff] }
  0xe6   :  { %v368_v30 = vpop.f32.mrf.mxu0  ;;  %v457_v32 = vpop.f32.mrf.mxu1  ;;  %v365_v43 = vadd.f32 %v364_v2, %v3997_v52  ;;  %v454_v46 = vadd.f32 %v453_v3, %v3997_v52  ;;  %v533_v47 = vmul.f32 %v501_v4, %v4126_v41  ;;  %v4178_v54 = vmax.f32 %v452_v1, 0.0 }
  0xe7   :  { %v679_v58 = vadd.f32 %v678_v39, %v648_v28  ;;  %v563_v59 = vadd.f32 %v562_v49, %v532_v61  ;;  %v790_v63 = vadd.f32 %v4066_v57, %v759_v12  ;;  %v369_v2 = vadd.f32 %v368_v30, %v4049_v35  ;;  %v3055_v61 = vld [vmem:[%s7042_s3 + $0x630] sm:$0xff] }
  0xe8   :  { %v370_v55 = vpop.f32.mrf.mxu0  ;;  %v459_v56 = vpop.f32.mrf.mxu1  ;;  %v458_v3 = vadd.f32 %v457_v32, %v4049_v35  ;;  %v761_v4 = vmul.f32 %v2927_v53, %v4095_v15  ;;  %v1215_v39 = vmul.f32 %v3053_v48, %v4072_v62  ;;  %v1216_v57 = vmul.f32 %v3054_v50, %v4097_v16  ;;  %v2957_v53 = vld [vmem:[%s7042_s3 + $0x320] sm:$0xff] }
  0xe9   :  { %v371_v51 = vadd.f32 %v370_v55, %v4049_v35  ;;  %680 = vadd.xlane.f32.xlu1 %v679_v58  ;;  %v564_v1 = vadd.f32 %v563_v59, %v533_v47  ;;  %v791_v28 = vadd.f32 %v790_v63, %v760_v37  ;;  %v4193_v12 = vmax.f32 %v365_v43, 0.0  ;;  %v2958_v37 = vld [vmem:[%s7042_s3 + $0x328] sm:$0xff]  ;;  %v3056_v55 = vld [vmem:[%s7042_s3 + $0x638] sm:$0xff] }
  0xea   :  { %v1733_v7 = vpop.f32.mrf.mxu0  ;;  %v1822_v6 = vpop.f32.mrf.mxu1  ;;  %v4195_v30 = vmax.f32 %v454_v46, 0.0  ;;  %v460_v32 = vadd.f32 %v459_v56, %v4049_v35  ;;  %v762_v49 = vmul.f32 %v2928_v60, %v4126_v41  ;;  %v1246_v56 = vadd.f32 %v4090_v13, %v1215_v39  ;;  %v3085_v39 = vld [vmem:[%s7042_s3 + $0x720] sm:$0xff] }
  0xeb   :  { %565 = vadd.xlane.f32.xlu0 %v564_v1  ;;  %v1734_v47 = vadd.f32 %v1733_v7, %v3925_v10  ;;  %v1823_v43 = vadd.f32 %v1822_v6, %v3925_v10  ;;  %v792_v50 = vadd.f32 %v791_v28, %v761_v4  ;;  %v4211_v58 = vmax.f32 %v369_v2, 0.0  ;;  %v2959_v4 = vld [vmem:[%s7042_s3 + $0x330] sm:$0xff] }
  0xec   :  { %v1735_v48 = vpop.f32.mrf.mxu0  ;;  %v1824_v46 = vpop.f32.mrf.mxu1  ;;  %v4213_v59 = vmax.f32 %v458_v3, 0.0  ;;  %v4215_v60 = vmax.f32 %v371_v51, 0.0  ;;  %v1217_v63 = vmul.f32 %v3055_v61, %v4095_v15  ;;  %v1247_v7 = vadd.f32 %v1246_v56, %v1216_v57 }
  0xed   :  { %v793_v1 = vadd.f32 %v792_v50, %v762_v49  ;;  %v873_v28 = vmul.f32 %v2957_v53, %v4072_v62  ;;  %v874_v13 = vmul.f32 %v2958_v37, %v4097_v16  ;;  %v4223_v2 = vmax.f32 %v460_v32, 0.0  ;;  %v2960_v32 = vld [vmem:[%s7042_s3 + $0x338] sm:$0xff] }
  0xee   :  { %7072 = vst [vmem:[#allocation7_spill] sm:$0xff] %v4213_v59  ;;  %7073 = vst [vmem:[#allocation8_spill] sm:$0xff] %v4215_v60  ;;  %v1739_v6 = vpop.f32.mrf.mxu0  ;;  %v1828_v5 = vpop.f32.mrf.mxu1  ;;  %v1736_v3 = vadd.f32 %v1735_v48, %v3925_v10  ;;  %v1825_v51 = vadd.f32 %v1824_v46, %v3925_v10  ;;  %v1218_v61 = vmul.f32 %v3056_v55, %v4126_v41  ;;  %v4231_v57 = vmax.f32 %v1734_v47, 0.0  ;;  %v3086_v46 = vld [vmem:[%s7042_s3 + $0x728] sm:$0xff] }
  0xef   :  { %7074 = vst [vmem:[#allocation9_spill] sm:$0xff] %v4223_v2  ;;  %v4233_v49 = vmax.f32 %v1823_v43, 0.0  ;;  %794 = vadd.xlane.f32.xlu1 %v793_v1  ;;  %v1248_v53 = vadd.f32 %v1247_v7, %v1217_v63  ;;  %v904_v48 = vadd.f32 %v4105_v21, %v873_v28  ;;  %v1740_v55 = vadd.f32 %v1739_v6, %v3970_v36 }
  0xf0   :  { %7075 = vst [vmem:[#allocation10_spill] sm:$0xff] %v4231_v57  ;;  %v1741_v50 = vpop.f32.mrf.mxu0  ;;  %v1830_v37 = vpop.f32.mrf.mxu1  ;;  %v1829_v47 = vadd.f32 %v1828_v5, %v3970_v36  ;;  %v875_v56 = vmul.f32 %v2959_v4, %v4095_v15  ;;  %v4248_v28 = vmax.f32 %v1736_v3, 0.0  ;;  %v4250_v2 = vmax.f32 %v1825_v51, 0.0  ;;  %v3087_v5 = vld [vmem:[%s7042_s3 + $0x730] sm:$0xff] }
  0xf1   :  { %7076 = vst [vmem:[#allocation11_spill] sm:$0xff] %v4233_v49  ;;  %v1742_v43 = vadd.f32 %v1741_v50, %v3970_v36  ;;  %v1249_v63 = vadd.f32 %v1248_v53, %v1218_v61  ;;  %v1831_v1 = vadd.f32 %v1830_v37, %v3970_v36  ;;  %v905_v7 = vadd.f32 %v904_v48, %v874_v13  ;;  %v3088_v13 = vld [vmem:[%s7042_s3 + $0x738] sm:$0xff] }
  0xf2   :  { %v1329_v49 = vmul.f32 %v3085_v39, %v4072_v62  ;;  %v1745_v57 = vpop.f32.mrf.mxu0  ;;  %v1834_v21 = vpop.f32.mrf.mxu1  ;;  %7077 = vst [vmem:[#allocation12_spill] sm:$0xff] %v4248_v28  ;;  %7078 = vst [vmem:[#allocation13_spill] sm:$0xff] %v4250_v2  ;;  %v876_v6 = vmul.f32 %v2960_v32, %v4126_v41  ;;  %v1330_v4 = vmul.f32 %v3086_v46, %v4097_v16  ;;  %v2988_v37 = vld [vmem:[%s7042_s3 + $0x418] sm:$0xff]  ;;  %v2989_v32 = vld [vmem:[%s7042_s3 + $0x420] sm:$0xff]  ;;  %v4270_v48 = vmax.f32 %v1740_v55, 0.0 }
  0xf3   :  { %1250 = vadd.xlane.f32.xlu0 %v1249_v63  ;;  %v906_v61 = vadd.f32 %v905_v7, %v875_v56  ;;  %v1359_v3 = vadd.f32 %v4118_v38, %v4093_v14  ;;  %v1746_v51 = vadd.f32 %v1745_v57, %v3997_v52  ;;  %v1835_v39 = vadd.f32 %v1834_v21, %v3997_v52  ;;  %v3113_v21 = vld [vmem:[%s7042_s3 + $0x800] sm:$0xff]  ;;  %v3114_v55 = vld [vmem:[%s7042_s3 + $0x808] sm:$0xff] }
  0xf4   :  { %v1747_v53 = vpop.f32.mrf.mxu0  ;;  %v1836_v50 = vpop.f32.mrf.mxu1  ;;  %7079 = vst [vmem:[#allocation14_spill] sm:$0xff] %v4270_v48  ;;  %v4272_v46 = vmax.f32 %v1829_v47, 0.0  ;;  %v4274_v56 = vmax.f32 %v1742_v43, 0.0  ;;  %v4277_v38 = vmax.f32 %v1831_v1, 0.0  ;;  %v3115_v47 = vld [vmem:[%s7042_s3 + $0x810] sm:$0xff]  ;;  %v1331_v1 = vmul.f32 %v3087_v5, %v4095_v15 }
  0xf5   :  { %v1748_v14 = vadd.f32 %v1747_v53, %v3997_v52  ;;  %v907_v57 = vadd.f32 %v906_v61, %v876_v6  ;;  %v1360_v63 = vadd.f32 %v1359_v3, %v1329_v49  ;;  %v1837_v7 = vadd.f32 %v1836_v50, %v3997_v52  ;;  %v2990_v49 = vld [vmem:[%s7042_s3 + $0x428] sm:$0xff]  ;;  %v2991_v5 = vld [vmem:[%s7042_s3 + $0x430] sm:$0xff] }
  0xf6   :  { %7080 = vst [vmem:[#allocation15_spill] sm:$0xff] %v4272_v46  ;;  %7081 = vst [vmem:[#allocation16_spill] sm:$0xff] %v4274_v56  ;;  %v1751_v43 = vpop.f32.mrf.mxu0  ;;  %v1332_v6 = vmul.f32 %v3088_v13, %v4126_v41  ;;  %v986_v61 = vmul.f32 %v2988_v37, %v3962_v31  ;;  %v987_v3 = vmul.f32 %v2989_v32, %v4072_v62  ;;  %v4296_v50 = vmax.f32 %v1746_v51, 0.0  ;;  %v2992_v13 = vld [vmem:[%s7042_s3 + $0x438] sm:$0xff]  ;;  %v1840_v37 = vpop.f32.mrf.mxu1  ;;  %v3146_v46 = vld [vmem:[%s7042_s3 + $0x908] sm:$0xff] }
  0xf7   :  { %7082 = vst [vmem:[#allocation17_spill] sm:$0xff] %v4277_v38  ;;  %908 = vadd.xlane.f32.xlu1 %v907_v57  ;;  %v1361_v53 = vadd.f32 %v1360_v63, %v1330_v4  ;;  %v4298_v2 = vmax.f32 %v1835_v39, 0.0  ;;  %v1015_v28 = vadd.f32 %v4124_v40, %v4108_v24  ;;  %v4308_v38 = vmax.f32 %v1748_v14, 0.0  ;;  %v3116_v24 = vld [vmem:[%s7042_s3 + $0x818] sm:$0xff]  ;;  %v3117_v40 = vld [vmem:[%s7042_s3 + $0x820] sm:$0xff] }
  0xf8   :  { %7083 = vst [vmem:[#allocation18_spill] sm:$0xff] %v4296_v50  ;;  %v1439_v4 = vmul.f32 %v3113_v21, %v3931_v19  ;;  %v1440_v51 = vmul.f32 %v3114_v55, %v3951_v27  ;;  %v1441_v39 = vmul.f32 %v3115_v47, %v3933_v20  ;;  %v1753_v32 = vpop.f32.mrf.mxu0  ;;  %v4313_v63 = vmax.f32 %v1837_v7, 0.0  ;;  %v3118_v7 = vld [vmem:[%s7042_s3 + $0x828] sm:$0xff] }
  0xf9   :  { %7084 = vst [vmem:[#allocation19_spill] sm:$0xff] %v4298_v2  ;;  %7085 = vst [vmem:[#allocation20_spill] sm:$0xff] %v4308_v38  ;;  %v1362_v57 = vadd.f32 %v1361_v53, %v1331_v1  ;;  %v988_v2 = vmul.f32 %v2990_v49, %v4097_v16  ;;  %v1016_v50 = vadd.f32 %v1015_v28, %v4147_v0  ;;  %v3119_v0 = vld [vmem:[%s7042_s3 + $0x830] sm:$0xff]  ;;  %v3018_v47 = vld [vmem:[%s7042_s3 + $0x508] sm:$0xff] }
  0xfa   :  { %7086 = vst [vmem:[#allocation21_spill] sm:$0xff] %v4313_v63  ;;  %v989_v14 = vmul.f32 %v2991_v5, %v4095_v15  ;;  %v990_v21 = vmul.f32 %v2992_v13, %v4126_v41  ;;  %v1471_v28 = vadd.f32 %v1440_v51, %v1439_v4  ;;  %v1752_v55 = vadd.f32 %v1751_v43, %v4049_v35  ;;  %v3120_v53 = vld [vmem:[%s7042_s3 + $0x838] sm:$0xff]  ;;  %v1842_v63 = vpop.f32.mrf.mxu1  ;;  %v3017_v4 = vld [vmem:[%s7042_s3 + $0x500] sm:$0xff]  ;;  %v3019_v43 = vld [vmem:[%s7042_s3 + $0x510] sm:$0xff] }
  0xfb   :  { %v1363_v1 = vadd.f32 %v1362_v57, %v1332_v6  ;;  %v1017_v49 = vadd.f32 %v1016_v50, %v986_v61  ;;  %v1841_v5 = vadd.f32 %v1840_v37, %v4049_v35  ;;  %v1754_v13 = vadd.f32 %v1753_v32, %v4049_v35 }
  0xfc   :  { %v1442_v6 = vmul.f32 %v3116_v24, %v3962_v31  ;;  %v1443_v61 = vmul.f32 %v3117_v40, %v4072_v62  ;;  %v1472_v50 = vadd.f32 %v1471_v28, %v1441_v39  ;;  %v1843_v51 = vadd.f32 %v1842_v63, %v4049_v35  ;;  %v3020_v39 = vld [vmem:[%s7042_s3 + $0x518] sm:$0xff]  ;;  %v3145_v40 = vld [vmem:[%s7042_s3 + $0x900] sm:$0xff] }
  0xfd   :  { %1364 = vadd.xlane.f32.xlu0 %v1363_v1  ;;  %v1018_v37 = vadd.f32 %v1017_v49, %v987_v3  ;;  %v1444_v32 = vmul.f32 %v3118_v7, %v4097_v16  ;;  %v1445_v57 = vmul.f32 %v3119_v0, %v4095_v15  ;;  %v1098_v38 = vmul.f32 %v3018_v47, %v3951_v27  ;;  %v3147_v7 = vld [vmem:[%s7042_s3 + $0x910] sm:$0xff]  ;;  %v3021_v49 = vld [vmem:[%s7042_s3 + $0x520] sm:$0xff] }
  0xfe   :  { %v1446_v56 = vmul.f32 %v3120_v53, %v4126_v41  ;;  %v1473_v24 = vadd.f32 %v1472_v50, %v1442_v6  ;;  %v1097_v63 = vmul.f32 %v3017_v4, %v3931_v19  ;;  %v1099_v3 = vmul.f32 %v3019_v43, %v3933_v20  ;;  %v3022_v53 = vld [vmem:[%s7042_s3 + $0x528] sm:$0xff]  ;;  %v1911_v4 = vpop.f32.mrf.mxu0  ;;  %v2000_v43 = vpop.f32.mrf.mxu1 }
  0xff   :  { %v1019_v0 = vadd.f32 %v1018_v37, %v988_v2  ;;  %v4367_v28 = vmax.f32 %v1752_v55, 0.0  ;;  %v4369_v47 = vmax.f32 %v1841_v5, 0.0  ;;  %v4371_v1 = vmax.f32 %v1754_v13, 0.0  ;;  %v3023_v2 = vld [vmem:[%s7042_s3 + $0x530] sm:$0xff]  ;;  %v3024_v55 = vld [vmem:[%s7042_s3 + $0x538] sm:$0xff] }
 0x100   :  { %v1474_v6 = vadd.f32 %v1473_v24, %v1443_v61  ;;  %v4379_v50 = vmax.f32 %v1843_v51, 0.0  ;;  %v1129_v5 = vadd.f32 %v1098_v38, %v1097_v63  ;;  %v1554_v13 = vmul.f32 %v3146_v46, %v3951_v27  ;;  %v3148_v61 = vld [vmem:[%s7042_s3 + $0x918] sm:$0xff]  ;;  %v3149_v51 = vld [vmem:[%s7042_s3 + $0x920] sm:$0xff]  ;;  %v2002_v48 = vpop.f32.mrf.mxu1 }
 0x101   :  { %7087 = vst [vmem:[#allocation22_spill] sm:$0xff] %v4367_v28  ;;  %7088 = vst [vmem:[#allocation23_spill] sm:$0xff] %v4369_v47  ;;  %v1020_v37 = vadd.f32 %v1019_v0, %v989_v14  ;;  %v1100_v47 = vmul.f32 %v3020_v39, %v3962_v31  ;;  %v1553_v24 = vmul.f32 %v3145_v40, %v3931_v19  ;;  %v1913_v28 = vpop.f32.mrf.mxu0  ;;  %v3150_v19 = vld [vmem:[%s7042_s3 + $0x928] sm:$0xff] }
 0x102   :  { %7089 = vst [vmem:[#allocation24_spill] sm:$0xff] %v4371_v1  ;;  %7090 = vst [vmem:[#allocation25_spill] sm:$0xff] %v4379_v50  ;;  %v1555_v50 = vmul.f32 %v3147_v7, %v3933_v20  ;;  %v1475_v1 = vadd.f32 %v1474_v6, %v1444_v32  ;;  %v1101_v38 = vmul.f32 %v3021_v49, %v4072_v62  ;;  %v502_v6 = vld [vmem:[%s7042_s3 + $0x40] sm:$0xff] }
 0x103   :  { %v1102_v27 = vmul.f32 %v3022_v53, %v4097_v16  ;;  %v1130_v46 = vadd.f32 %v1129_v5, %v1099_v3  ;;  %v1021_v14 = vadd.f32 %v1020_v37, %v990_v21  ;;  %v1103_v39 = vmul.f32 %v3023_v2, %v4095_v15  ;;  %v3151_v21 = vld [vmem:[%s7042_s3 + $0x930] sm:$0xff]  ;;  %v3152_v3 = vld [vmem:[%s7042_s3 + $0x938] sm:$0xff]  ;;  %v2897_v5 = vld [vmem:[%s7042_s3 + $0x140] sm:$0xff]  ;;  %v2006_v37 = vpop.f32.mrf.mxu1 }
 0x104   :  { %v1104_v63 = vmul.f32 %v3024_v55, %v4126_v41  ;;  %v1585_v0 = vadd.f32 %v1554_v13, %v1553_v24  ;;  %v1476_v59 = vadd.f32 %v1475_v1, %v1445_v57  ;;  %v1556_v20 = vmul.f32 %v3148_v61, %v3962_v31  ;;  %v503_v31 = vld [vmem:[%s7042_s3 + $0x48] sm:$0xff]  ;;  %v2899_v13 = vld [vmem:[%s7042_s3 + $0x150] sm:$0xff] }
 0x105   :  { %v1131_v60 = vadd.f32 %v1130_v46, %v1100_v47  ;;  %v1557_v32 = vmul.f32 %v3149_v51, %v4072_v62  ;;  %1022 = vadd.xlane.f32.xlu1 %v1021_v14  ;;  %v1912_v57 = vadd.f32 %v1911_v4, %v3925_v10  ;;  %v2001_v7 = vadd.f32 %v2000_v43, %v3925_v10  ;;  %v507_v46 = vld [vmem:[%s7042_s3 + $0x68] sm:$0xff] }
 0x106   :  { %v1586_v40 = vadd.f32 %v1585_v0, %v1555_v50  ;;  %v179_v47 = vadd.f32 %v3938_v22, %v3970_v36  ;;  %v1477_v62 = vadd.f32 %v1476_v59, %v1446_v56  ;;  %v1914_v49 = vadd.f32 %v1913_v28, %v3925_v10  ;;  %v1917_v56 = vpop.f32.mrf.mxu0  ;;  %v508_v0 = vld [vmem:[%s7042_s3 + $0x70] sm:$0xff] }
 0x107   :  { %v1132_v1 = vadd.f32 %v1131_v60, %v1101_v38  ;;  %v2003_v53 = vadd.f32 %v2002_v48, %v3925_v10  ;;  %v1558_v4 = vmul.f32 %v3150_v19, %v4097_v16  ;;  %v268_v22 = vadd.f32 %v3940_v23, %v3970_v36  ;;  %v504_v10 = vld [vmem:[%s7042_s3 + $0x50] sm:$0xff]  ;;  %v2898_v16 = vld [vmem:[%s7042_s3 + $0x148] sm:$0xff] }
 0x108   :  { %v1587_v43 = vadd.f32 %v1586_v40, %v1556_v20  ;;  %v4427_v50 = vmax.f32 %v179_v47, 0.0  ;;  %1478 = vadd.xlane.f32.xlu0 %v1477_v62  ;;  %v1559_v59 = vmul.f32 %v3151_v21, %v4095_v15  ;;  %v1560_v60 = vmul.f32 %v3152_v3, %v4126_v41  ;;  %v505_v15 = vld [vmem:[%s7042_s3 + $0x58] sm:$0xff] }
 0x109   :  { %v1133_v2 = vadd.f32 %v1132_v1, %v1102_v27  ;;  %v535_v48 = vmul.f32 %v503_v31, %v4025_v8  ;;  %v4438_v28 = vmax.f32 %v1912_v57, 0.0  ;;  %v4440_v55 = vmax.f32 %v268_v22, 0.0  ;;  %v506_v27 = vld [vmem:[%s7042_s3 + $0x60] sm:$0xff]  ;;  %v2903_v22 = vld [vmem:[%s7042_s3 + $0x170] sm:$0xff] }
 0x10a   :  { %v1588_v23 = vadd.f32 %v1587_v43, %v1557_v32  ;;  %v534_v41 = vmul.f32 %v502_v6, %v4427_v50  ;;  %v4452_v51 = vmax.f32 %v2001_v7, 0.0  ;;  %v4454_v24 = vmax.f32 %v1914_v49, 0.0  ;;  %v1919_v7 = vpop.f32.mrf.mxu0  ;;  %v2900_v49 = vld [vmem:[%s7042_s3 + $0x158] sm:$0xff]  ;;  %v2902_v43 = vld [vmem:[%s7042_s3 + $0x168] sm:$0xff] }
 0x10b   :  { %v1134_v61 = vadd.f32 %v1133_v2, %v1103_v39  ;;  %v4456_v38 = vmax.f32 %v2003_v53, 0.0  ;;  %v509_v39 = vld [vmem:[%s7042_s3 + $0x78] sm:$0xff]  ;;  %v536_v19 = vmul.f32 %v504_v10, %v4440_v55  ;;  %v650_v32 = vmul.f32 %v2898_v16, %v4025_v8  ;;  %v2008_v53 = vpop.f32.mrf.mxu1  ;;  %v3058_v10 = vld [vmem:[%s7042_s3 + $0x648] sm:$0xff] }
 0x10c   :  { %v1589_v14 = vadd.f32 %v1588_v23, %v1558_v4  ;;  %v567_v20 = vadd.f32 %v535_v48, %v534_v41  ;;  %v537_v3 = vmul.f32 %v505_v15, %v4041_v25  ;;  %v649_v40 = vmul.f32 %v2897_v5, %v4427_v50  ;;  %v2904_v23 = vld [vmem:[%s7042_s3 + $0x178] sm:$0xff]  ;;  %v3057_v5 = vld [vmem:[%s7042_s3 + $0x640] sm:$0xff] }
 0x10d   :  { %v1135_v21 = vadd.f32 %v1134_v61, %v1104_v63  ;;  %v651_v57 = vmul.f32 %v2899_v13, %v4440_v55  ;;  %v538_v31 = vmul.f32 %v506_v27, %v4154_v18  ;;  %v539_v62 = vmul.f32 %v507_v46, %v4158_v26  ;;  %v2901_v63 = vld [vmem:[%s7042_s3 + $0x160] sm:$0xff] }
 0x10e   :  { %v1590_v47 = vadd.f32 %v1589_v14, %v1559_v59  ;;  %v568_v1 = vadd.f32 %v567_v20, %v536_v19  ;;  %v540_v6 = vmul.f32 %v508_v0, %v4156_v17  ;;  %v541_v4 = vmul.f32 %v509_v39, %v4161_v29  ;;  %v2930_v39 = vld [vmem:[%s7042_s3 + $0x248] sm:$0xff] }
 0x10f   :  { %1136 = vadd.xlane.f32.xlu1 %v1135_v21  ;;  %v682_v2 = vadd.f32 %v650_v32, %v649_v40  ;;  %v1918_v59 = vadd.f32 %v1917_v56, %v3970_v36  ;;  %v2007_v15 = vadd.f32 %v2006_v37, %v3970_v36  ;;  %v1920_v41 = vadd.f32 %v1919_v7, %v3970_v36  ;;  %v3059_v56 = vld [vmem:[%s7042_s3 + $0x650] sm:$0xff]  ;;  %v3060_v32 = vld [vmem:[%s7042_s3 + $0x658] sm:$0xff] }
 0x110   :  { %v1591_v48 = vadd.f32 %v1590_v47, %v1560_v60  ;;  %v569_v16 = vadd.f32 %v568_v1, %v537_v3  ;;  %v652_v13 = vmul.f32 %v2900_v49, %v4041_v25  ;;  %v653_v60 = vmul.f32 %v2901_v63, %v4154_v18  ;;  %v2929_v3 = vld [vmem:[%s7042_s3 + $0x240] sm:$0xff]  ;;  %v2931_v40 = vld [vmem:[%s7042_s3 + $0x250] sm:$0xff]  ;;  %v3062_v63 = vld [vmem:[%s7042_s3 + $0x668] sm:$0xff] }
 0x111   :  { %v683_v61 = vadd.f32 %v682_v2, %v651_v57  ;;  %v2009_v27 = vadd.f32 %v2008_v53, %v3970_v36  ;;  %v654_v37 = vmul.f32 %v2902_v43, %v4158_v26  ;;  %v655_v14 = vmul.f32 %v2903_v22, %v4156_v17  ;;  %v1923_v57 = vpop.f32.mrf.mxu0  ;;  %v3061_v49 = vld [vmem:[%s7042_s3 + $0x660] sm:$0xff]  ;;  %v3064_v22 = vld [vmem:[%s7042_s3 + $0x678] sm:$0xff] }
 0x112   :  { %1592 = vadd.xlane.f32.xlu0 %v1591_v48  ;;  %v570_v46 = vadd.f32 %v569_v16, %v538_v31  ;;  %v1220_v0 = vmul.f32 %v3058_v10, %v4025_v8  ;;  %v656_v19 = vmul.f32 %v2904_v23, %v4161_v29  ;;  %v1219_v36 = vmul.f32 %v3057_v5, %v4427_v50  ;;  %v2932_v16 = vld [vmem:[%s7042_s3 + $0x258] sm:$0xff] }
 0x113   :  { %v684_v20 = vadd.f32 %v683_v61, %v652_v13  ;;  %v1221_v21 = vmul.f32 %v3059_v56, %v4440_v55  ;;  %v4527_v47 = vmax.f32 %v1918_v59, 0.0  ;;  %v4529_v31 = vmax.f32 %v2007_v15, 0.0  ;;  %v1925_v61 = vpop.f32.mrf.mxu0 }
 0x114   :  { %v571_v7 = vadd.f32 %v570_v46, %v539_v62  ;;  %v4531_v1 = vmax.f32 %v1920_v41, 0.0  ;;  %v4539_v43 = vmax.f32 %v2009_v27, 0.0  ;;  %v3063_v62 = vld [vmem:[%s7042_s3 + $0x670] sm:$0xff]  ;;  %v1252_v2 = vadd.f32 %v1220_v0, %v1219_v36  ;;  %v2012_v41 = vpop.f32.mrf.mxu1 }
 0x115   :  { %v685_v53 = vadd.f32 %v684_v20, %v653_v60  ;;  %v764_v59 = vmul.f32 %v2930_v39, %v4025_v8  ;;  %v1222_v48 = vmul.f32 %v3060_v32, %v4041_v25  ;;  %v763_v23 = vmul.f32 %v2929_v3, %v4427_v50  ;;  %v2934_v39 = vld [vmem:[%s7042_s3 + $0x268] sm:$0xff] }
 0x116   :  { %v572_v10 = vadd.f32 %v571_v7, %v540_v6  ;;  %v765_v15 = vmul.f32 %v2931_v40, %v4440_v55  ;;  %v1223_v56 = vmul.f32 %v3061_v49, %v4154_v18  ;;  %v1224_v13 = vmul.f32 %v3062_v63, %v4158_v26  ;;  %v2933_v6 = vld [vmem:[%s7042_s3 + $0x260] sm:$0xff]  ;;  %v3090_v40 = vld [vmem:[%s7042_s3 + $0x748] sm:$0xff]  ;;  %v3091_v7 = vld [vmem:[%s7042_s3 + $0x750] sm:$0xff] }
 0x117   :  { %v686_v5 = vadd.f32 %v685_v53, %v654_v37  ;;  %v1253_v60 = vadd.f32 %v1252_v2, %v1221_v21  ;;  %v1225_v46 = vmul.f32 %v3063_v62, %v4156_v17  ;;  %v1226_v0 = vmul.f32 %v3064_v22, %v4161_v29  ;;  %v2935_v37 = vld [vmem:[%s7042_s3 + $0x270] sm:$0xff]  ;;  %v2014_v62 = vpop.f32.mrf.mxu1 }
 0x118   :  { %v573_v27 = vadd.f32 %v572_v10, %v541_v4  ;;  %v796_v20 = vadd.f32 %v764_v59, %v763_v23  ;;  %v766_v21 = vmul.f32 %v2932_v16, %v4041_v25  ;;  %v1924_v3 = vadd.f32 %v1923_v57, %v3997_v52  ;;  %v3089_v4 = vld [vmem:[%s7042_s3 + $0x740] sm:$0xff]  ;;  %v3092_v16 = vld [vmem:[%s7042_s3 + $0x758] sm:$0xff] }
 0x119   :  { %v687_v32 = vadd.f32 %v686_v5, %v655_v14  ;;  %v1254_v36 = vadd.f32 %v1253_v60, %v1222_v48  ;;  %v2936_v14 = vld [vmem:[%s7042_s3 + $0x278] sm:$0xff]  ;;  %v767_v49 = vmul.f32 %v2933_v6, %v4154_v18  ;;  %v2013_v63 = vadd.f32 %v2012_v41, %v3997_v52  ;;  %v3093_v23 = vld [vmem:[%s7042_s3 + $0x760] sm:$0xff]  ;;  %v2962_v5 = vld [vmem:[%s7042_s3 + $0x348] sm:$0xff] }
 0x11a   :  { %574 = vadd.xlane.f32.xlu1 %v573_v27  ;;  %v797_v57 = vadd.f32 %v796_v20, %v765_v15  ;;  %v1926_v53 = vadd.f32 %v1925_v61, %v3997_v52  ;;  %v768_v59 = vmul.f32 %v2934_v39, %v4158_v26  ;;  %v769_v10 = vmul.f32 %v2935_v37, %v4156_v17  ;;  %v2961_v39 = vld [vmem:[%s7042_s3 + $0x340] sm:$0xff]  ;;  %v2963_v37 = vld [vmem:[%s7042_s3 + $0x350] sm:$0xff] }
 0x11b   :  { %v688_v22 = vadd.f32 %v687_v32, %v656_v19  ;;  %v1255_v2 = vadd.f32 %v1254_v36, %v1223_v56  ;;  %v1333_v15 = vmul.f32 %v3089_v4, %v4427_v50  ;;  %v1334_v41 = vmul.f32 %v3090_v40, %v4025_v8  ;;  %v1929_v56 = vpop.f32.mrf.mxu0  ;;  %v3096_v40 = vld [vmem:[%s7042_s3 + $0x778] sm:$0xff] }
 0x11c   :  { %v798_v48 = vadd.f32 %v797_v57, %v766_v21  ;;  %v1335_v19 = vmul.f32 %v3091_v7, %v4440_v55  ;;  %v770_v6 = vmul.f32 %v2936_v14, %v4161_v29  ;;  %v4599_v61 = vmax.f32 %v1924_v3, 0.0  ;;  %v3095_v21 = vld [vmem:[%s7042_s3 + $0x770] sm:$0xff] }
 0x11d   :  { %689 = vadd.xlane.f32.xlu0 %v688_v22  ;;  %v1256_v60 = vadd.f32 %v1255_v2, %v1224_v13  ;;  %v2015_v27 = vadd.f32 %v2014_v62, %v3997_v52  ;;  %v4608_v32 = vmax.f32 %v2013_v63, 0.0  ;;  %v4610_v36 = vmax.f32 %v1926_v53, 0.0  ;;  %v3094_v13 = vld [vmem:[%s7042_s3 + $0x768] sm:$0xff]  ;;  %v2964_v53 = vld [vmem:[%s7042_s3 + $0x358] sm:$0xff]  ;;  %v2018_v22 = vpop.f32.mrf.mxu1  ;;  %v1931_v2 = vpop.f32.mrf.mxu0 }
 0x11e   :  { %v799_v20 = vadd.f32 %v798_v48, %v767_v49  ;;  %v1366_v3 = vadd.f32 %v1334_v41, %v1333_v15  ;;  %v1336_v7 = vmul.f32 %v3092_v16, %v4041_v25  ;;  %v1337_v14 = vmul.f32 %v3093_v23, %v4154_v18  ;;  %v3122_v41 = vld [vmem:[%s7042_s3 + $0x848] sm:$0xff] }
 0x11f   :  { %v1257_v4 = vadd.f32 %v1256_v60, %v1225_v46  ;;  %v878_v49 = vmul.f32 %v2962_v5, %v4025_v8  ;;  %v877_v62 = vmul.f32 %v2961_v39, %v4427_v50  ;;  %v879_v46 = vmul.f32 %v2963_v37, %v4440_v55  ;;  %v2968_v39 = vld [vmem:[%s7042_s3 + $0x378] sm:$0xff] }
 0x120   :  { %v800_v57 = vadd.f32 %v799_v20, %v768_v59  ;;  %v1367_v63 = vadd.f32 %v1366_v3, %v1335_v19  ;;  %v4629_v15 = vmax.f32 %v2015_v27, 0.0  ;;  %v1338_v16 = vmul.f32 %v3094_v13, %v4158_v26  ;;  %v2965_v59 = vld [vmem:[%s7042_s3 + $0x360] sm:$0xff]  ;;  %v2967_v27 = vld [vmem:[%s7042_s3 + $0x370] sm:$0xff] }
 0x121   :  { %v1258_v48 = vadd.f32 %v1257_v4, %v1226_v0  ;;  %v1339_v23 = vmul.f32 %v3095_v21, %v4156_v17  ;;  %v1340_v5 = vmul.f32 %v3096_v40, %v4161_v29  ;;  %v2966_v0 = vld [vmem:[%s7042_s3 + $0x368] sm:$0xff]  ;;  %v910_v37 = vadd.f32 %v878_v49, %v877_v62  ;;  %v3121_v3 = vld [vmem:[%s7042_s3 + $0x840] sm:$0xff]  ;;  %v3123_v4 = vld [vmem:[%s7042_s3 + $0x850] sm:$0xff] }
 0x122   :  { %7091 = vst [vmem:[#allocation26_spill] sm:$0xff] %v4629_v15  ;;  %v801_v19 = vadd.f32 %v800_v57, %v769_v10  ;;  %v1368_v60 = vadd.f32 %v1367_v63, %v1336_v7  ;;  %v880_v20 = vmul.f32 %v2964_v53, %v4041_v25  ;;  %v1930_v10 = vadd.f32 %v1929_v56, %v4049_v35  ;;  %v2020_v63 = vpop.f32.mrf.mxu1 }
 0x123   :  { %1259 = vadd.xlane.f32.xlu1 %v1258_v48  ;;  %v2019_v13 = vadd.f32 %v2018_v22, %v4049_v35  ;;  %v1932_v21 = vadd.f32 %v1931_v2, %v4049_v35  ;;  %v881_v49 = vmul.f32 %v2965_v59, %v4154_v18  ;;  %v911_v57 = vadd.f32 %v910_v37, %v879_v46  ;;  %v3124_v22 = vld [vmem:[%s7042_s3 + $0x858] sm:$0xff]  ;;  %v3125_v48 = vld [vmem:[%s7042_s3 + $0x860] sm:$0xff]  ;;  %v3126_v37 = vld [vmem:[%s7042_s3 + $0x868] sm:$0xff] }
 0x124   :  { %v802_v40 = vadd.f32 %v801_v19, %v770_v6  ;;  %v1369_v7 = vadd.f32 %v1368_v60, %v1337_v14  ;;  %v882_v56 = vmul.f32 %v2966_v0, %v4158_v26  ;;  %v883_v53 = vmul.f32 %v2967_v27, %v4156_v17  ;;  %v2993_v6 = vld [vmem:[%s7042_s3 + $0x440] sm:$0xff]  ;;  %v2994_v60 = vld [vmem:[%s7042_s3 + $0x448] sm:$0xff] }
 0x125   :  { %v884_v62 = vmul.f32 %v2968_v39, %v4161_v29  ;;  %v1448_v2 = vmul.f32 %v3122_v41, %v4025_v8  ;;  %v912_v46 = vadd.f32 %v911_v57, %v880_v20  ;;  %v1447_v59 = vmul.f32 %v3121_v3, %v4427_v50  ;;  %v2995_v41 = vld [vmem:[%s7042_s3 + $0x450] sm:$0xff] }
 0x126   :  { %803 = vadd.xlane.f32.xlu0 %v802_v40  ;;  %v1370_v14 = vadd.f32 %v1369_v7, %v1338_v16  ;;  %v1449_v19 = vmul.f32 %v3123_v4, %v4440_v55  ;;  %v4681_v0 = vmax.f32 %v1930_v10, 0.0  ;;  %v4683_v16 = vmax.f32 %v2019_v13, 0.0  ;;  %v3127_v4 = vld [vmem:[%s7042_s3 + $0x870] sm:$0xff]  ;;  %v3128_v10 = vld [vmem:[%s7042_s3 + $0x878] sm:$0xff] }
 0x127   :  { %v4685_v27 = vmax.f32 %v1932_v21, 0.0  ;;  %v4688_v39 = vadd.f32 %v2020_v63, %v4049_v35  ;;  %v913_v3 = vadd.f32 %v912_v46, %v881_v49  ;;  %v1450_v13 = vmul.f32 %v3124_v22, %v4041_v25  ;;  %v2996_v40 = vld [vmem:[%s7042_s3 + $0x458] sm:$0xff]  ;;  %v3154_v22 = vld [vmem:[%s7042_s3 + $0x948] sm:$0xff] }
 0x128   :  { %7092 = vst [vmem:[#allocation27_spill] sm:$0xff] %v4681_v0  ;;  %7093 = vst [vmem:[#allocation28_spill] sm:$0xff] %v4683_v16  ;;  %v1371_v20 = vadd.f32 %v1370_v14, %v1339_v23  ;;  %v1480_v21 = vadd.f32 %v1448_v2, %v1447_v59  ;;  %v1451_v7 = vmul.f32 %v3125_v48, %v4154_v18  ;;  %v2997_v23 = vld [vmem:[%s7042_s3 + $0x460] sm:$0xff]  ;;  %v2998_v48 = vld [vmem:[%s7042_s3 + $0x468] sm:$0xff] }
 0x129   :  { %7094 = vst [vmem:[#allocation29_spill] sm:$0xff] %v4685_v27  ;;  %v991_v49 = vmul.f32 %v2993_v6, %v4427_v50  ;;  %v992_v57 = vmul.f32 %v2994_v60, %v4025_v8  ;;  %v993_v63 = vmul.f32 %v2995_v41, %v4440_v55  ;;  %v914_v14 = vadd.f32 %v913_v3, %v882_v56  ;;  %v3153_v6 = vld [vmem:[%s7042_s3 + $0x940] sm:$0xff]  ;;  %v3155_v60 = vld [vmem:[%s7042_s3 + $0x950] sm:$0xff]  ;;  %v3026_v27 = vld [vmem:[%s7042_s3 + $0x548] sm:$0xff] }
 0x12a   :  { %v1372_v2 = vadd.f32 %v1371_v20, %v1340_v5  ;;  %v1452_v46 = vmul.f32 %v3126_v37, %v4158_v26  ;;  %v1481_v59 = vadd.f32 %v1480_v21, %v1449_v19  ;;  %v1453_v41 = vmul.f32 %v3127_v4, %v4156_v17  ;;  %v2999_v56 = vld [vmem:[%s7042_s3 + $0x470] sm:$0xff]  ;;  %v3000_v19 = vld [vmem:[%s7042_s3 + $0x478] sm:$0xff] }
 0x12b   :  { %v1454_v5 = vmul.f32 %v3128_v10, %v4161_v29  ;;  %v994_v37 = vmul.f32 %v2996_v40, %v4041_v25  ;;  %v1024_v20 = vadd.f32 %v992_v57, %v991_v49  ;;  %v915_v3 = vadd.f32 %v914_v14, %v883_v53  ;;  %v3156_v4 = vld [vmem:[%s7042_s3 + $0x958] sm:$0xff]  ;;  %v3157_v53 = vld [vmem:[%s7042_s3 + $0x960] sm:$0xff]  ;;  %v3027_v49 = vld [vmem:[%s7042_s3 + $0x550] sm:$0xff] }
 0x12c   :  { %1373 = vadd.xlane.f32.xlu1 %v1372_v2  ;;  %v1482_v21 = vadd.f32 %v1481_v59, %v1450_v13  ;;  %v995_v16 = vmul.f32 %v2997_v23, %v4154_v18  ;;  %v1562_v10 = vmul.f32 %v3154_v22, %v4025_v8  ;;  %v996_v0 = vmul.f32 %v2998_v48, %v4158_v26  ;;  %v3025_v23 = vld [vmem:[%s7042_s3 + $0x540] sm:$0xff]  ;;  %v3158_v14 = vld [vmem:[%s7042_s3 + $0x968] sm:$0xff]  ;;  %v3159_v59 = vld [vmem:[%s7042_s3 + $0x970] sm:$0xff] }
 0x12d   :  { %v1025_v15 = vadd.f32 %v1024_v20, %v993_v63  ;;  %v1561_v13 = vmul.f32 %v3153_v6, %v4427_v50  ;;  %v1563_v40 = vmul.f32 %v3155_v60, %v4440_v55  ;;  %v916_v57 = vadd.f32 %v915_v3, %v884_v62  ;;  %v3028_v62 = vld [vmem:[%s7042_s3 + $0x558] sm:$0xff]  ;;  %v3029_v20 = vld [vmem:[%s7042_s3 + $0x560] sm:$0xff] }
 0x12e   :  { %v1483_v22 = vadd.f32 %v1482_v21, %v1451_v7  ;;  %v997_v63 = vmul.f32 %v2999_v56, %v4156_v17  ;;  %v998_v2 = vmul.f32 %v3000_v19, %v4161_v29  ;;  %v1564_v6 = vmul.f32 %v3156_v4, %v4041_v25 }
 0x12f   :  { %v1026_v48 = vadd.f32 %v1025_v15, %v994_v37  ;;  %v1594_v60 = vadd.f32 %v1562_v10, %v1561_v13  ;;  %v1106_v7 = vmul.f32 %v3026_v27, %v4025_v8  ;;  %917 = vadd.xlane.f32.xlu0 %v916_v57  ;;  %v1565_v19 = vmul.f32 %v3157_v53, %v4154_v18  ;;  %v2906_v8 = vld [vmem:[%s7042_s3 + $0x188] sm:$0xff] }
 0x130   :  { %v1484_v56 = vadd.f32 %v1483_v22, %v1452_v46  ;;  %v1105_v3 = vmul.f32 %v3025_v23, %v4427_v50  ;;  %v1107_v15 = vmul.f32 %v3027_v49, %v4440_v55  ;;  %v1566_v21 = vmul.f32 %v3158_v14, %v4158_v26  ;;  %v3160_v46 = vld [vmem:[%s7042_s3 + $0x978] sm:$0xff]  ;;  %v2907_v14 = vld [vmem:[%s7042_s3 + $0x190] sm:$0xff] }
 0x131   :  { %v1027_v37 = vadd.f32 %v1026_v48, %v995_v16  ;;  %v1567_v4 = vmul.f32 %v3159_v59, %v4156_v17  ;;  %v1595_v10 = vadd.f32 %v1594_v60, %v1563_v40  ;;  %v1108_v53 = vmul.f32 %v3028_v62, %v4041_v25  ;;  %v3030_v40 = vld [vmem:[%s7042_s3 + $0x568] sm:$0xff]  ;;  %v2905_v25 = vld [vmem:[%s7042_s3 + $0x180] sm:$0xff] }
 0x132   :  { %v1485_v27 = vadd.f32 %v1484_v56, %v1453_v41  ;;  %v1138_v50 = vadd.f32 %v1106_v7, %v1105_v3  ;;  %v185_v55 = vadd.f32 %v3983_v44, %v3997_v52  ;;  %v3031_v41 = vld [vmem:[%s7042_s3 + $0x570] sm:$0xff]  ;;  %v1109_v23 = vmul.f32 %v3029_v20, %v4154_v18 }
 0x133   :  { %v1028_v16 = vadd.f32 %v1027_v37, %v996_v0  ;;  %v1596_v13 = vadd.f32 %v1595_v10, %v1564_v6  ;;  %v274_v49 = vadd.f32 %v3985_v45, %v3997_v52  ;;  %v3032_v0 = vld [vmem:[%s7042_s3 + $0x578] sm:$0xff]  ;;  %v658_v18 = vmul.f32 %v2906_v8, %v4045_v33  ;;  %v511_v6 = vld [vmem:[%s7042_s3 + $0x88] sm:$0xff]  ;;  %v512_v20 = vld [vmem:[%s7042_s3 + $0x90] sm:$0xff] }
 0x134   :  { %v1486_v44 = vadd.f32 %v1485_v27, %v1454_v5  ;;  %v1139_v57 = vadd.f32 %v1138_v50, %v1107_v15  ;;  %v4797_v22 = vmax.f32 %v185_v55, 0.0  ;;  %v1568_v45 = vmul.f32 %v3160_v46, %v4161_v29  ;;  %v2908_v5 = vld [vmem:[%s7042_s3 + $0x198] sm:$0xff]  ;;  %v2911_v37 = vld [vmem:[%s7042_s3 + $0x1b0] sm:$0xff]  ;;  %v514_v55 = vld [vmem:[%s7042_s3 + $0xa0] sm:$0xff] }
 0x135   :  { %v1029_v59 = vadd.f32 %v1028_v16, %v997_v63  ;;  %v1597_v52 = vadd.f32 %v1596_v13, %v1565_v19  ;;  %v4804_v48 = vmax.f32 %v274_v49, 0.0  ;;  %v1110_v60 = vmul.f32 %v3030_v40, %v4158_v26  ;;  %v2909_v63 = vld [vmem:[%s7042_s3 + $0x1a0] sm:$0xff]  ;;  %v2912_v27 = vld [vmem:[%s7042_s3 + $0x1b8] sm:$0xff]  ;;  %v2938_v40 = vld [vmem:[%s7042_s3 + $0x288] sm:$0xff] }
 0x136   :  { %1487 = vadd.xlane.f32.xlu1 %v1486_v44  ;;  %v1111_v62 = vmul.f32 %v3031_v41, %v4156_v17  ;;  %v1140_v7 = vadd.f32 %v1139_v57, %v1108_v53  ;;  %v657_v56 = vmul.f32 %v2905_v25, %v4797_v22  ;;  %v510_v19 = vld [vmem:[%s7042_s3 + $0x80] sm:$0xff]  ;;  %v1112_v26 = vmul.f32 %v3032_v0, %v4161_v29  ;;  %v2910_v17 = vld [vmem:[%s7042_s3 + $0x1a8] sm:$0xff]  ;;  %v513_v29 = vld [vmem:[%s7042_s3 + $0x98] sm:$0xff] }
 0x137   :  { %v1030_v3 = vadd.f32 %v1029_v59, %v998_v2  ;;  %v1598_v15 = vadd.f32 %v1597_v52, %v1566_v21  ;;  %v659_v10 = vmul.f32 %v2907_v14, %v4804_v48  ;;  %v660_v2 = vmul.f32 %v2908_v5, %v4047_v34  ;;  %v515_v25 = vld [vmem:[%s7042_s3 + $0xa8] sm:$0xff]  ;;  %v2937_v44 = vld [vmem:[%s7042_s3 + $0x280] sm:$0xff]  ;;  %v2939_v0 = vld [vmem:[%s7042_s3 + $0x290] sm:$0xff] }
 0x138   :  { %v1141_v8 = vadd.f32 %v1140_v7, %v1109_v23  ;;  %v691_v21 = vadd.f32 %v658_v18, %v657_v56  ;;  %v543_v46 = vmul.f32 %v511_v6, %v4045_v33  ;;  %v661_v50 = vmul.f32 %v2909_v63, %v4167_v42  ;;  %v516_v18 = vld [vmem:[%s7042_s3 + $0xb0] sm:$0xff]  ;;  %v517_v59 = vld [vmem:[%s7042_s3 + $0xb8] sm:$0xff] }
 0x139   :  { %1031 = vadd.xlane.f32.xlu0 %v1030_v3  ;;  %v1599_v53 = vadd.f32 %v1598_v15, %v1567_v4  ;;  %v542_v16 = vmul.f32 %v510_v19, %v4797_v22  ;;  %v544_v13 = vmul.f32 %v512_v20, %v4804_v48  ;;  %v662_v23 = vmul.f32 %v2910_v17, %v4193_v12  ;;  %v2940_v19 = vld [vmem:[%s7042_s3 + $0x298] sm:$0xff]  ;;  %v2941_v20 = vld [vmem:[%s7042_s3 + $0x2a0] sm:$0xff]  ;;  %v519_v15 = vld [vmem:[%s7042_s3 + $0xc8] sm:$0xff] }
 0x13a   :  { %v1142_v41 = vadd.f32 %v1141_v8, %v1110_v60  ;;  %v663_v49 = vmul.f32 %v2911_v37, %v4178_v54  ;;  %v692_v4 = vadd.f32 %v691_v21, %v659_v10  ;;  %v664_v14 = vmul.f32 %v2912_v27, %v4195_v30  ;;  %v2943_v21 = vld [vmem:[%s7042_s3 + $0x2b0] sm:$0xff] }
 0x13b   :  { %v1600_v57 = vadd.f32 %v1599_v53, %v1568_v45  ;;  %v545_v52 = vmul.f32 %v513_v29, %v4047_v34  ;;  %v576_v5 = vadd.f32 %v543_v46, %v542_v16  ;;  %v546_v7 = vmul.f32 %v514_v55, %v4167_v42  ;;  %v2944_v29 = vld [vmem:[%s7042_s3 + $0x2b8] sm:$0xff] }
 0x13c   :  { %v1143_v6 = vadd.f32 %v1142_v41, %v1111_v62  ;;  %v693_v60 = vadd.f32 %v692_v4, %v660_v2  ;;  %v772_v63 = vmul.f32 %v2938_v40, %v4045_v33  ;;  %v547_v45 = vmul.f32 %v515_v25, %v4193_v12  ;;  %v2942_v2 = vld [vmem:[%s7042_s3 + $0x2a8] sm:$0xff]  ;;  %v520_v40 = vld [vmem:[%s7042_s3 + $0xd0] sm:$0xff] }
 0x13d   :  { %1601 = vadd.xlane.f32.xlu1 %v1600_v57  ;;  %v577_v56 = vadd.f32 %v576_v5, %v544_v13  ;;  %v771_v3 = vmul.f32 %v2937_v44, %v4797_v22  ;;  %v773_v62 = vmul.f32 %v2939_v0, %v4804_v48  ;;  %v548_v10 = vmul.f32 %v516_v18, %v4178_v54  ;;  %v518_v13 = vld [vmem:[%s7042_s3 + $0xc0] sm:$0xff]  ;;  %v2970_v0 = vld [vmem:[%s7042_s3 + $0x388] sm:$0xff] }
 0x13e   :  { %v1144_v17 = vadd.f32 %v1143_v6, %v1112_v26  ;;  %v694_v37 = vadd.f32 %v693_v60, %v661_v50  ;;  %v549_v8 = vmul.f32 %v517_v59, %v4195_v30  ;;  %v191_v26 = vadd.f32 %v4027_v9, %v4049_v35  ;;  %v7095_v41 = vld [vmem:[#allocation5_spill] sm:$0xff]  ;;  %v2971_v6 = vld [vmem:[%s7042_s3 + $0x390] sm:$0xff] }
 0x13f   :  { %v578_v27 = vadd.f32 %v577_v56, %v545_v52  ;;  %v805_v46 = vadd.f32 %v772_v63, %v771_v3  ;;  %v280_v53 = vadd.f32 %v4029_v11, %v4049_v35  ;;  %v774_v55 = vmul.f32 %v2940_v19, %v4047_v34  ;;  %v521_v35 = vld [vmem:[%s7042_s3 + $0xd8] sm:$0xff]  ;;  %v522_v5 = vld [vmem:[%s7042_s3 + $0xe0] sm:$0xff]  ;;  %v524_v63 = vld [vmem:[%s7042_s3 + $0xf0] sm:$0xff] }
 0x140   :  { %1145 = vadd.xlane.f32.xlu0 %v1144_v17  ;;  %v695_v50 = vadd.f32 %v694_v37, %v662_v23  ;;  %v775_v16 = vmul.f32 %v2941_v20, %v4167_v42  ;;  %v551_v4 = vmul.f32 %v519_v15, %v7095_v41  ;;  %v4906_v44 = vmax.f32 %v191_v26, 0.0  ;;  %v2969_v23 = vld [vmem:[%s7042_s3 + $0x380] sm:$0xff]  ;;  %v525_v56 = vld [vmem:[%s7042_s3 + $0xf8] sm:$0xff]  ;;  %v2915_v26 = vld [vmem:[%s7042_s3 + $0x1d0] sm:$0xff] }
 0x141   :  { %v579_v9 = vadd.f32 %v578_v27, %v546_v7  ;;  %v806_v25 = vadd.f32 %v805_v46, %v773_v62  ;;  %v4908_v11 = vmax.f32 %v280_v53, 0.0  ;;  %v776_v18 = vmul.f32 %v2942_v2, %v4193_v12  ;;  %v7096_v62 = vld [vmem:[#allocation6_spill] sm:$0xff]  ;;  %v2972_v15 = vld [vmem:[%s7042_s3 + $0x398] sm:$0xff]  ;;  %v2913_v46 = vld [vmem:[%s7042_s3 + $0x1c0] sm:$0xff] }
 0x142   :  { %v696_v57 = vadd.f32 %v695_v50, %v663_v49  ;;  %v777_v59 = vmul.f32 %v2943_v21, %v4178_v54  ;;  %v778_v52 = vmul.f32 %v2944_v29, %v4195_v30  ;;  %v523_v49 = vld [vmem:[%s7042_s3 + $0xe8] sm:$0xff]  ;;  %v550_v19 = vmul.f32 %v518_v13, %v4906_v44 }
 0x143   :  { %v580_v60 = vadd.f32 %v579_v9, %v547_v45  ;;  %v807_v7 = vadd.f32 %v806_v25, %v774_v55  ;;  %v552_v20 = vmul.f32 %v520_v40, %v4908_v11  ;;  %v553_v45 = vmul.f32 %v521_v35, %v7096_v62  ;;  %v7098_v55 = vld [vmem:[#allocation7_spill] sm:$0xff]  ;;  %v7099_v13 = vld [vmem:[#allocation9_spill] sm:$0xff] }
 0x144   :  { %v697_v3 = vadd.f32 %v696_v57, %v664_v14  ;;  %v885_v17 = vmul.f32 %v2969_v23, %v4797_v22  ;;  %v886_v37 = vmul.f32 %v2970_v0, %v4045_v33  ;;  %v585_v21 = vadd.f32 %v551_v4, %v550_v19  ;;  %v2914_v14 = vld [vmem:[%s7042_s3 + $0x1c8] sm:$0xff]  ;;  %v2973_v4 = vld [vmem:[%s7042_s3 + $0x3a0] sm:$0xff]  ;;  %v2975_v0 = vld [vmem:[%s7042_s3 + $0x3b0] sm:$0xff] }
 0x145   :  { %v581_v27 = vadd.f32 %v580_v60, %v548_v10  ;;  %v808_v2 = vadd.f32 %v807_v7, %v775_v16  ;;  %v887_v29 = vmul.f32 %v2971_v6, %v4804_v48  ;;  %v554_v53 = vmul.f32 %v522_v5, %v4211_v58  ;;  %v7097_v10 = vld [vmem:[#allocation8_spill] sm:$0xff]  ;;  %v2974_v23 = vld [vmem:[%s7042_s3 + $0x3a8] sm:$0xff] }
 0x146   :  { %698 = vadd.xlane.f32.xlu1 %v697_v3  ;;  %v555_v50 = vmul.f32 %v523_v49, %v7097_v10  ;;  %v556_v16 = vmul.f32 %v524_v63, %v7098_v55  ;;  %v4959_v40 = vmul.f32 %v525_v56, %v7099_v13  ;;  %v586_v35 = vadd.f32 %v585_v21, %v552_v20  ;;  %v2916_v5 = vld [vmem:[%s7042_s3 + $0x1d8] sm:$0xff]  ;;  %v3001_v20 = vld [vmem:[%s7042_s3 + $0x480] sm:$0xff]  ;;  %v3002_v3 = vld [vmem:[%s7042_s3 + $0x488] sm:$0xff] }
 0x147   :  { %v582_v9 = vadd.f32 %v581_v27, %v549_v8  ;;  %v809_v25 = vadd.f32 %v808_v2, %v776_v18  ;;  %v919_v57 = vadd.f32 %v886_v37, %v885_v17  ;;  %v888_v6 = vmul.f32 %v2972_v15, %v4047_v34  ;;  %v2917_v8 = vld [vmem:[%s7042_s3 + $0x1e0] sm:$0xff]  ;;  %v3003_v15 = vld [vmem:[%s7042_s3 + $0x490] sm:$0xff]  ;;  %v2918_v37 = vld [vmem:[%s7042_s3 + $0x1e8] sm:$0xff] }
 0x148   :  { %v665_v18 = vmul.f32 %v2913_v46, %v4906_v44  ;;  %v666_v60 = vmul.f32 %v2914_v14, %v7095_v41  ;;  %v667_v7 = vmul.f32 %v2915_v26, %v4908_v11  ;;  %v587_v63 = vadd.f32 %v586_v35, %v553_v45  ;;  %v2919_v14 = vld [vmem:[%s7042_s3 + $0x1f0] sm:$0xff]  ;;  %v2920_v26 = vld [vmem:[%s7042_s3 + $0x1f8] sm:$0xff] }
 0x149   :  { %583 = vadd.xlane.f32.xlu0 %v582_v9  ;;  %v810_v49 = vadd.f32 %v809_v25, %v777_v59  ;;  %v889_v56 = vmul.f32 %v2973_v4, %v4167_v42  ;;  %v920_v19 = vadd.f32 %v919_v57, %v887_v29  ;;  %v2976_v59 = vld [vmem:[%s7042_s3 + $0x3b8] sm:$0xff]  ;;  %v890_v45 = vmul.f32 %v2974_v23, %v4193_v12  ;;  %v2946_v23 = vld [vmem:[%s7042_s3 + $0x2c8] sm:$0xff] }
 0x14a   :  { %v891_v17 = vmul.f32 %v2975_v0, %v4178_v54  ;;  %v668_v27 = vmul.f32 %v2916_v5, %v7096_v62  ;;  %v700_v2 = vadd.f32 %v666_v60, %v665_v18  ;;  %v588_v29 = vadd.f32 %v587_v63, %v554_v53  ;;  %v3004_v25 = vld [vmem:[%s7042_s3 + $0x498] sm:$0xff]  ;;  %v3006_v18 = vld [vmem:[%s7042_s3 + $0x4a8] sm:$0xff] }
 0x14b   :  { %v811_v21 = vadd.f32 %v810_v49, %v778_v52  ;;  %v921_v46 = vadd.f32 %v920_v19, %v888_v6  ;;  %v669_v4 = vmul.f32 %v2917_v8, %v4211_v58  ;;  %v999_v35 = vmul.f32 %v3001_v20, %v4797_v22  ;;  %v3005_v8 = vld [vmem:[%s7042_s3 + $0x4a0] sm:$0xff] }
 0x14c   :  { %v701_v9 = vadd.f32 %v700_v2, %v667_v7  ;;  %v1000_v52 = vmul.f32 %v3002_v3, %v4045_v33  ;;  %v1001_v53 = vmul.f32 %v3003_v15, %v4804_v48  ;;  %v589_v0 = vadd.f32 %v588_v29, %v555_v50  ;;  %v2945_v50 = vld [vmem:[%s7042_s3 + $0x2c0] sm:$0xff]  ;;  %v3007_v3 = vld [vmem:[%s7042_s3 + $0x4b0] sm:$0xff]  ;;  %v3008_v15 = vld [vmem:[%s7042_s3 + $0x4b8] sm:$0xff] }
 0x14d   :  { %812 = vadd.xlane.f32.xlu1 %v811_v21  ;;  %v892_v57 = vmul.f32 %v2976_v59, %v4195_v30  ;;  %v922_v5 = vadd.f32 %v921_v46, %v889_v56  ;;  %v670_v6 = vmul.f32 %v2918_v37, %v7097_v10  ;;  %v671_v60 = vmul.f32 %v2919_v14, %v7098_v55  ;;  %v2947_v56 = vld [vmem:[%s7042_s3 + $0x2d0] sm:$0xff] }
 0x14e   :  { %v672_v7 = vmul.f32 %v2920_v26, %v7099_v13  ;;  %v702_v49 = vadd.f32 %v701_v9, %v668_v27  ;;  %v1033_v63 = vadd.f32 %v1000_v52, %v999_v35  ;;  %v590_v19 = vadd.f32 %v589_v0, %v556_v16  ;;  %v2948_v16 = vld [vmem:[%s7042_s3 + $0x2d8] sm:$0xff]  ;;  %v3033_v9 = vld [vmem:[%s7042_s3 + $0x580] sm:$0xff]  ;;  %v2951_v0 = vld [vmem:[%s7042_s3 + $0x2f0] sm:$0xff] }
 0x14f   :  { %v923_v20 = vadd.f32 %v922_v5, %v890_v45  ;;  %v1002_v59 = vmul.f32 %v3004_v25, %v4047_v34  ;;  %v780_v37 = vmul.f32 %v2946_v23, %v7095_v41  ;;  %v1003_v2 = vmul.f32 %v3005_v8, %v4167_v42  ;;  %v3034_v45 = vld [vmem:[%s7042_s3 + $0x588] sm:$0xff]  ;;  %v3035_v25 = vld [vmem:[%s7042_s3 + $0x590] sm:$0xff] }
 0x150   :  { %v703_v27 = vadd.f32 %v702_v49, %v669_v4  ;;  %v1004_v21 = vmul.f32 %v3006_v18, %v4193_v12  ;;  %v1034_v29 = vadd.f32 %v1033_v63, %v1001_v53  ;;  %v591_v46 = vadd.f32 %v590_v19, %v4959_v40  ;;  %v2949_v40 = vld [vmem:[%s7042_s3 + $0x2e0] sm:$0xff] }
 0x151   :  { %v924_v14 = vadd.f32 %v923_v20, %v891_v17  ;;  %v779_v26 = vmul.f32 %v2945_v50, %v4906_v44  ;;  %v781_v4 = vmul.f32 %v2947_v56, %v4908_v11  ;;  %v1005_v52 = vmul.f32 %v3007_v3, %v4178_v54  ;;  %v2950_v17 = vld [vmem:[%s7042_s3 + $0x2e8] sm:$0xff]  ;;  %v3036_v56 = vld [vmem:[%s7042_s3 + $0x598] sm:$0xff]  ;;  %v3037_v19 = vld [vmem:[%s7042_s3 + $0x5a0] sm:$0xff] }
 0x152   :  { %v704_v35 = vadd.f32 %v703_v27, %v670_v6  ;;  %v1006_v53 = vmul.f32 %v3008_v15, %v4195_v30  ;;  %v1035_v23 = vadd.f32 %v1034_v29, %v1002_v59  ;;  %592 = vadd.xlane.f32.xlu0 %v591_v46  ;;  %v2952_v6 = vld [vmem:[%s7042_s3 + $0x2f8] sm:$0xff]  ;;  %v782_v8 = vmul.f32 %v2948_v16, %v7096_v62  ;;  %v2978_v3 = vld [vmem:[%s7042_s3 + $0x3c8] sm:$0xff]  ;;  %v2977_v27 = vld [vmem:[%s7042_s3 + $0x3c0] sm:$0xff] }
 0x153   :  { %v925_v5 = vadd.f32 %v924_v14, %v892_v57  ;;  %v814_v18 = vadd.f32 %v780_v37, %v779_v26  ;;  %v1114_v49 = vmul.f32 %v3034_v45, %v4045_v33  ;;  %v1113_v57 = vmul.f32 %v3033_v9, %v4797_v22  ;;  %v3038_v46 = vld [vmem:[%s7042_s3 + $0x5a8] sm:$0xff]  ;;  %v3039_v14 = vld [vmem:[%s7042_s3 + $0x5b0] sm:$0xff]  ;;  %v3040_v26 = vld [vmem:[%s7042_s3 + $0x5b8] sm:$0xff] }
 0x154   :  { %v705_v63 = vadd.f32 %v704_v35, %v671_v60  ;;  %v1036_v50 = vadd.f32 %v1035_v23, %v1003_v2  ;;  %v1115_v20 = vmul.f32 %v3035_v25, %v4804_v48  ;;  %v783_v60 = vmul.f32 %v2949_v40, %v4211_v58  ;;  %v2979_v2 = vld [vmem:[%s7042_s3 + $0x3d0] sm:$0xff] }
 0x155   :  { %926 = vadd.xlane.f32.xlu1 %v925_v5  ;;  %v784_v15 = vmul.f32 %v2950_v17, %v7097_v10  ;;  %v785_v59 = vmul.f32 %v2951_v0, %v7098_v55  ;;  %v815_v37 = vadd.f32 %v814_v18, %v781_v4  ;;  %v786_v45 = vmul.f32 %v2952_v6, %v7099_v13  ;;  %v3065_v5 = vld [vmem:[%s7042_s3 + $0x680] sm:$0xff]  ;;  %v3066_v6 = vld [vmem:[%s7042_s3 + $0x688] sm:$0xff] }
 0x156   :  { %v706_v29 = vadd.f32 %v705_v63, %v672_v7  ;;  %v1037_v16 = vadd.f32 %v1036_v50, %v1004_v21  ;;  %v1147_v4 = vadd.f32 %v1114_v49, %v1113_v57  ;;  %v1116_v25 = vmul.f32 %v3036_v56, %v4047_v34  ;;  %v2980_v21 = vld [vmem:[%s7042_s3 + $0x3d8] sm:$0xff]  ;;  %v2981_v50 = vld [vmem:[%s7042_s3 + $0x3e0] sm:$0xff]  ;;  %v2982_v56 = vld [vmem:[%s7042_s3 + $0x3e8] sm:$0xff] }
 0x157   :  { %v816_v9 = vadd.f32 %v815_v37, %v782_v8  ;;  %v1117_v7 = vmul.f32 %v3037_v19, %v4167_v42  ;;  %v894_v35 = vmul.f32 %v2978_v3, %v7095_v41  ;;  %v893_v17 = vmul.f32 %v2977_v27, %v4906_v44  ;;  %v3067_v8 = vld [vmem:[%s7042_s3 + $0x690] sm:$0xff]  ;;  %v3068_v37 = vld [vmem:[%s7042_s3 + $0x698] sm:$0xff] }
 0x158   :  { %707 = vadd.xlane.f32.xlu0 %v706_v29  ;;  %v1038_v23 = vadd.f32 %v1037_v16, %v1005_v52  ;;  %v1148_v40 = vadd.f32 %v1147_v4, %v1115_v20  ;;  %v895_v0 = vmul.f32 %v2979_v2, %v4908_v11  ;;  %v1118_v52 = vmul.f32 %v3038_v46, %v4193_v12  ;;  %v2983_v20 = vld [vmem:[%s7042_s3 + $0x3f0] sm:$0xff]  ;;  %v3069_v2 = vld [vmem:[%s7042_s3 + $0x6a0] sm:$0xff]  ;;  %v3010_v46 = vld [vmem:[%s7042_s3 + $0x4c8] sm:$0xff] }
 0x159   :  { %v817_v18 = vadd.f32 %v816_v9, %v783_v60  ;;  %v1119_v49 = vmul.f32 %v3039_v14, %v4178_v54  ;;  %v1120_v63 = vmul.f32 %v3040_v26, %v4195_v30  ;;  %v896_v3 = vmul.f32 %v2980_v21, %v7096_v62  ;;  %v3009_v9 = vld [vmem:[%s7042_s3 + $0x4c0] sm:$0xff] }
 0x15a   :  { %v1039_v19 = vadd.f32 %v1038_v23, %v1006_v53  ;;  %v1149_v57 = vadd.f32 %v1148_v40, %v1116_v25  ;;  %v928_v60 = vadd.f32 %v894_v35, %v893_v17  ;;  %v1227_v29 = vmul.f32 %v3065_v5, %v4797_v22  ;;  %v3011_v25 = vld [vmem:[%s7042_s3 + $0x4d0] sm:$0xff]  ;;  %v2984_v35 = vld [vmem:[%s7042_s3 + $0x3f8] sm:$0xff]  ;;  %v3070_v23 = vld [vmem:[%s7042_s3 + $0x6a8] sm:$0xff] }
 0x15b   :  { %v818_v27 = vadd.f32 %v817_v18, %v784_v15  ;;  %v1228_v53 = vmul.f32 %v3066_v6, %v4045_v33  ;;  %v1229_v16 = vmul.f32 %v3067_v8, %v4804_v48  ;;  %v897_v26 = vmul.f32 %v2981_v50, %v4211_v58  ;;  %v3071_v6 = vld [vmem:[%s7042_s3 + $0x6b0] sm:$0xff]  ;;  %v3012_v8 = vld [vmem:[%s7042_s3 + $0x4d8] sm:$0xff] }
 0x15c   :  { %1040 = vadd.xlane.f32.xlu1 %v1039_v19  ;;  %v1150_v14 = vadd.f32 %v1149_v57, %v1117_v7  ;;  %v898_v15 = vmul.f32 %v2982_v56, %v7097_v10  ;;  %v929_v4 = vadd.f32 %v928_v60, %v895_v0  ;;  %v899_v7 = vmul.f32 %v2983_v20, %v7098_v55  ;;  %v3013_v19 = vld [vmem:[%s7042_s3 + $0x4e0] sm:$0xff]  ;;  %v3098_v20 = vld [vmem:[%s7042_s3 + $0x788] sm:$0xff] }
 0x15d   :  { %v819_v21 = vadd.f32 %v818_v27, %v785_v59  ;;  %v1230_v40 = vmul.f32 %v3068_v37, %v4047_v34  ;;  %v1261_v17 = vadd.f32 %v1228_v53, %v1227_v29  ;;  %v1231_v59 = vmul.f32 %v3069_v2, %v4167_v42  ;;  %v3099_v2 = vld [vmem:[%s7042_s3 + $0x790] sm:$0xff]  ;;  %v3072_v29 = vld [vmem:[%s7042_s3 + $0x6b8] sm:$0xff] }
 0x15e   :  { %v1151_v0 = vadd.f32 %v1150_v14, %v1118_v52  ;;  %v930_v5 = vadd.f32 %v929_v4, %v896_v3  ;;  %v1008_v18 = vmul.f32 %v3010_v46, %v7095_v41  ;;  %v1007_v52 = vmul.f32 %v3009_v9, %v4906_v44  ;;  %v3015_v46 = vld [vmem:[%s7042_s3 + $0x4f0] sm:$0xff] }
 0x15f   :  { %v820_v50 = vadd.f32 %v819_v21, %v786_v45  ;;  %v1262_v56 = vadd.f32 %v1261_v17, %v1229_v16  ;;  %v1009_v57 = vmul.f32 %v3011_v25, %v4908_v11  ;;  %v900_v60 = vmul.f32 %v2984_v35, %v7099_v13  ;;  %v3097_v45 = vld [vmem:[%s7042_s3 + $0x780] sm:$0xff]  ;;  %v3014_v16 = vld [vmem:[%s7042_s3 + $0x4e8] sm:$0xff]  ;;  %v3100_v21 = vld [vmem:[%s7042_s3 + $0x798] sm:$0xff] }
 0x160   :  { %v1152_v3 = vadd.f32 %v1151_v0, %v1119_v49  ;;  %v931_v37 = vadd.f32 %v930_v5, %v897_v26  ;;  %v1232_v27 = vmul.f32 %v3070_v23, %v4193_v12  ;;  %v1233_v49 = vmul.f32 %v3071_v6, %v4178_v54  ;;  %v3101_v17 = vld [vmem:[%s7042_s3 + $0x7a0] sm:$0xff] }
 0x161   :  { %821 = vadd.xlane.f32.xlu0 %v820_v50  ;;  %v1263_v53 = vadd.f32 %v1262_v56, %v1230_v40  ;;  %v1010_v14 = vmul.f32 %v3012_v8, %v7096_v62  ;;  %v1042_v26 = vadd.f32 %v1008_v18, %v1007_v52  ;;  %v1011_v25 = vmul.f32 %v3013_v19, %v4211_v58  ;;  %v3016_v8 = vld [vmem:[%s7042_s3 + $0x4f8] sm:$0xff]  ;;  %v3043_v56 = vld [vmem:[%s7042_s3 + $0x5d0] sm:$0xff] }
 0x162   :  { %v1153_v4 = vadd.f32 %v1152_v3, %v1120_v63  ;;  %v932_v9 = vadd.f32 %v931_v37, %v898_v15  ;;  %v1342_v35 = vmul.f32 %v3098_v20, %v4045_v33  ;;  %v1341_v0 = vmul.f32 %v3097_v45, %v4797_v22  ;;  %v3041_v63 = vld [vmem:[%s7042_s3 + $0x5c0] sm:$0xff]  ;;  %v3042_v15 = vld [vmem:[%s7042_s3 + $0x5c8] sm:$0xff]  ;;  %v3104_v20 = vld [vmem:[%s7042_s3 + $0x7b8] sm:$0xff] }
 0x163   :  { %v1264_v23 = vadd.f32 %v1263_v53, %v1231_v59  ;;  %v1043_v40 = vadd.f32 %v1042_v26, %v1009_v57  ;;  %v1343_v5 = vmul.f32 %v3099_v2, %v4804_v48  ;;  %v1234_v59 = vmul.f32 %v3072_v29, %v4195_v30  ;;  %v3103_v57 = vld [vmem:[%s7042_s3 + $0x7b0] sm:$0xff]  ;;  %v3129_v53 = vld [vmem:[%s7042_s3 + $0x880] sm:$0xff]  ;;  %v3044_v26 = vld [vmem:[%s7042_s3 + $0x5d8] sm:$0xff] }
 0x164   :  { %1154 = vadd.xlane.f32.xlu1 %v1153_v4  ;;  %v933_v6 = vadd.f32 %v932_v9, %v899_v7  ;;  %v1012_v18 = vmul.f32 %v3014_v16, %v7097_v10  ;;  %v1013_v50 = vmul.f32 %v3015_v46, %v7098_v55  ;;  %v3102_v7 = vld [vmem:[%s7042_s3 + $0x7a8] sm:$0xff]  ;;  %v1344_v3 = vmul.f32 %v3100_v21, %v4047_v34  ;;  %v3131_v9 = vld [vmem:[%s7042_s3 + $0x890] sm:$0xff] }
 0x165   :  { %v1265_v19 = vadd.f32 %v1264_v23, %v1232_v27  ;;  %v1044_v52 = vadd.f32 %v1043_v40, %v1010_v14  ;;  %v1375_v37 = vadd.f32 %v1342_v35, %v1341_v0  ;;  %v1345_v2 = vmul.f32 %v3101_v17, %v4167_v42  ;;  %v3045_v23 = vld [vmem:[%s7042_s3 + $0x5e0] sm:$0xff] }
 0x166   :  { %v934_v45 = vadd.f32 %v933_v6, %v900_v60  ;;  %v1121_v27 = vmul.f32 %v3041_v63, %v4906_v44  ;;  %v1122_v29 = vmul.f32 %v3042_v15, %v7095_v41  ;;  %v1123_v4 = vmul.f32 %v3043_v56, %v4908_v11  ;;  %v3130_v60 = vld [vmem:[%s7042_s3 + $0x888] sm:$0xff]  ;;  %v3047_v63 = vld [vmem:[%s7042_s3 + $0x5f0] sm:$0xff]  ;;  %v3132_v6 = vld [vmem:[%s7042_s3 + $0x898] sm:$0xff] }
 0x167   :  { %v1266_v16 = vadd.f32 %v1265_v19, %v1233_v49  ;;  %v1045_v46 = vadd.f32 %v1044_v52, %v1011_v25  ;;  %v1376_v14 = vadd.f32 %v1375_v37, %v1343_v5  ;;  %v1014_v21 = vmul.f32 %v3016_v8, %v7099_v13  ;;  %v3046_v5 = vld [vmem:[%s7042_s3 + $0x5e8] sm:$0xff] }
 0x168   :  { %935 = vadd.xlane.f32.xlu0 %v934_v45  ;;  %v1346_v49 = vmul.f32 %v3102_v7, %v4193_v12  ;;  %v1347_v25 = vmul.f32 %v3103_v57, %v4178_v54  ;;  %v1348_v35 = vmul.f32 %v3104_v20, %v4195_v30  ;;  %v1156_v15 = vadd.f32 %v1122_v29, %v1121_v27  ;;  %v3074_v37 = vld [vmem:[%s7042_s3 + $0x6c8] sm:$0xff]  ;;  %v3075_v45 = vld [vmem:[%s7042_s3 + $0x6d0] sm:$0xff] }
 0x169   :  { %v1267_v40 = vadd.f32 %v1266_v16, %v1234_v59  ;;  %v1046_v17 = vadd.f32 %v1045_v46, %v1012_v18  ;;  %v1377_v0 = vadd.f32 %v1376_v14, %v1344_v3  ;;  %v1124_v8 = vmul.f32 %v3044_v26, %v7096_v62  ;;  %v3133_v59 = vld [vmem:[%s7042_s3 + $0x8a0] sm:$0xff]  ;;  %v3134_v29 = vld [vmem:[%s7042_s3 + $0x8a8] sm:$0xff] }
 0x16a   :  { %v1455_v18 = vmul.f32 %v3129_v53, %v4797_v22  ;;  %v1456_v56 = vmul.f32 %v3130_v60, %v4045_v33  ;;  %v1457_v19 = vmul.f32 %v3131_v9, %v4804_v48  ;;  %v1125_v57 = vmul.f32 %v3045_v23, %v4211_v58  ;;  %v3073_v3 = vld [vmem:[%s7042_s3 + $0x6c0] sm:$0xff]  ;;  %v3076_v9 = vld [vmem:[%s7042_s3 + $0x6d8] sm:$0xff] }
 0x16b   :  { %1268 = vadd.xlane.f32.xlu1 %v1267_v40  ;;  %v1047_v52 = vadd.f32 %v1046_v17, %v1013_v50  ;;  %v1378_v7 = vadd.f32 %v1377_v0, %v1345_v2  ;;  %v1157_v20 = vadd.f32 %v1156_v15, %v1123_v4  ;;  %v3048_v50 = vld [vmem:[%s7042_s3 + $0x5f8] sm:$0xff]  ;;  %v1126_v2 = vmul.f32 %v3046_v5, %v7097_v10  ;;  %v3135_v4 = vld [vmem:[%s7042_s3 + $0x8b0] sm:$0xff]  ;;  %v3077_v40 = vld [vmem:[%s7042_s3 + $0x6e0] sm:$0xff] }
 0x16c   :  { %v1127_v27 = vmul.f32 %v3047_v63, %v7098_v55  ;;  %v1458_v53 = vmul.f32 %v3132_v6, %v4047_v34  ;;  %v1489_v16 = vadd.f32 %v1456_v56, %v1455_v18  ;;  %v1459_v60 = vmul.f32 %v3133_v59, %v4167_v42  ;;  %v3162_v0 = vld [vmem:[%s7042_s3 + $0x988] sm:$0xff]  ;;  %v3163_v59 = vld [vmem:[%s7042_s3 + $0x990] sm:$0xff]  ;;  %v3136_v18 = vld [vmem:[%s7042_s3 + $0x8b8] sm:$0xff] }
 0x16d   :  { %v1048_v46 = vadd.f32 %v1047_v52, %v1014_v21  ;;  %v1379_v14 = vadd.f32 %v1378_v7, %v1346_v49  ;;  %v1158_v26 = vadd.f32 %v1157_v20, %v1124_v8  ;;  %v1235_v17 = vmul.f32 %v3073_v3, %v4906_v44  ;;  %v3161_v8 = vld [vmem:[%s7042_s3 + $0x980] sm:$0xff]  ;;  %v3079_v52 = vld [vmem:[%s7042_s3 + $0x6f0] sm:$0xff] }
 0x16e   :  { %v1490_v23 = vadd.f32 %v1489_v16, %v1457_v19  ;;  %v1236_v21 = vmul.f32 %v3074_v37, %v7095_v41  ;;  %v1237_v49 = vmul.f32 %v3075_v45, %v4908_v11  ;;  %v1128_v63 = vmul.f32 %v3048_v50, %v7099_v13  ;;  %v3078_v19 = vld [vmem:[%s7042_s3 + $0x6e8] sm:$0xff]  ;;  %v3164_v45 = vld [vmem:[%s7042_s3 + $0x998] sm:$0xff]  ;;  %v3165_v16 = vld [vmem:[%s7042_s3 + $0x9a0] sm:$0xff] }
 0x16f   :  { %1049 = vadd.xlane.f32.xlu0 %v1048_v46  ;;  %v1380_v5 = vadd.f32 %v1379_v14, %v1347_v25  ;;  %v1159_v15 = vadd.f32 %v1158_v26, %v1125_v57  ;;  %v1460_v6 = vmul.f32 %v3134_v29, %v4193_v12  ;;  %v1461_v56 = vmul.f32 %v3135_v4, %v4178_v54  ;;  %v3080_v4 = vld [vmem:[%s7042_s3 + $0x6f8] sm:$0xff] }
 0x170   :  { %v1491_v25 = vadd.f32 %v1490_v23, %v1458_v53  ;;  %v1238_v7 = vmul.f32 %v3076_v9, %v7096_v62  ;;  %v1270_v57 = vadd.f32 %v1236_v21, %v1235_v17  ;;  %v1239_v37 = vmul.f32 %v3077_v40, %v4211_v58  ;;  %v3167_v40 = vld [vmem:[%s7042_s3 + $0x9b0] sm:$0xff]  ;;  %v3168_v17 = vld [vmem:[%s7042_s3 + $0x9b8] sm:$0xff] }
 0x171   :  { %v1381_v20 = vadd.f32 %v1380_v5, %v1348_v35  ;;  %v1160_v3 = vadd.f32 %v1159_v15, %v1126_v2  ;;  %v1570_v50 = vmul.f32 %v3162_v0, %v4045_v33  ;;  %v1569_v46 = vmul.f32 %v3161_v8, %v4797_v22  ;;  %v3105_v35 = vld [vmem:[%s7042_s3 + $0x7c0] sm:$0xff]  ;;  %v3106_v2 = vld [vmem:[%s7042_s3 + $0x7c8] sm:$0xff] }
 0x172   :  { %v1492_v29 = vadd.f32 %v1491_v25, %v1459_v60  ;;  %v1271_v53 = vadd.f32 %v1270_v57, %v1237_v49  ;;  %v1571_v14 = vmul.f32 %v3163_v59, %v4804_v48  ;;  %v1462_v26 = vmul.f32 %v3136_v18, %v4195_v30  ;;  %v3107_v60 = vld [vmem:[%s7042_s3 + $0x7d0] sm:$0xff]  ;;  %v3108_v25 = vld [vmem:[%s7042_s3 + $0x7d8] sm:$0xff] }
 0x173   :  { %1382 = vadd.xlane.f32.xlu1 %v1381_v20  ;;  %v1161_v33 = vadd.f32 %v1160_v3, %v1127_v27  ;;  %v1240_v22 = vmul.f32 %v3078_v19, %v7097_v10  ;;  %v1241_v48 = vmul.f32 %v3079_v52, %v7098_v55  ;;  %v3166_v27 = vld [vmem:[%s7042_s3 + $0x9a8] sm:$0xff]  ;;  %v1572_v21 = vmul.f32 %v3164_v45, %v4047_v34  ;;  %v3109_v19 = vld [vmem:[%s7042_s3 + $0x7e0] sm:$0xff] }
 0x174   :  { %v1493_v9 = vadd.f32 %v1492_v29, %v1460_v6  ;;  %v1272_v23 = vadd.f32 %v1271_v53, %v1238_v7  ;;  %v1603_v49 = vadd.f32 %v1570_v50, %v1569_v46  ;;  %v1573_v5 = vmul.f32 %v3165_v16, %v4167_v42  ;;  %v3110_v7 = vld [vmem:[%s7042_s3 + $0x7e8] sm:$0xff]  ;;  %v7101_v16 = vld [vmem:[#allocation16_spill] sm:$0xff] }
 0x175   :  { %v1162_v0 = vadd.f32 %v1161_v33, %v1128_v63  ;;  %v1349_v15 = vmul.f32 %v3105_v35, %v4906_v44  ;;  %v1350_v6 = vmul.f32 %v3106_v2, %v7095_v41  ;;  %v1351_v34 = vmul.f32 %v3107_v60, %v4908_v11  ;;  %v3231_v53 = vld [vmem:[%s7042_s3 + $0x48] sm:$0xff] }
 0x176   :  { %v1494_v8 = vadd.f32 %v1493_v9, %v1461_v56  ;;  %v1273_v59 = vadd.f32 %v1272_v23, %v1239_v37  ;;  %v1604_v18 = vadd.f32 %v1603_v49, %v1571_v14  ;;  %v1242_v42 = vmul.f32 %v3080_v4, %v7099_v13  ;;  %v3111_v37 = vld [vmem:[%s7042_s3 + $0x7f0] sm:$0xff]  ;;  %v3138_v4 = vld [vmem:[%s7042_s3 + $0x8c8] sm:$0xff] }
 0x177   :  { %1163 = vadd.xlane.f32.xlu0 %v1162_v0  ;;  %v1574_v63 = vmul.f32 %v3166_v27, %v4193_v12  ;;  %v1575_v52 = vmul.f32 %v3167_v40, %v4178_v54  ;;  %v1576_v56 = vmul.f32 %v3168_v17, %v4195_v30  ;;  %v1384_v45 = vadd.f32 %v1350_v6, %v1349_v15  ;;  %v3230_v54 = vld [vmem:[%s7042_s3 + $0x40] sm:$0xff]  ;;  %v7100_v30 = vld [vmem:[#allocation14_spill] sm:$0xff]  ;;  %v7102_v23 = vld [vmem:[#allocation15_spill] sm:$0xff] }
 0x178   :  { %v1495_v57 = vadd.f32 %v1494_v8, %v1462_v26  ;;  %v1274_v20 = vadd.f32 %v1273_v59, %v1240_v22  ;;  %v1605_v3 = vadd.f32 %v1604_v18, %v1572_v21  ;;  %v1352_v50 = vmul.f32 %v3108_v25, %v7096_v62  ;;  %v3137_v26 = vld [vmem:[%s7042_s3 + $0x8c0] sm:$0xff]  ;;  %v3139_v22 = vld [vmem:[%s7042_s3 + $0x8d0] sm:$0xff]  ;;  %v3233_v40 = vld [vmem:[%s7042_s3 + $0x58] sm:$0xff] }
 0x179   :  { %v1353_v12 = vmul.f32 %v3109_v19, %v4211_v58  ;;  %v2063_v29 = vmul.f32 %v3230_v54, %v7100_v30  ;;  %v2064_v46 = vmul.f32 %v3231_v53, %v7101_v16  ;;  %v1354_v2 = vmul.f32 %v3110_v7, %v7097_v10  ;;  %v3232_v9 = vld [vmem:[%s7042_s3 + $0x50] sm:$0xff]  ;;  %v7103_v17 = vld [vmem:[#allocation17_spill] sm:$0xff]  ;;  %v3140_v18 = vld [vmem:[%s7042_s3 + $0x8d8] sm:$0xff] }
 0x17a   :  { %1496 = vadd.xlane.f32.xlu1 %v1495_v57  ;;  %v1275_v14 = vadd.f32 %v1274_v20, %v1241_v48  ;;  %v1606_v35 = vadd.f32 %v1605_v3, %v1573_v5  ;;  %v1385_v33 = vadd.f32 %v1384_v45, %v1351_v34  ;;  %v3112_v48 = vld [vmem:[%s7042_s3 + $0x7f8] sm:$0xff]  ;;  %v1355_v60 = vmul.f32 %v3111_v37, %v7098_v55  ;;  %v3234_v6 = vld [vmem:[%s7042_s3 + $0x60] sm:$0xff]  ;;  %v3235_v57 = vld [vmem:[%s7042_s3 + $0x68] sm:$0xff] }
 0x17b   :  { %v2065_v27 = vmul.f32 %v3232_v9, %v7102_v23  ;;  %v2066_v21 = vmul.f32 %v3233_v40, %v7103_v17  ;;  %v2096_v49 = vadd.f32 %v2064_v46, %v2063_v29  ;;  %v2067_v8 = vmul.f32 %v3234_v6, %v4527_v47  ;;  %v3141_v3 = vld [vmem:[%s7042_s3 + $0x8e0] sm:$0xff]  ;;  %v3236_v37 = vld [vmem:[%s7042_s3 + $0x70] sm:$0xff]  ;;  %v3142_v54 = vld [vmem:[%s7042_s3 + $0x8e8] sm:$0xff] }
 0x17c   :  { %v1276_v0 = vadd.f32 %v1275_v14, %v1242_v42  ;;  %v1607_v5 = vadd.f32 %v1606_v35, %v1574_v63  ;;  %v1386_v15 = vadd.f32 %v1385_v33, %v1352_v50  ;;  %v1463_v25 = vmul.f32 %v3137_v26, %v4906_v44  ;;  %v3143_v29 = vld [vmem:[%s7042_s3 + $0x8f0] sm:$0xff]  ;;  %v3238_v33 = vld [vmem:[%s7042_s3 + $0x148] sm:$0xff]  ;;  %v3239_v9 = vld [vmem:[%s7042_s3 + $0x140] sm:$0xff] }
 0x17d   :  { %v2097_v59 = vadd.f32 %v2096_v49, %v2065_v27  ;;  %v1464_v19 = vmul.f32 %v3138_v4, %v7095_v41  ;;  %v1465_v34 = vmul.f32 %v3139_v22, %v4908_v11  ;;  %v1356_v63 = vmul.f32 %v3112_v48, %v7099_v13 }
 0x17e   :  { %1277 = vadd.xlane.f32.xlu0 %v1276_v0  ;;  %v1608_v42 = vadd.f32 %v1607_v5, %v1575_v52  ;;  %v1387_v7 = vadd.f32 %v1386_v15, %v1353_v12  ;;  %v2068_v20 = vmul.f32 %v3235_v57, %v4531_v1  ;;  %v2069_v45 = vmul.f32 %v3236_v37, %v4529_v31  ;;  %v3237_v52 = vld [vmem:[%s7042_s3 + $0x78] sm:$0xff]  ;;  %v3240_v0 = vld [vmem:[%s7042_s3 + $0x150] sm:$0xff] }
 0x17f   :  { %v2070_v50 = vmul.f32 %v3237_v52, %v4539_v43  ;;  %v2098_v12 = vadd.f32 %v2097_v59, %v2066_v21  ;;  %v1498_v53 = vadd.f32 %v1464_v19, %v1463_v25  ;;  %v1466_v35 = vmul.f32 %v3140_v18, %v7096_v62  ;;  %v3171_v15 = vld [vmem:[%s7042_s3 + $0x9d0] sm:$0xff]  ;;  %v3241_v59 = vld [vmem:[%s7042_s3 + $0x158] sm:$0xff] }
 0x180   :  { %v1609_v46 = vadd.f32 %v1608_v42, %v1576_v56  ;;  %v1388_v14 = vadd.f32 %v1387_v7, %v1354_v2  ;;  %v2145_v26 = vmul.f32 %v3238_v33, %v7101_v16  ;;  %v1467_v22 = vmul.f32 %v3141_v3, %v4211_v58  ;;  %v3169_v56 = vld [vmem:[%s7042_s3 + $0x9c0] sm:$0xff]  ;;  %v3170_v2 = vld [vmem:[%s7042_s3 + $0x9c8] sm:$0xff]  ;;  %v3172_v52 = vld [vmem:[%s7042_s3 + $0x9d8] sm:$0xff] }
 0x181   :  { %v2099_v4 = vadd.f32 %v2098_v12, %v2067_v8  ;;  %v1499_v48 = vadd.f32 %v1498_v53, %v1465_v34  ;;  %v2144_v27 = vmul.f32 %v3239_v9, %v7100_v30  ;;  %v1468_v21 = vmul.f32 %v3142_v54, %v7097_v10  ;;  %v3144_v8 = vld [vmem:[%s7042_s3 + $0x8f8] sm:$0xff]  ;;  %v3242_v34 = vld [vmem:[%s7042_s3 + $0x160] sm:$0xff]  ;;  %v3247_v9 = vld [vmem:[%s7042_s3 + $0x248] sm:$0xff] }
 0x182   :  { %1610 = vadd.xlane.f32.xlu1 %v1609_v46  ;;  %v1389_v40 = vadd.f32 %v1388_v14, %v1355_v60  ;;  %v1469_v49 = vmul.f32 %v3143_v29, %v7098_v55  ;;  %v2146_v5 = vmul.f32 %v3240_v0, %v7102_v23  ;;  %v2147_v18 = vmul.f32 %v3241_v59, %v7103_v17  ;;  %v3174_v14 = vld [vmem:[%s7042_s3 + $0x9e8] sm:$0xff] }
 0x183   :  { %v2100_v6 = vadd.f32 %v2099_v4, %v2068_v20  ;;  %v1500_v60 = vadd.f32 %v1499_v48, %v1466_v35  ;;  %v2177_v25 = vadd.f32 %v2145_v26, %v2144_v27  ;;  %v2148_v42 = vmul.f32 %v3242_v34, %v4527_v47  ;;  %v3175_v35 = vld [vmem:[%s7042_s3 + $0x9f0] sm:$0xff]  ;;  %v3245_v26 = vld [vmem:[%s7042_s3 + $0x178] sm:$0xff] }
 0x184   :  { %v1390_v19 = vadd.f32 %v1389_v40, %v1356_v63  ;;  %v1577_v7 = vmul.f32 %v3169_v56, %v4906_v44  ;;  %v1578_v57 = vmul.f32 %v3170_v2, %v7095_v41  ;;  %v1579_v12 = vmul.f32 %v3171_v15, %v4908_v11  ;;  %v3243_v44 = vld [vmem:[%s7042_s3 + $0x168] sm:$0xff]  ;;  %v3248_v15 = vld [vmem:[%s7042_s3 + $0x250] sm:$0xff] }
 0x185   :  { %v2101_v20 = vadd.f32 %v2100_v6, %v2069_v45  ;;  %v1501_v3 = vadd.f32 %v1500_v60, %v1467_v22  ;;  %v2178_v37 = vadd.f32 %v2177_v25, %v2146_v5  ;;  %v5485_v63 = vmax.f32 %v4688_v39, 0.0  ;;  %v3244_v45 = vld [vmem:[%s7042_s3 + $0x170] sm:$0xff]  ;;  %v3173_v39 = vld [vmem:[%s7042_s3 + $0x9e0] sm:$0xff] }
 0x186   :  { %1391 = vadd.xlane.f32.xlu0 %v1390_v19  ;;  %v1470_v54 = vmul.f32 %v3144_v8, %v7099_v13  ;;  %v2149_v41 = vmul.f32 %v3243_v44, %v4531_v1  ;;  %v2150_v29 = vmul.f32 %v3244_v45, %v4529_v31  ;;  %v1612_v33 = vadd.f32 %v1578_v57, %v1577_v7  ;;  %v3251_v19 = vld [vmem:[%s7042_s3] sm:$0xff]  ;;  %v7104_v34 = vld [vmem:[#allocation10_spill] sm:$0xff] }
 0x187   :  { %v2102_v11 = vadd.f32 %v2101_v20, %v2070_v50  ;;  %v1502_v53 = vadd.f32 %v1501_v3, %v1468_v21  ;;  %v2179_v46 = vadd.f32 %v2178_v37, %v2147_v18  ;;  %v2151_v4 = vmul.f32 %v3245_v26, %v4539_v43  ;;  %v3246_v50 = vld [vmem:[%s7042_s3 + $0x240] sm:$0xff]  ;;  %v3252_v7 = vld [vmem:[%s7042_s3 + $0x8] sm:$0xff]  ;;  %v3254_v44 = vld [vmem:[%s7042_s3 + $0x270] sm:$0xff] }
 0x188   :  { %v1580_v22 = vmul.f32 %v3172_v52, %v7096_v62  ;;  %v2224_v48 = vmul.f32 %v3246_v50, %v7100_v30  ;;  %v2225_v27 = vmul.f32 %v3247_v9, %v7101_v16  ;;  %v1581_v40 = vmul.f32 %v3173_v39, %v4211_v58  ;;  %v3176_v62 = vld [vmem:[%s7042_s3 + $0x9f8] sm:$0xff]  ;;  %v3257_v26 = vld [vmem:[%s7042_s3 + $0x348] sm:$0xff] }
 0x189   :  { %2103 = vadd.xlane.f32.xlu1 %v2102_v11  ;;  %v1503_v56 = vadd.f32 %v1502_v53, %v1469_v49  ;;  %v2180_v2 = vadd.f32 %v2179_v46, %v2148_v42  ;;  %v1613_v21 = vadd.f32 %v1612_v33, %v1579_v12  ;;  %v1582_v0 = vmul.f32 %v3174_v14, %v7097_v10  ;;  %v3249_v58 = vld [vmem:[%s7042_s3 + $0x258] sm:$0xff]  ;;  %v3250_v10 = vld [vmem:[%s7042_s3 + $0x260] sm:$0xff]  ;;  %v3253_v12 = vld [vmem:[%s7042_s3 + $0x268] sm:$0xff] }
 0x18a   :  { %v1583_v5 = vmul.f32 %v3175_v35, %v7098_v55  ;;  %v2226_v6 = vmul.f32 %v3248_v15, %v7102_v23  ;;  %v2257_v8 = vadd.f32 %v2225_v27, %v2224_v48  ;;  %v2227_v18 = vmul.f32 %v3249_v58, %v7103_v17  ;;  %v7105_v57 = vld [vmem:[#allocation12_spill] sm:$0xff]  ;;  %v7106_v39 = vld [vmem:[#allocation11_spill] sm:$0xff]  ;;  %v7107_v35 = vld [vmem:[#allocation13_spill] sm:$0xff] }
 0x18b   :  { %v1504_v49 = vadd.f32 %v1503_v56, %v1470_v54  ;;  %v2181_v60 = vadd.f32 %v2180_v2, %v2149_v41  ;;  %v1614_v59 = vadd.f32 %v1613_v21, %v1580_v22  ;;  %v2228_v55 = vmul.f32 %v3250_v10, %v4527_v47  ;;  %v3256_v14 = vld [vmem:[%s7042_s3 + $0x18] sm:$0xff]  ;;  %v3258_v48 = vld [vmem:[%s7042_s3 + $0x20] sm:$0xff]  ;;  %v3262_v15 = vld [vmem:[%s7042_s3 + $0x30] sm:$0xff] }
 0x18c   :  { %v2258_v25 = vadd.f32 %v2257_v8, %v2226_v6  ;;  %v2055_v42 = vmul.f32 %v3251_v19, %v7104_v34  ;;  %v2056_v20 = vmul.f32 %v3252_v7, %v7105_v57  ;;  %v1584_v37 = vmul.f32 %v3176_v62, %v7099_v13  ;;  %v3259_v27 = vld [vmem:[%s7042_s3 + $0x340] sm:$0xff]  ;;  %v3261_v62 = vld [vmem:[%s7042_s3 + $0x28] sm:$0xff] }
 0x18d   :  { %1505 = vadd.xlane.f32.xlu0 %v1504_v49  ;;  %v2182_v3 = vadd.f32 %v2181_v60, %v2150_v29  ;;  %v1615_v52 = vadd.f32 %v1614_v59, %v1581_v40  ;;  %v2229_v54 = vmul.f32 %v3253_v12, %v4531_v1  ;;  %v2230_v41 = vmul.f32 %v3254_v44, %v4529_v31  ;;  %v3255_v29 = vld [vmem:[%s7042_s3 + $0x10] sm:$0xff]  ;;  %v3260_v40 = vld [vmem:[%s7042_s3 + $0x278] sm:$0xff]  ;;  %v3266_v19 = vld [vmem:[%s7042_s3 + $0x108] sm:$0xff] }
 0x18e   :  { %v2259_v45 = vadd.f32 %v2258_v25, %v2227_v18  ;;  %v2057_v13 = vmul.f32 %v3255_v29, %v7106_v39  ;;  %v2087_v11 = vadd.f32 %v2056_v20, %v2055_v42  ;;  %v2058_v33 = vmul.f32 %v3256_v14, %v7107_v35  ;;  %v3263_v49 = vld [vmem:[%s7042_s3 + $0x350] sm:$0xff]  ;;  %v3264_v18 = vld [vmem:[%s7042_s3 + $0x358] sm:$0xff]  ;;  %v3269_v44 = vld [vmem:[%s7042_s3 + $0x368] sm:$0xff] }
 0x18f   :  { %v2183_v53 = vadd.f32 %v2182_v3, %v2151_v4  ;;  %v1616_v46 = vadd.f32 %v1615_v52, %v1582_v0  ;;  %v2305_v22 = vmul.f32 %v3257_v26, %v7101_v16  ;;  %v2059_v4 = vmul.f32 %v3258_v48, %v4438_v28  ;;  %v3268_v12 = vld [vmem:[%s7042_s3 + $0x38] sm:$0xff] }
 0x190   :  { %v2260_v50 = vadd.f32 %v2259_v45, %v2228_v55  ;;  %v2088_v9 = vadd.f32 %v2087_v11, %v2057_v13  ;;  %v2304_v56 = vmul.f32 %v3259_v27, %v7100_v30  ;;  %v2231_v21 = vmul.f32 %v3260_v40, %v4539_v43  ;;  %v3265_v55 = vld [vmem:[%s7042_s3 + $0x360] sm:$0xff]  ;;  %v3270_v45 = vld [vmem:[%s7042_s3 + $0x370] sm:$0xff]  ;;  %v3272_v26 = vld [vmem:[%s7042_s3 + $0x378] sm:$0xff] }
 0x191   :  { %2184 = vadd.xlane.f32.xlu1 %v2183_v53  ;;  %v1617_v2 = vadd.f32 %v1616_v46, %v1583_v5  ;;  %v2060_v0 = vmul.f32 %v3261_v62, %v4454_v24  ;;  %v2061_v6 = vmul.f32 %v3262_v15, %v4452_v51  ;;  %v2306_v60 = vmul.f32 %v3263_v49, %v7102_v23  ;;  %v3271_v13 = vld [vmem:[%s7042_s3 + $0x110] sm:$0xff]  ;;  %v3275_v27 = vld [vmem:[%s7042_s3 + $0x448] sm:$0xff] }
 0x192   :  { %v2261_v8 = vadd.f32 %v2260_v50, %v2229_v54  ;;  %v2089_v5 = vadd.f32 %v2088_v9, %v2058_v33  ;;  %v2337_v59 = vadd.f32 %v2305_v22, %v2304_v56  ;;  %v2307_v10 = vmul.f32 %v3264_v18, %v7103_v17  ;;  %v3273_v50 = vld [vmem:[%s7042_s3 + $0x118] sm:$0xff]  ;;  %v3277_v15 = vld [vmem:[%s7042_s3 + $0x128] sm:$0xff]  ;;  %v3279_v49 = vld [vmem:[%s7042_s3 + $0x450] sm:$0xff] }
 0x193   :  { %v1618_v58 = vadd.f32 %v1617_v2, %v1584_v37  ;;  %v2308_v25 = vmul.f32 %v3265_v55, %v4527_v47  ;;  %v2137_v42 = vmul.f32 %v3266_v19, %v7105_v57  ;;  %v3267_v37 = vld [vmem:[%s7042_s3 + $0x100] sm:$0xff]  ;;  %v2062_v54 = vmul.f32 %v3268_v12, %v4456_v38  ;;  %v3280_v55 = vld [vmem:[%s7042_s3 + $0x458] sm:$0xff] }
 0x194   :  { %v2262_v7 = vadd.f32 %v2261_v8, %v2230_v41  ;;  %v2090_v20 = vadd.f32 %v2089_v5, %v2059_v4  ;;  %v2338_v3 = vadd.f32 %v2337_v59, %v2306_v60  ;;  %v2136_v52 = vmul.f32 %v3267_v37, %v7104_v34  ;;  %v3274_v4 = vld [vmem:[%s7042_s3 + $0x440] sm:$0xff]  ;;  %v3278_v5 = vld [vmem:[%s7042_s3 + $0x130] sm:$0xff]  ;;  %v3283_v37 = vld [vmem:[%s7042_s3 + $0x208] sm:$0xff] }
 0x195   :  { %1619 = vadd.xlane.f32.xlu0 %v1618_v58  ;;  %v2309_v41 = vmul.f32 %v3269_v44, %v4531_v1  ;;  %v2310_v29 = vmul.f32 %v3270_v45, %v4529_v31  ;;  %v2138_v11 = vmul.f32 %v3271_v13, %v7106_v39  ;;  %v2311_v22 = vmul.f32 %v3272_v26, %v4539_v43  ;;  %v3281_v19 = vld [vmem:[%s7042_s3 + $0x460] sm:$0xff]  ;;  %v3285_v45 = vld [vmem:[%s7042_s3 + $0x468] sm:$0xff] }
 0x196   :  { %v2263_v53 = vadd.f32 %v2262_v7, %v2231_v21  ;;  %v2091_v46 = vadd.f32 %v2090_v20, %v2060_v0  ;;  %v2339_v14 = vadd.f32 %v2338_v3, %v2307_v10  ;;  %v2168_v33 = vadd.f32 %v2137_v42, %v2136_v52  ;;  %v3276_v21 = vld [vmem:[%s7042_s3 + $0x120] sm:$0xff] }
 0x197   :  { %v2139_v48 = vmul.f32 %v3273_v50, %v7107_v35  ;;  %v2384_v9 = vmul.f32 %v3274_v4, %v7100_v30  ;;  %v2385_v56 = vmul.f32 %v3275_v27, %v7101_v16  ;;  %v2140_v62 = vmul.f32 %v3276_v21, %v4438_v28  ;;  %v3282_v20 = vld [vmem:[%s7042_s3 + $0x200] sm:$0xff] }
 0x198   :  { %2264 = vadd.xlane.f32.xlu1 %v2263_v53  ;;  %v2092_v2 = vadd.f32 %v2091_v46, %v2061_v6  ;;  %v2340_v40 = vadd.f32 %v2339_v14, %v2308_v25  ;;  %v2169_v0 = vadd.f32 %v2168_v33, %v2138_v11  ;;  %v2141_v8 = vmul.f32 %v3277_v15, %v4454_v24  ;;  %v3286_v11 = vld [vmem:[%s7042_s3 + $0x470] sm:$0xff]  ;;  %v3291_v21 = vld [vmem:[%s7042_s3 + $0x540] sm:$0xff]  ;;  %v3292_v15 = vld [vmem:[%s7042_s3 + $0x478] sm:$0xff] }
 0x199   :  { %v2142_v6 = vmul.f32 %v3278_v5, %v4452_v51  ;;  %v2386_v60 = vmul.f32 %v3279_v49, %v7102_v23  ;;  %v2417_v59 = vadd.f32 %v2385_v56, %v2384_v9  ;;  %v2387_v25 = vmul.f32 %v3280_v55, %v7103_v17  ;;  %v3287_v46 = vld [vmem:[%s7042_s3 + $0x210] sm:$0xff]  ;;  %v3289_v9 = vld [vmem:[%s7042_s3 + $0x548] sm:$0xff] }
 0x19a   :  { %v2093_v58 = vadd.f32 %v2092_v2, %v2062_v54  ;;  %v2341_v18 = vadd.f32 %v2340_v40, %v2309_v41  ;;  %v2170_v10 = vadd.f32 %v2169_v0, %v2139_v48  ;;  %v2388_v42 = vmul.f32 %v3281_v19, %v4527_v47  ;;  %v3284_v54 = vld [vmem:[%s7042_s3 + $0x138] sm:$0xff]  ;;  %v3290_v2 = vld [vmem:[%s7042_s3 + $0x220] sm:$0xff]  ;;  %v3293_v5 = vld [vmem:[%s7042_s3 + $0x228] sm:$0xff] }
 0x19b   :  { %v2418_v7 = vadd.f32 %v2417_v59, %v2386_v60  ;;  %v2216_v3 = vmul.f32 %v3282_v20, %v7104_v34  ;;  %v2217_v52 = vmul.f32 %v3283_v37, %v7105_v57  ;;  %v2143_v44 = vmul.f32 %v3284_v54, %v4456_v38  ;;  %v3288_v48 = vld [vmem:[%s7042_s3 + $0x218] sm:$0xff]  ;;  %v3294_v60 = vld [vmem:[%s7042_s3 + $0x230] sm:$0xff] }
 0x19c   :  { %2094 = vadd.xlane.f32.xlu0 %v2093_v58  ;;  %v2342_v12 = vadd.f32 %v2341_v18, %v2310_v29  ;;  %v2171_v41 = vadd.f32 %v2170_v10, %v2140_v62  ;;  %v2389_v13 = vmul.f32 %v3285_v45, %v4531_v1  ;;  %v2390_v53 = vmul.f32 %v3286_v11, %v4529_v31  ;;  %v3295_v18 = vld [vmem:[%s7042_s3 + $0x550] sm:$0xff]  ;;  %v3296_v19 = vld [vmem:[%s7042_s3 + $0x558] sm:$0xff]  ;;  %v3301_v11 = vld [vmem:[%s7042_s3 + $0x568] sm:$0xff] }
 0x19d   :  { %v2419_v29 = vadd.f32 %v2418_v7, %v2387_v25  ;;  %v2218_v14 = vmul.f32 %v3287_v46, %v7106_v39  ;;  %v2248_v33 = vadd.f32 %v2217_v52, %v2216_v3  ;;  %v2219_v4 = vmul.f32 %v3288_v48, %v7107_v35  ;;  %v3297_v7 = vld [vmem:[%s7042_s3 + $0x560] sm:$0xff]  ;;  %v3298_v3 = vld [vmem:[%s7042_s3 + $0x308] sm:$0xff]  ;;  %v3300_v45 = vld [vmem:[%s7042_s3 + $0x238] sm:$0xff] }
 0x19e   :  { %v2343_v26 = vadd.f32 %v2342_v12, %v2311_v22  ;;  %v2172_v50 = vadd.f32 %v2171_v41, %v2141_v8  ;;  %v2465_v27 = vmul.f32 %v3289_v9, %v7101_v16  ;;  %v2220_v22 = vmul.f32 %v3290_v2, %v4438_v28  ;;  %v3304_v9 = vld [vmem:[%s7042_s3 + $0x578] sm:$0xff] }
 0x19f   :  { %v2420_v56 = vadd.f32 %v2419_v29, %v2388_v42  ;;  %v2249_v40 = vadd.f32 %v2248_v33, %v2218_v14  ;;  %v2464_v62 = vmul.f32 %v3291_v21, %v7100_v30  ;;  %v2391_v8 = vmul.f32 %v3292_v15, %v4539_v43  ;;  %v3302_v29 = vld [vmem:[%s7042_s3 + $0x570] sm:$0xff]  ;;  %v3307_v21 = vld [vmem:[%s7042_s3 + $0x648] sm:$0xff] }
 0x1a0   :  { %2344 = vadd.xlane.f32.xlu1 %v2343_v26  ;;  %v2173_v0 = vadd.f32 %v2172_v50, %v2142_v6  ;;  %v2221_v49 = vmul.f32 %v3293_v5, %v4454_v24  ;;  %v2222_v59 = vmul.f32 %v3294_v60, %v4452_v51  ;;  %v2466_v10 = vmul.f32 %v3295_v18, %v7102_v23  ;;  %v3303_v14 = vld [vmem:[%s7042_s3 + $0x310] sm:$0xff]  ;;  %v3309_v60 = vld [vmem:[%s7042_s3 + $0x328] sm:$0xff] }
 0x1a1   :  { %v2421_v58 = vadd.f32 %v2420_v56, %v2389_v13  ;;  %v2250_v6 = vadd.f32 %v2249_v40, %v2219_v4  ;;  %v2497_v55 = vadd.f32 %v2465_v27, %v2464_v62  ;;  %v2467_v42 = vmul.f32 %v3296_v19, %v7103_v17  ;;  %v3305_v56 = vld [vmem:[%s7042_s3 + $0x318] sm:$0xff]  ;;  %v3311_v18 = vld [vmem:[%s7042_s3 + $0x650] sm:$0xff] }
 0x1a2   :  { %v2174_v25 = vadd.f32 %v2173_v0, %v2143_v44  ;;  %v2468_v20 = vmul.f32 %v3297_v7, %v4527_v47  ;;  %v2297_v37 = vmul.f32 %v3298_v3, %v7105_v57  ;;  %v3299_v44 = vld [vmem:[%s7042_s3 + $0x300] sm:$0xff]  ;;  %v2223_v13 = vmul.f32 %v3300_v45, %v4456_v38  ;;  %v3312_v7 = vld [vmem:[%s7042_s3 + $0x658] sm:$0xff] }
 0x1a3   :  { %v2422_v52 = vadd.f32 %v2421_v58, %v2390_v53  ;;  %v2251_v12 = vadd.f32 %v2250_v6, %v2220_v22  ;;  %v2498_v54 = vadd.f32 %v2497_v55, %v2466_v10  ;;  %v2296_v41 = vmul.f32 %v3299_v44, %v7104_v34  ;;  %v3306_v22 = vld [vmem:[%s7042_s3 + $0x640] sm:$0xff]  ;;  %v3310_v6 = vld [vmem:[%s7042_s3 + $0x330] sm:$0xff]  ;;  %v3315_v44 = vld [vmem:[%s7042_s3 + $0x408] sm:$0xff] }
 0x1a4   :  { %2175 = vadd.xlane.f32.xlu0 %v2174_v25  ;;  %v2469_v53 = vmul.f32 %v3301_v11, %v4531_v1  ;;  %v2470_v46 = vmul.f32 %v3302_v29, %v4529_v31  ;;  %v2298_v33 = vmul.f32 %v3303_v14, %v7106_v39  ;;  %v2471_v27 = vmul.f32 %v3304_v9, %v4539_v43  ;;  %v3313_v3 = vld [vmem:[%s7042_s3 + $0x660] sm:$0xff]  ;;  %v3317_v29 = vld [vmem:[%s7042_s3 + $0x668] sm:$0xff] }
 0x1a5   :  { %v2423_v26 = vadd.f32 %v2422_v52, %v2391_v8  ;;  %v2252_v50 = vadd.f32 %v2251_v12, %v2221_v49  ;;  %v2499_v48 = vadd.f32 %v2498_v54, %v2467_v42  ;;  %v2328_v4 = vadd.f32 %v2297_v37, %v2296_v41  ;;  %v3308_v8 = vld [vmem:[%s7042_s3 + $0x320] sm:$0xff] }
 0x1a6   :  { %v2299_v2 = vmul.f32 %v3305_v56, %v7107_v35  ;;  %v2544_v40 = vmul.f32 %v3306_v22, %v7100_v30  ;;  %v2545_v62 = vmul.f32 %v3307_v21, %v7101_v16  ;;  %v2300_v5 = vmul.f32 %v3308_v8, %v4438_v28  ;;  %v3314_v12 = vld [vmem:[%s7042_s3 + $0x400] sm:$0xff] }
 0x1a7   :  { %2424 = vadd.xlane.f32.xlu1 %v2423_v26  ;;  %v2253_v0 = vadd.f32 %v2252_v50, %v2222_v59  ;;  %v2500_v15 = vadd.f32 %v2499_v48, %v2468_v20  ;;  %v2329_v49 = vadd.f32 %v2328_v4, %v2298_v33  ;;  %v2301_v58 = vmul.f32 %v3309_v60, %v4454_v24  ;;  %v3318_v33 = vld [vmem:[%s7042_s3 + $0x670] sm:$0xff]  ;;  %v3323_v8 = vld [vmem:[%s7042_s3 + $0x740] sm:$0xff]  ;;  %v3324_v60 = vld [vmem:[%s7042_s3 + $0x678] sm:$0xff] }
 0x1a8   :  { %v2302_v59 = vmul.f32 %v3310_v6, %v4452_v51  ;;  %v2546_v10 = vmul.f32 %v3311_v18, %v7102_v23  ;;  %v2577_v55 = vadd.f32 %v2545_v62, %v2544_v40  ;;  %v2547_v20 = vmul.f32 %v3312_v7, %v7103_v17  ;;  %v3319_v50 = vld [vmem:[%s7042_s3 + $0x410] sm:$0xff]  ;;  %v3321_v40 = vld [vmem:[%s7042_s3 + $0x748] sm:$0xff] }
 0x1a9   :  { %v2254_v25 = vadd.f32 %v2253_v0, %v2223_v13  ;;  %v2501_v19 = vadd.f32 %v2500_v15, %v2469_v53  ;;  %v2330_v42 = vadd.f32 %v2329_v49, %v2299_v2  ;;  %v2548_v37 = vmul.f32 %v3313_v3, %v4527_v47  ;;  %v3316_v13 = vld [vmem:[%s7042_s3 + $0x338] sm:$0xff]  ;;  %v3322_v0 = vld [vmem:[%s7042_s3 + $0x420] sm:$0xff]  ;;  %v3325_v6 = vld [vmem:[%s7042_s3 + $0x428] sm:$0xff] }
 0x1aa   :  { %v2578_v52 = vadd.f32 %v2577_v55, %v2546_v10  ;;  %v2376_v54 = vmul.f32 %v3314_v12, %v7104_v34  ;;  %v2377_v41 = vmul.f32 %v3315_v44, %v7105_v57  ;;  %v2303_v11 = vmul.f32 %v3316_v13, %v4456_v38  ;;  %v3320_v2 = vld [vmem:[%s7042_s3 + $0x418] sm:$0xff]  ;;  %v3326_v10 = vld [vmem:[%s7042_s3 + $0x430] sm:$0xff] }
 0x1ab   :  { %2255 = vadd.xlane.f32.xlu0 %v2254_v25  ;;  %v2502_v45 = vadd.f32 %v2501_v19, %v2470_v46  ;;  %v2331_v53 = vadd.f32 %v2330_v42, %v2300_v5  ;;  %v2549_v14 = vmul.f32 %v3317_v29, %v4531_v1  ;;  %v2550_v26 = vmul.f32 %v3318_v33, %v4529_v31  ;;  %v3327_v19 = vld [vmem:[%s7042_s3 + $0x750] sm:$0xff]  ;;  %v3328_v3 = vld [vmem:[%s7042_s3 + $0x758] sm:$0xff]  ;;  %v3333_v33 = vld [vmem:[%s7042_s3 + $0x768] sm:$0xff] }
 0x1ac   :  { %v2579_v46 = vadd.f32 %v2578_v52, %v2547_v20  ;;  %v2378_v48 = vmul.f32 %v3319_v50, %v7106_v39  ;;  %v2408_v4 = vadd.f32 %v2377_v41, %v2376_v54  ;;  %v2379_v22 = vmul.f32 %v3320_v2, %v7107_v35  ;;  %v3329_v52 = vld [vmem:[%s7042_s3 + $0x760] sm:$0xff]  ;;  %v3330_v54 = vld [vmem:[%s7042_s3 + $0x508] sm:$0xff]  ;;  %v3332_v29 = vld [vmem:[%s7042_s3 + $0x438] sm:$0xff] }
 0x1ad   :  { %v2503_v9 = vadd.f32 %v2502_v45, %v2471_v27  ;;  %v2332_v56 = vadd.f32 %v2331_v53, %v2301_v58  ;;  %v2625_v21 = vmul.f32 %v3321_v40, %v7101_v16  ;;  %v2380_v27 = vmul.f32 %v3322_v0, %v4438_v28  ;;  %v3336_v40 = vld [vmem:[%s7042_s3 + $0x778] sm:$0xff] }
 0x1ae   :  { %v2580_v62 = vadd.f32 %v2579_v46, %v2548_v37  ;;  %v2409_v15 = vadd.f32 %v2408_v4, %v2378_v48  ;;  %v2624_v5 = vmul.f32 %v3323_v8, %v7100_v30  ;;  %v2551_v58 = vmul.f32 %v3324_v60, %v4539_v43  ;;  %v3334_v46 = vld [vmem:[%s7042_s3 + $0x770] sm:$0xff]  ;;  %v3339_v8 = vld [vmem:[%s7042_s3 + $0x848] sm:$0xff] }
 0x1af   :  { %2504 = vadd.xlane.f32.xlu1 %v2503_v9  ;;  %v2333_v49 = vadd.f32 %v2332_v56, %v2302_v59  ;;  %v2381_v18 = vmul.f32 %v3325_v6, %v4454_v24  ;;  %v2382_v55 = vmul.f32 %v3326_v10, %v4452_v51  ;;  %v2626_v42 = vmul.f32 %v3327_v19, %v7102_v23  ;;  %v3335_v48 = vld [vmem:[%s7042_s3 + $0x510] sm:$0xff]  ;;  %v3341_v10 = vld [vmem:[%s7042_s3 + $0x528] sm:$0xff] }
 0x1b0   :  { %v2581_v25 = vadd.f32 %v2580_v62, %v2549_v14  ;;  %v2410_v59 = vadd.f32 %v2409_v15, %v2379_v22  ;;  %v2657_v7 = vadd.f32 %v2625_v21, %v2624_v5  ;;  %v2627_v37 = vmul.f32 %v3328_v3, %v7103_v17  ;;  %v3337_v62 = vld [vmem:[%s7042_s3 + $0x518] sm:$0xff]  ;;  %v3343_v19 = vld [vmem:[%s7042_s3 + $0x850] sm:$0xff] }
 0x1b1   :  { %v2334_v20 = vadd.f32 %v2333_v49, %v2303_v11  ;;  %v2628_v12 = vmul.f32 %v3329_v52, %v4527_v47  ;;  %v2457_v44 = vmul.f32 %v3330_v54, %v7105_v57  ;;  %v3331_v11 = vld [vmem:[%s7042_s3 + $0x500] sm:$0xff]  ;;  %v2383_v14 = vmul.f32 %v3332_v29, %v4456_v38  ;;  %v3344_v52 = vld [vmem:[%s7042_s3 + $0x858] sm:$0xff] }
 0x1b2   :  { %v2582_v41 = vadd.f32 %v2581_v25, %v2550_v26  ;;  %v2411_v45 = vadd.f32 %v2410_v59, %v2380_v27  ;;  %v2658_v13 = vadd.f32 %v2657_v7, %v2626_v42  ;;  %v2456_v53 = vmul.f32 %v3331_v11, %v7104_v34  ;;  %v3338_v27 = vld [vmem:[%s7042_s3 + $0x840] sm:$0xff]  ;;  %v3342_v59 = vld [vmem:[%s7042_s3 + $0x530] sm:$0xff]  ;;  %v3347_v11 = vld [vmem:[%s7042_s3 + $0x608] sm:$0xff] }
 0x1b3   :  { %2335 = vadd.xlane.f32.xlu0 %v2334_v20  ;;  %v2629_v26 = vmul.f32 %v3333_v33, %v4531_v1  ;;  %v2630_v50 = vmul.f32 %v3334_v46, %v4529_v31  ;;  %v2458_v4 = vmul.f32 %v3335_v48, %v7106_v39  ;;  %v2631_v21 = vmul.f32 %v3336_v40, %v4539_v43  ;;  %v3345_v54 = vld [vmem:[%s7042_s3 + $0x860] sm:$0xff]  ;;  %v3349_v46 = vld [vmem:[%s7042_s3 + $0x868] sm:$0xff] }
 0x1b4   :  { %v2583_v9 = vadd.f32 %v2582_v41, %v2551_v58  ;;  %v2412_v56 = vadd.f32 %v2411_v45, %v2381_v18  ;;  %v2659_v2 = vadd.f32 %v2658_v13, %v2627_v37  ;;  %v2488_v22 = vadd.f32 %v2457_v44, %v2456_v53  ;;  %v3340_v58 = vld [vmem:[%s7042_s3 + $0x520] sm:$0xff] }
 0x1b5   :  { %v2459_v0 = vmul.f32 %v3337_v62, %v7107_v35  ;;  %v2704_v15 = vmul.f32 %v3338_v27, %v7100_v30  ;;  %v2705_v5 = vmul.f32 %v3339_v8, %v7101_v16  ;;  %v2460_v6 = vmul.f32 %v3340_v58, %v4438_v28  ;;  %v3346_v45 = vld [vmem:[%s7042_s3 + $0x600] sm:$0xff] }
 0x1b6   :  { %2584 = vadd.xlane.f32.xlu1 %v2583_v9  ;;  %v2413_v49 = vadd.f32 %v2412_v56, %v2382_v55  ;;  %v2660_v60 = vadd.f32 %v2659_v2, %v2628_v12  ;;  %v2489_v18 = vadd.f32 %v2488_v22, %v2458_v4  ;;  %v2461_v25 = vmul.f32 %v3341_v10, %v4454_v24  ;;  %v3350_v4 = vld [vmem:[%s7042_s3 + $0x870] sm:$0xff]  ;;  %v3355_v58 = vld [vmem:[%s7042_s3 + $0x940] sm:$0xff] }
 0x1b7   :  { %v2462_v55 = vmul.f32 %v3342_v59, %v4452_v51  ;;  %v2706_v42 = vmul.f32 %v3343_v19, %v7102_v23  ;;  %v2737_v7 = vadd.f32 %v2705_v5, %v2704_v15  ;;  %v2707_v12 = vmul.f32 %v3344_v52, %v7103_v17  ;;  %v3351_v56 = vld [vmem:[%s7042_s3 + $0x610] sm:$0xff]  ;;  %v3353_v15 = vld [vmem:[%s7042_s3 + $0x948] sm:$0xff] }
 0x1b8   :  { %v2414_v20 = vadd.f32 %v2413_v49, %v2383_v14  ;;  %v2661_v3 = vadd.f32 %v2660_v60, %v2629_v26  ;;  %v2490_v37 = vadd.f32 %v2489_v18, %v2459_v0  ;;  %v2708_v44 = vmul.f32 %v3345_v54, %v4527_v47  ;;  %v3348_v14 = vld [vmem:[%s7042_s3 + $0x538] sm:$0xff]  ;;  %v3354_v49 = vld [vmem:[%s7042_s3 + $0x620] sm:$0xff]  ;;  %v5957_v18 = vpop.xlane.xlu0 %565  ;;  %v3357_v59 = vld [vmem:[%s7042_s3 + $0x628] sm:$0xff] }
 0x1b9   :  { %v2738_v41 = vadd.f32 %v2737_v7, %v2706_v42  ;;  %v2536_v13 = vmul.f32 %v3346_v45, %v7104_v34  ;;  %v2537_v53 = vmul.f32 %v3347_v11, %v7105_v57  ;;  %v2463_v33 = vmul.f32 %v3348_v14, %v4456_v38  ;;  %v3352_v0 = vld [vmem:[%s7042_s3 + $0x618] sm:$0xff]  ;;  %v3362_v45 = vld [vmem:[%s7042_s3 + $0x708] sm:$0xff] }
 0x1ba   :  { %2415 = vadd.xlane.f32.xlu0 %v2414_v20  ;;  %v2662_v29 = vadd.f32 %v2661_v3, %v2630_v50  ;;  %v2491_v26 = vadd.f32 %v2490_v37, %v2460_v6  ;;  %v2709_v48 = vmul.f32 %v3349_v46, %v4531_v1  ;;  %v2710_v9 = vmul.f32 %v3350_v4, %v4529_v31  ;;  %v3359_v20 = vld [vmem:[%s7042_s3 + $0x950] sm:$0xff] }
 0x1bb   :  { %v2739_v50 = vadd.f32 %v2738_v41, %v2707_v12  ;;  %v2538_v2 = vmul.f32 %v3351_v56, %v7106_v39  ;;  %v2568_v22 = vadd.f32 %v2537_v53, %v2536_v13  ;;  %v2539_v27 = vmul.f32 %v3352_v0, %v7107_v35  ;;  %v3360_v12 = vld [vmem:[%s7042_s3 + $0x958] sm:$0xff]  ;;  %v3366_v46 = vld [vmem:[%s7042_s3 + $0x970] sm:$0xff] }
 0x1bc   :  { %v2663_v40 = vadd.f32 %v2662_v29, %v2631_v21  ;;  %v2492_v62 = vadd.f32 %v2491_v26, %v2461_v25  ;;  %v2785_v8 = vmul.f32 %v3353_v15, %v7101_v16  ;;  %v2540_v21 = vmul.f32 %v3354_v49, %v4438_v28  ;;  %v3356_v16 = vld [vmem:[%s7042_s3 + $0x878] sm:$0xff]  ;;  %v3363_v29 = vld [vmem:[%s7042_s3 + $0x700] sm:$0xff]  ;;  %v3367_v4 = vld [vmem:[%s7042_s3 + $0x710] sm:$0xff] }
 0x1bd   :  { %v2740_v5 = vadd.f32 %v2739_v50, %v2708_v44  ;;  %v2569_v60 = vadd.f32 %v2568_v22, %v2538_v2  ;;  %v2784_v6 = vmul.f32 %v3355_v58, %v7100_v30  ;;  %v2711_v25 = vmul.f32 %v3356_v16, %v4539_v43  ;;  %v3358_v30 = vld [vmem:[%s7042_s3 + $0x630] sm:$0xff]  ;;  %v3361_v44 = vld [vmem:[%s7042_s3 + $0x960] sm:$0xff]  ;;  %v3370_v15 = vld [vmem:[%s7042_s3 + $0x88] sm:$0xff] }
 0x1be   :  { %2664 = vadd.xlane.f32.xlu1 %v2663_v40  ;;  %v2493_v10 = vadd.f32 %v2492_v62, %v2462_v55  ;;  %v2541_v19 = vmul.f32 %v3357_v59, %v4454_v24  ;;  %v2542_v42 = vmul.f32 %v3358_v30, %v4452_v51  ;;  %v2786_v3 = vmul.f32 %v3359_v20, %v7102_v23  ;;  %v6007_v40 = vpop.xlane.xlu0 %1250  ;;  %v7108_v0 = vld [vmem:[#allocation18_spill] sm:$0xff]  ;;  %v6029_v59 = vpop.xlane.xlu1 %680  ;;  %v7111_v20 = vld [vmem:[#allocation21_spill] sm:$0xff] }
 0x1bf   :  { %v2741_v7 = vadd.f32 %v2740_v5, %v2709_v48  ;;  %v2570_v55 = vadd.f32 %v2569_v60, %v2539_v27  ;;  %v2817_v37 = vadd.f32 %v2785_v8, %v2784_v6  ;;  %v2787_v54 = vmul.f32 %v3360_v12, %v7103_v17  ;;  %v7109_v8 = vld [vmem:[#allocation20_spill] sm:$0xff]  ;;  %v3371_v49 = vld [vmem:[%s7042_s3 + $0x90] sm:$0xff] }
 0x1c0   :  { %v2494_v52 = vadd.f32 %v2493_v10, %v2463_v33  ;;  %v2788_v41 = vmul.f32 %v3361_v44, %v4527_v47  ;;  %v2617_v23 = vmul.f32 %v3362_v45, %v7105_v57  ;;  %v2616_v17 = vmul.f32 %v3363_v29, %v7104_v34  ;;  %v3364_v47 = vld [vmem:[%s7042_s3 + $0x638] sm:$0xff]  ;;  %v3365_v33 = vld [vmem:[%s7042_s3 + $0x968] sm:$0xff]  ;;  %v3372_v10 = vld [vmem:[%s7042_s3 + $0x720] sm:$0xff] }
 0x1c1   :  { %v2742_v13 = vadd.f32 %v2741_v7, %v2710_v9  ;;  %v2571_v11 = vadd.f32 %v2570_v55, %v2540_v21  ;;  %v2818_v53 = vadd.f32 %v2817_v37, %v2786_v3  ;;  %v2543_v14 = vmul.f32 %v3364_v47, %v4456_v38  ;;  %v7110_v21 = vld [vmem:[#allocation19_spill] sm:$0xff] }
 0x1c2   :  { %2495 = vadd.xlane.f32.xlu0 %v2494_v52  ;;  %v2789_v26 = vmul.f32 %v3365_v33, %v4531_v1  ;;  %v2790_v48 = vmul.f32 %v3366_v46, %v4529_v31  ;;  %v2618_v9 = vmul.f32 %v3367_v4, %v7106_v39  ;;  %v2648_v22 = vadd.f32 %v2617_v23, %v2616_v17  ;;  %v3368_v1 = vld [vmem:[%s7042_s3 + $0x718] sm:$0xff]  ;;  %v3369_v31 = vld [vmem:[%s7042_s3 + $0x80] sm:$0xff]  ;;  %v6067_v4 = vpop.xlane.xlu0 %1364 }
 0x1c3   :  { %v2743_v50 = vadd.f32 %v2742_v13, %v2711_v25  ;;  %v2572_v56 = vadd.f32 %v2571_v11, %v2541_v19  ;;  %v2819_v2 = vadd.f32 %v2818_v53, %v2787_v54  ;;  %v2619_v62 = vmul.f32 %v3368_v1, %v7107_v35  ;;  %v3373_v19 = vld [vmem:[%s7042_s3 + $0x978] sm:$0xff]  ;;  %v3376_v54 = vld [vmem:[%s7042_s3 + $0x730] sm:$0xff]  ;;  %v3378_v13 = vld [vmem:[%s7042_s3 + $0x800] sm:$0xff] }
 0x1c4   :  { %v2071_v27 = vmul.f32 %v3369_v31, %v7108_v0  ;;  %v2072_v5 = vmul.f32 %v3370_v15, %v7109_v8  ;;  %v2073_v60 = vmul.f32 %v3371_v49, %v7110_v21  ;;  %v2620_v16 = vmul.f32 %v3372_v10, %v4438_v28  ;;  %v3375_v55 = vld [vmem:[%s7042_s3 + $0x98] sm:$0xff]  ;;  %v3379_v53 = vld [vmem:[%s7042_s3 + $0x808] sm:$0xff]  ;;  %v3384_v31 = vld [vmem:[%s7042_s3 + $0x180] sm:$0xff]  ;;  %v6085_v49 = vpop.xlane.xlu1 %794 }
 0x1c5   :  { %2744 = vadd.xlane.f32.xlu1 %v2743_v50  ;;  %v2573_v58 = vadd.f32 %v2572_v56, %v2542_v42  ;;  %v2820_v6 = vadd.f32 %v2819_v2, %v2788_v41  ;;  %v2649_v25 = vadd.f32 %v2648_v22, %v2618_v9  ;;  %v2791_v30 = vmul.f32 %v3373_v19, %v4539_v43  ;;  %v3374_v42 = vld [vmem:[%s7042_s3 + $0x728] sm:$0xff]  ;;  %v3377_v41 = vld [vmem:[%s7042_s3 + $0xa0] sm:$0xff]  ;;  %v3380_v47 = vld [vmem:[%s7042_s3 + $0x738] sm:$0xff] }
 0x1c6   :  { %v2621_v7 = vmul.f32 %v3374_v42, %v4454_v24  ;;  %v2074_v3 = vmul.f32 %v3375_v55, %v7111_v20  ;;  %v2105_v37 = vadd.f32 %v2072_v5, %v2071_v27  ;;  %v2622_v43 = vmul.f32 %v3376_v54, %v4452_v51  ;;  %v3383_v56 = vld [vmem:[%s7042_s3 + $0x818] sm:$0xff]  ;;  %v3385_v15 = vld [vmem:[%s7042_s3 + $0x188] sm:$0xff] }
 0x1c7   :  { %v2574_v52 = vadd.f32 %v2573_v58, %v2543_v14  ;;  %v2821_v12 = vadd.f32 %v2820_v6, %v2789_v26  ;;  %v2650_v44 = vadd.f32 %v2649_v25, %v2619_v62  ;;  %v2075_v45 = vmul.f32 %v3377_v41, %v4599_v61  ;;  %v3381_v26 = vld [vmem:[%s7042_s3 + $0xa8] sm:$0xff]  ;;  %v3386_v58 = vld [vmem:[%s7042_s3 + $0x820] sm:$0xff] }
 0x1c8   :  { %v2106_v23 = vadd.f32 %v2105_v37, %v2073_v60  ;;  %v2696_v11 = vmul.f32 %v3378_v13, %v7104_v34  ;;  %v2697_v29 = vmul.f32 %v3379_v53, %v7105_v57  ;;  %v2623_v14 = vmul.f32 %v3380_v47, %v4456_v38  ;;  %v7112_v55 = vld [vmem:[#allocation26_spill] sm:$0xff]  ;;  %v6123_v47 = vpop.xlane.xlu0 %1478 }
 0x1c9   :  { %2575 = vadd.xlane.f32.xlu0 %v2574_v52  ;;  %v2822_v17 = vadd.f32 %v2821_v12, %v2790_v48  ;;  %v2651_v33 = vadd.f32 %v2650_v44, %v2620_v16  ;;  %v2076_v46 = vmul.f32 %v3381_v26, %v4610_v36  ;;  %v3382_v48 = vld [vmem:[%s7042_s3 + $0x810] sm:$0xff]  ;;  %v2699_v2 = vmul.f32 %v3383_v56, %v7107_v35  ;;  %v3390_v37 = vld [vmem:[%s7042_s3 + $0x828] sm:$0xff] }
 0x1ca   :  { %v2107_v9 = vadd.f32 %v2106_v23, %v2074_v3  ;;  %v2698_v50 = vmul.f32 %v3382_v48, %v7106_v39  ;;  %v2728_v22 = vadd.f32 %v2697_v29, %v2696_v11  ;;  %v2152_v27 = vmul.f32 %v3384_v31, %v7108_v0  ;;  %v3387_v16 = vld [vmem:[%s7042_s3 + $0x190] sm:$0xff]  ;;  %v3393_v11 = vld [vmem:[%s7042_s3 + $0x1a0] sm:$0xff]  ;;  %v3394_v29 = vld [vmem:[%s7042_s3 + $0x908] sm:$0xff] }
 0x1cb   :  { %v2823_v1 = vadd.f32 %v2822_v17, %v2791_v30  ;;  %v2652_v62 = vadd.f32 %v2651_v33, %v2621_v7  ;;  %v2153_v5 = vmul.f32 %v3385_v15, %v7109_v8  ;;  %v2700_v6 = vmul.f32 %v3386_v58, %v4438_v28  ;;  %v3388_v30 = vld [vmem:[%s7042_s3 + $0xb0] sm:$0xff]  ;;  %v3389_v7 = vld [vmem:[%s7042_s3 + $0xb8] sm:$0xff] }
 0x1cc   :  { %v2108_v60 = vadd.f32 %v2107_v9, %v2075_v45  ;;  %v2729_v10 = vadd.f32 %v2728_v22, %v2698_v50  ;;  %v2154_v25 = vmul.f32 %v3387_v16, %v7110_v21  ;;  %v2077_v42 = vmul.f32 %v3388_v30, %v4608_v32  ;;  %v3392_v23 = vld [vmem:[%s7042_s3 + $0x830] sm:$0xff]  ;;  %v3396_v48 = vld [vmem:[%s7042_s3 + $0x838] sm:$0xff] }
 0x1cd   :  { %2824 = vadd.xlane.f32.xlu1 %v2823_v1  ;;  %v2653_v19 = vadd.f32 %v2652_v62, %v2622_v43  ;;  %v2078_v3 = vmul.f32 %v3389_v7, %v7112_v55  ;;  %v2701_v52 = vmul.f32 %v3390_v37, %v4454_v24  ;;  %v3391_v43 = vld [vmem:[%s7042_s3 + $0x198] sm:$0xff]  ;;  %v2186_v41 = vadd.f32 %v2153_v5, %v2152_v27  ;;  %v6145_v62 = vpop.xlane.xlu1 %908 }
 0x1ce   :  { %v2109_v12 = vadd.f32 %v2108_v60, %v2076_v46  ;;  %v2730_v54 = vadd.f32 %v2729_v10, %v2699_v2  ;;  %v2155_v44 = vmul.f32 %v3391_v43, %v7111_v20  ;;  %v2702_v13 = vmul.f32 %v3392_v23, %v4452_v51  ;;  %v3395_v46 = vld [vmem:[%s7042_s3 + $0x900] sm:$0xff]  ;;  %v3398_v2 = vld [vmem:[%s7042_s3 + $0x1b0] sm:$0xff]  ;;  %v3400_v60 = vld [vmem:[%s7042_s3 + $0x918] sm:$0xff] }
 0x1cf   :  { %v2654_v45 = vadd.f32 %v2653_v19, %v2623_v14  ;;  %v2156_v53 = vmul.f32 %v3393_v11, %v4599_v61  ;;  %v2777_v17 = vmul.f32 %v3394_v29, %v7105_v57  ;;  %v2187_v26 = vadd.f32 %v2186_v41, %v2154_v25  ;;  %v3397_v57 = vld [vmem:[%s7042_s3 + $0x1a8] sm:$0xff]  ;;  %v3403_v25 = vld [vmem:[%s7042_s3 + $0x290] sm:$0xff]  ;;  %v3405_v37 = vld [vmem:[%s7042_s3 + $0x1b8] sm:$0xff]  ;;  %v6179_v41 = vpop.xlane.xlu0 %1592 }
 0x1d0   :  { %v2110_v14 = vadd.f32 %v2109_v12, %v2077_v42  ;;  %v2731_v33 = vadd.f32 %v2730_v54, %v2700_v6  ;;  %v2776_v9 = vmul.f32 %v3395_v46, %v7104_v34  ;;  %v2703_v50 = vmul.f32 %v3396_v48, %v4456_v38  ;;  %v3399_v34 = vld [vmem:[%s7042_s3 + $0x910] sm:$0xff]  ;;  %v3401_v6 = vld [vmem:[%s7042_s3 + $0x280] sm:$0xff]  ;;  %v3406_v12 = vld [vmem:[%s7042_s3 + $0x928] sm:$0xff] }
 0x1d1   :  { %2655 = vadd.xlane.f32.xlu0 %v2654_v45  ;;  %v2157_v56 = vmul.f32 %v3397_v57, %v4610_v36  ;;  %v2158_v22 = vmul.f32 %v3398_v2, %v4608_v32  ;;  %v2778_v1 = vmul.f32 %v3399_v34, %v7106_v39  ;;  %v2188_v15 = vadd.f32 %v2187_v26, %v2155_v44  ;;  %v3402_v39 = vld [vmem:[%s7042_s3 + $0x288] sm:$0xff]  ;;  %v3404_v42 = vld [vmem:[%s7042_s3 + $0x920] sm:$0xff]  ;;  %v3407_v43 = vld [vmem:[%s7042_s3 + $0x298] sm:$0xff]  ;;  %v6197_v57 = vpop.xlane.xlu1 %1022 }
 0x1d2   :  { %v2111_v31 = vadd.f32 %v2110_v14, %v2078_v3  ;;  %v2732_v27 = vadd.f32 %v2731_v33, %v2701_v52  ;;  %v2808_v5 = vadd.f32 %v2777_v17, %v2776_v9  ;;  %v2779_v58 = vmul.f32 %v3400_v60, %v7107_v35  ;;  %v3408_v11 = vld [vmem:[%s7042_s3 + $0xc0] sm:$0xff]  ;;  %v3410_v33 = vld [vmem:[%s7042_s3 + $0xc8] sm:$0xff]  ;;  %v3411_v9 = vld [vmem:[%s7042_s3 + $0xd0] sm:$0xff] }
 0x1d3   :  { %v2232_v10 = vmul.f32 %v3401_v6, %v7108_v0  ;;  %v2233_v16 = vmul.f32 %v3402_v39, %v7109_v8  ;;  %v2234_v19 = vmul.f32 %v3403_v25, %v7110_v21  ;;  %v2189_v30 = vadd.f32 %v2188_v15, %v2156_v53  ;;  %v7113_v53 = vld [vmem:[#allocation22_spill] sm:$0xff]  ;;  %v7114_v26 = vld [vmem:[#allocation24_spill] sm:$0xff]  ;;  %v7115_v48 = vld [vmem:[#allocation23_spill] sm:$0xff] }
 0x1d4   :  { %2112 = vadd.xlane.f32.xlu1 %v2111_v31  ;;  %v2733_v35 = vadd.f32 %v2732_v27, %v2702_v13  ;;  %v2780_v7 = vmul.f32 %v3404_v42, %v4438_v28  ;;  %v2809_v3 = vadd.f32 %v2808_v5, %v2778_v1  ;;  %v2159_v52 = vmul.f32 %v3405_v37, %v7112_v55  ;;  %v3412_v2 = vld [vmem:[%s7042_s3 + $0x930] sm:$0xff]  ;;  %v3413_v1 = vld [vmem:[%s7042_s3 + $0x938] sm:$0xff]  ;;  %v3414_v15 = vld [vmem:[%s7042_s3 + $0x2a8] sm:$0xff] }
 0x1d5   :  { %v2781_v54 = vmul.f32 %v3406_v12, %v4454_v24  ;;  %v2235_v44 = vmul.f32 %v3407_v43, %v7111_v20  ;;  %v2266_v28 = vadd.f32 %v2233_v16, %v2232_v10  ;;  %v2190_v23 = vadd.f32 %v2189_v30, %v2157_v56  ;;  %v3409_v24 = vld [vmem:[%s7042_s3 + $0x2a0] sm:$0xff]  ;;  %v3415_v60 = vld [vmem:[%s7042_s3 + $0xd8] sm:$0xff]  ;;  %v3417_v25 = vld [vmem:[%s7042_s3 + $0x388] sm:$0xff]  ;;  %v6231_v12 = vpop.xlane.xlu0 %689 }
 0x1d6   :  { %v2734_v45 = vadd.f32 %v2733_v35, %v2703_v50  ;;  %v2810_v13 = vadd.f32 %v2809_v3, %v2779_v58  ;;  %v2079_v29 = vmul.f32 %v3408_v11, %v7113_v53  ;;  %v2236_v17 = vmul.f32 %v3409_v24, %v4599_v61  ;;  %v7116_v58 = vld [vmem:[#allocation25_spill] sm:$0xff]  ;;  %v7117_v42 = vld [vmem:[#allocation27_spill] sm:$0xff] }
 0x1d7   :  { %v2267_v14 = vadd.f32 %v2266_v28, %v2234_v19  ;;  %v2080_v46 = vmul.f32 %v3410_v33, %v7114_v26  ;;  %v2081_v50 = vmul.f32 %v3411_v9, %v7115_v48  ;;  %v2191_v56 = vadd.f32 %v2190_v23, %v2158_v22  ;;  %v3418_v30 = vld [vmem:[%s7042_s3 + $0xe0] sm:$0xff]  ;;  %v3419_v37 = vld [vmem:[%s7042_s3 + $0x390] sm:$0xff]  ;;  %v3421_v28 = vld [vmem:[%s7042_s3 + $0x2b8] sm:$0xff] }
 0x1d8   :  { %2735 = vadd.xlane.f32.xlu0 %v2734_v45  ;;  %v2782_v34 = vmul.f32 %v3412_v2, %v4452_v51  ;;  %v2783_v31 = vmul.f32 %v3413_v1, %v4456_v38  ;;  %v2811_v27 = vadd.f32 %v2810_v13, %v2780_v7  ;;  %v2237_v5 = vmul.f32 %v3414_v15, %v4610_v36  ;;  %v3416_v38 = vld [vmem:[%s7042_s3 + $0x380] sm:$0xff]  ;;  %v3420_v43 = vld [vmem:[%s7042_s3 + $0x2b0] sm:$0xff]  ;;  %v3422_v23 = vld [vmem:[%s7042_s3 + $0xe8] sm:$0xff] }
 0x1d9   :  { %v2268_v22 = vadd.f32 %v2267_v14, %v2235_v44  ;;  %v2082_v51 = vmul.f32 %v3415_v60, %v7116_v58  ;;  %v2114_v6 = vadd.f32 %v2080_v46, %v2079_v29  ;;  %v2192_v10 = vadd.f32 %v2191_v56, %v2159_v52  ;;  %v7118_v13 = vld [vmem:[#allocation29_spill] sm:$0xff]  ;;  %v6249_v46 = vpop.xlane.xlu1 %1136 }
 0x1da   :  { %v2812_v39 = vadd.f32 %v2811_v27, %v2781_v54  ;;  %v2312_v16 = vmul.f32 %v3416_v38, %v7108_v0  ;;  %v2313_v19 = vmul.f32 %v3417_v25, %v7109_v8  ;;  %v2083_v7 = vmul.f32 %v3418_v30, %v7117_v42  ;;  %v3425_v2 = vld [vmem:[%s7042_s3 + $0x1c0] sm:$0xff]  ;;  %v3426_v1 = vld [vmem:[%s7042_s3 + $0x1c8] sm:$0xff] }
 0x1db   :  { %v2269_v35 = vadd.f32 %v2268_v22, %v2236_v17  ;;  %v2115_v3 = vadd.f32 %v2114_v6, %v2081_v50  ;;  %v2314_v52 = vmul.f32 %v3419_v37, %v7110_v21  ;;  %2193 = vadd.xlane.f32.xlu1 %v2192_v10  ;;  %v2238_v44 = vmul.f32 %v3420_v43, %v4608_v32  ;;  %v3423_v17 = vld [vmem:[%s7042_s3 + $0x398] sm:$0xff]  ;;  %v3424_v50 = vld [vmem:[%s7042_s3 + $0x3a0] sm:$0xff]  ;;  %v3427_v22 = vld [vmem:[%s7042_s3 + $0x1d0] sm:$0xff] }
 0x1dc   :  { %v2813_v54 = vadd.f32 %v2812_v39, %v2782_v34  ;;  %v2239_v45 = vmul.f32 %v3421_v28, %v7112_v55  ;;  %v2084_v11 = vmul.f32 %v3422_v23, %v7118_v13  ;;  %v2315_v14 = vmul.f32 %v3423_v17, %v7111_v20  ;;  %v7119_v6 = vld [vmem:[#allocation28_spill] sm:$0xff] }
 0x1dd   :  { %v2270_v29 = vadd.f32 %v2269_v35, %v2237_v5  ;;  %v2116_v24 = vadd.f32 %v2115_v3, %v2082_v51  ;;  %v2346_v33 = vadd.f32 %v2313_v19, %v2312_v16  ;;  %v2316_v56 = vmul.f32 %v3424_v50, %v4599_v61  ;;  %v3428_v51 = vld [vmem:[%s7042_s3 + $0xf0] sm:$0xff]  ;;  %v3429_v39 = vld [vmem:[%s7042_s3 + $0xf8] sm:$0xff]  ;;  %v3430_v16 = vld [vmem:[%s7042_s3 + $0x3a8] sm:$0xff]  ;;  %v6305_v50 = vpop.xlane.xlu1 %574 }
 0x1de   :  { %v2814_v9 = vadd.f32 %v2813_v54, %v2783_v31  ;;  %v2160_v34 = vmul.f32 %v3425_v2, %v7113_v53  ;;  %v2161_v27 = vmul.f32 %v3426_v1, %v7114_v26  ;;  %v2162_v60 = vmul.f32 %v3427_v22, %v7115_v48  ;;  %v3431_v19 = vld [vmem:[%s7042_s3 + $0x1d8] sm:$0xff]  ;;  %v3432_v54 = vld [vmem:[%s7042_s3 + $0x3b0] sm:$0xff]  ;;  %v3438_v1 = vld [vmem:[%s7042_s3 + $0x1e8] sm:$0xff] }
 0x1df   :  { %v2271_v15 = vadd.f32 %v2270_v29, %v2238_v44  ;;  %v2117_v31 = vadd.f32 %v2116_v24, %v2083_v7  ;;  %v2347_v5 = vadd.f32 %v2346_v33, %v2314_v52  ;;  %v2085_v10 = vmul.f32 %v3428_v51, %v7119_v6  ;;  %v6283_v52 = vpop.xlane.xlu0 %803  ;;  %v3433_v44 = vld [vmem:[%s7042_s3 + $0x480] sm:$0xff]  ;;  %v3437_v2 = vld [vmem:[%s7042_s3 + $0x3b8] sm:$0xff] }
 0x1e0   :  { %2815 = vadd.xlane.f32.xlu0 %v2814_v9  ;;  %v2086_v38 = vmul.f32 %v3429_v39, %v5485_v63  ;;  %v2317_v25 = vmul.f32 %v3430_v16, %v4610_v36  ;;  %v2163_v35 = vmul.f32 %v3431_v19, %v7116_v58  ;;  %v2195_v37 = vadd.f32 %v2161_v27, %v2160_v34  ;;  %v3439_v27 = vld [vmem:[%s7042_s3 + $0x498] sm:$0xff]  ;;  %v3440_v51 = vld [vmem:[%s7042_s3 + $0x2c0] sm:$0xff] }
 0x1e1   :  { %v2272_v30 = vadd.f32 %v2271_v15, %v2239_v45  ;;  %v2118_v7 = vadd.f32 %v2117_v31, %v2084_v11  ;;  %v2348_v3 = vadd.f32 %v2347_v5, %v2315_v14  ;;  %v2318_v43 = vmul.f32 %v3432_v54, %v4608_v32  ;;  %v3434_v45 = vld [vmem:[%s7042_s3 + $0x488] sm:$0xff]  ;;  %v3435_v11 = vld [vmem:[%s7042_s3 + $0x490] sm:$0xff]  ;;  %v3436_v14 = vld [vmem:[%s7042_s3 + $0x1e0] sm:$0xff] }
 0x1e2   :  { %v2392_v28 = vmul.f32 %v3433_v44, %v7108_v0  ;;  %v2393_v23 = vmul.f32 %v3434_v45, %v7109_v8  ;;  %v2394_v29 = vmul.f32 %v3435_v11, %v7110_v21  ;;  %v2164_v33 = vmul.f32 %v3436_v14, %v7117_v42  ;;  %v3441_v39 = vld [vmem:[%s7042_s3 + $0x4a0] sm:$0xff]  ;;  %v3445_v54 = vld [vmem:[%s7042_s3 + $0x1f8] sm:$0xff] }
 0x1e3   :  { %2273 = vadd.xlane.f32.xlu1 %v2272_v30  ;;  %v2119_v24 = vadd.f32 %v2118_v7, %v2085_v10  ;;  %v2349_v17 = vadd.f32 %v2348_v3, %v2316_v56  ;;  %v2196_v9 = vadd.f32 %v2195_v37, %v2162_v60  ;;  %v2319_v34 = vmul.f32 %v3437_v2, %v7112_v55  ;;  %v3442_v30 = vld [vmem:[%s7042_s3 + $0x2c8] sm:$0xff]  ;;  %v3444_v3 = vld [vmem:[%s7042_s3 + $0x1f0] sm:$0xff]  ;;  %v6343_v45 = vpop.xlane.xlu0 %917 }
 0x1e4   :  { %v2165_v56 = vmul.f32 %v3438_v1, %v7118_v13  ;;  %v2395_v15 = vmul.f32 %v3439_v27, %v7111_v20  ;;  %v2426_v31 = vadd.f32 %v2393_v23, %v2392_v28  ;;  %v2240_v10 = vmul.f32 %v3440_v51, %v7113_v53  ;;  %v3446_v23 = vld [vmem:[%s7042_s3 + $0x4a8] sm:$0xff] }
 0x1e5   :  { %v2120_v5 = vadd.f32 %v2119_v24, %v2086_v38  ;;  %v2350_v22 = vadd.f32 %v2349_v17, %v2317_v25  ;;  %v2197_v60 = vadd.f32 %v2196_v9, %v2163_v35  ;;  %v2396_v16 = vmul.f32 %v3441_v39, %v4599_v61  ;;  %v3443_v25 = vld [vmem:[%s7042_s3 + $0x2d0] sm:$0xff]  ;;  %v3449_v1 = vld [vmem:[%s7042_s3 + $0x588] sm:$0xff] }
 0x1e6   :  { %v2427_v19 = vadd.f32 %v2426_v31, %v2394_v29  ;;  %v2241_v38 = vmul.f32 %v3442_v30, %v7114_v26  ;;  %v2242_v35 = vmul.f32 %v3443_v25, %v7115_v48  ;;  %v2166_v37 = vmul.f32 %v3444_v3, %v7119_v6  ;;  %v3447_v29 = vld [vmem:[%s7042_s3 + $0x2d8] sm:$0xff]  ;;  %v3454_v30 = vld [vmem:[%s7042_s3 + $0x2e8] sm:$0xff] }
 0x1e7   :  { %2121 = vadd.xlane.f32.xlu0 %v2120_v5  ;;  %v2351_v7 = vadd.f32 %v2350_v22, %v2318_v43  ;;  %v2167_v44 = vmul.f32 %v3445_v54, %v5485_v63  ;;  %v2198_v28 = vadd.f32 %v2197_v60, %v2164_v33  ;;  %v2397_v43 = vmul.f32 %v3446_v23, %v4610_v36  ;;  %v3448_v33 = vld [vmem:[%s7042_s3 + $0x580] sm:$0xff]  ;;  %v3451_v22 = vld [vmem:[%s7042_s3 + $0x590] sm:$0xff] }
 0x1e8   :  { %v2428_v11 = vadd.f32 %v2427_v19, %v2395_v15  ;;  %v2243_v24 = vmul.f32 %v3447_v29, %v7116_v58  ;;  %v2275_v17 = vadd.f32 %v2241_v38, %v2240_v10  ;;  %v2472_v2 = vmul.f32 %v3448_v33, %v7108_v0  ;;  %v6361_v15 = vpop.xlane.xlu1 %1259  ;;  %v3452_v10 = vld [vmem:[%s7042_s3 + $0x4b0] sm:$0xff]  ;;  %v3458_v29 = vld [vmem:[%s7042_s3 + $0x3c8] sm:$0xff] }
 0x1e9   :  { %v2352_v14 = vadd.f32 %v2351_v7, %v2319_v34  ;;  %v2199_v9 = vadd.f32 %v2198_v28, %v2165_v56  ;;  %v2473_v27 = vmul.f32 %v3449_v1, %v7109_v8  ;;  %v3450_v34 = vld [vmem:[%s7042_s3 + $0x2e0] sm:$0xff]  ;;  %v2474_v60 = vmul.f32 %v3451_v22, %v7110_v21  ;;  %v3455_v7 = vld [vmem:[%s7042_s3 + $0x598] sm:$0xff]  ;;  %v3459_v33 = vld [vmem:[%s7042_s3 + $0x3d0] sm:$0xff] }
 0x1ea   :  { %v2429_v31 = vadd.f32 %v2428_v11, %v2396_v16  ;;  %v2244_v56 = vmul.f32 %v3450_v34, %v7117_v42  ;;  %v2276_v5 = vadd.f32 %v2275_v17, %v2242_v35  ;;  %v2398_v39 = vmul.f32 %v3452_v10, %v4608_v32  ;;  %v3453_v16 = vld [vmem:[%s7042_s3 + $0x4b8] sm:$0xff]  ;;  %v3456_v28 = vld [vmem:[%s7042_s3 + $0x5a0] sm:$0xff]  ;;  %v6399_v17 = vpop.xlane.xlu0 %1031  ;;  %v3460_v1 = vld [vmem:[%s7042_s3 + $0x2f0] sm:$0xff] }
 0x1eb   :  { %2353 = vadd.xlane.f32.xlu1 %v2352_v14  ;;  %v2200_v51 = vadd.f32 %v2199_v9, %v2166_v37  ;;  %v2399_v19 = vmul.f32 %v3453_v16, %v7112_v55  ;;  %v2245_v38 = vmul.f32 %v3454_v30, %v7118_v13  ;;  %v2475_v3 = vmul.f32 %v3455_v7, %v7111_v20  ;;  %v3457_v11 = vld [vmem:[%s7042_s3 + $0x3c0] sm:$0xff]  ;;  %v3463_v22 = vld [vmem:[%s7042_s3 + $0x3d8] sm:$0xff] }
 0x1ec   :  { %v2430_v25 = vadd.f32 %v2429_v31, %v2397_v43  ;;  %v2277_v35 = vadd.f32 %v2276_v5, %v2243_v24  ;;  %v2506_v37 = vadd.f32 %v2473_v27, %v2472_v2  ;;  %v2476_v23 = vmul.f32 %v3456_v28, %v4599_v61  ;;  %v3461_v31 = vld [vmem:[%s7042_s3 + $0x2f8] sm:$0xff]  ;;  %v3465_v7 = vld [vmem:[%s7042_s3 + $0x680] sm:$0xff] }
 0x1ed   :  { %v2201_v54 = vadd.f32 %v2200_v51, %v2167_v44  ;;  %v2320_v43 = vmul.f32 %v3457_v11, %v7113_v53  ;;  %v2321_v24 = vmul.f32 %v3458_v29, %v7114_v26  ;;  %v2322_v2 = vmul.f32 %v3459_v33, %v7115_v48  ;;  %v6421_v51 = vpop.xlane.xlu1 %1373 }
 0x1ee   :  { %v2431_v44 = vadd.f32 %v2430_v25, %v2398_v39  ;;  %v2278_v14 = vadd.f32 %v2277_v35, %v2244_v56  ;;  %v2507_v9 = vadd.f32 %v2506_v37, %v2474_v60  ;;  %v2246_v27 = vmul.f32 %v3460_v1, %v7119_v6  ;;  %v3462_v56 = vld [vmem:[%s7042_s3 + $0x5a8] sm:$0xff]  ;;  %v3464_v25 = vld [vmem:[%s7042_s3 + $0x5b0] sm:$0xff] }
 0x1ef   :  { %2202 = vadd.xlane.f32.xlu0 %v2201_v54  ;;  %v2247_v34 = vmul.f32 %v3461_v31, %v5485_v63  ;;  %v2477_v5 = vmul.f32 %v3462_v56, %v4610_v36  ;;  %v2323_v60 = vmul.f32 %v3463_v22, %v7116_v58  ;;  %v2355_v30 = vadd.f32 %v2321_v24, %v2320_v43  ;;  %v3466_v54 = vld [vmem:[%s7042_s3 + $0x688] sm:$0xff]  ;;  %v3468_v43 = vld [vmem:[%s7042_s3 + $0x3e0] sm:$0xff] }
 0x1f0   :  { %v2432_v10 = vadd.f32 %v2431_v44, %v2399_v19  ;;  %v2279_v39 = vadd.f32 %v2278_v14, %v2245_v38  ;;  %v2508_v16 = vadd.f32 %v2507_v9, %v2475_v3  ;;  %v2478_v35 = vmul.f32 %v3464_v25, %v4608_v32  ;;  %v3467_v38 = vld [vmem:[%s7042_s3 + $0x690] sm:$0xff]  ;;  %v3469_v44 = vld [vmem:[%s7042_s3 + $0x5b8] sm:$0xff]  ;;  %v3470_v9 = vld [vmem:[%s7042_s3 + $0x3e8] sm:$0xff] }
 0x1f1   :  { %v2552_v37 = vmul.f32 %v3465_v7, %v7108_v0  ;;  %v2553_v19 = vmul.f32 %v3466_v54, %v7109_v8  ;;  %v2554_v3 = vmul.f32 %v3467_v38, %v7110_v21  ;;  %v2324_v29 = vmul.f32 %v3468_v43, %v7117_v42  ;;  %v3474_v7 = vld [vmem:[%s7042_s3 + $0x4c8] sm:$0xff] }
 0x1f2   :  { %2433 = vadd.xlane.f32.xlu1 %v2432_v10  ;;  %v2280_v28 = vadd.f32 %v2279_v39, %v2246_v27  ;;  %v2509_v11 = vadd.f32 %v2508_v16, %v2476_v23  ;;  %v2356_v24 = vadd.f32 %v2355_v30, %v2322_v2  ;;  %v2479_v14 = vmul.f32 %v3469_v44, %v7112_v55  ;;  %v3471_v23 = vld [vmem:[%s7042_s3 + $0x698] sm:$0xff]  ;;  %v6455_v2 = vpop.xlane.xlu0 %1145  ;;  %v3472_v10 = vld [vmem:[%s7042_s3 + $0x4c0] sm:$0xff]  ;;  %v3478_v43 = vld [vmem:[%s7042_s3 + $0x6a8] sm:$0xff] }
 0x1f3   :  { %v2325_v33 = vmul.f32 %v3470_v9, %v7118_v13  ;;  %v2555_v1 = vmul.f32 %v3471_v23, %v7111_v20  ;;  %v2586_v27 = vadd.f32 %v2553_v19, %v2552_v37  ;;  %v2400_v39 = vmul.f32 %v3472_v10, %v7113_v53  ;;  %v3473_v16 = vld [vmem:[%s7042_s3 + $0x6a0] sm:$0xff]  ;;  %v6473_v37 = vpop.xlane.xlu1 %1487  ;;  %v3476_v19 = vld [vmem:[%s7042_s3 + $0x3f0] sm:$0xff]  ;;  %v3479_v44 = vld [vmem:[%s7042_s3 + $0x4d8] sm:$0xff] }
 0x1f4   :  { %v2281_v31 = vadd.f32 %v2280_v28, %v2247_v34  ;;  %v2510_v56 = vadd.f32 %v2509_v11, %v2477_v5  ;;  %v2357_v22 = vadd.f32 %v2356_v24, %v2323_v60  ;;  %v2556_v30 = vmul.f32 %v3473_v16, %v4599_v61  ;;  %v3475_v5 = vld [vmem:[%s7042_s3 + $0x4d0] sm:$0xff]  ;;  %v3482_v16 = vld [vmem:[%s7042_s3 + $0x4e0] sm:$0xff] }
 0x1f5   :  { %v2587_v25 = vadd.f32 %v2586_v27, %v2554_v3  ;;  %v2401_v34 = vmul.f32 %v3474_v7, %v7114_v26  ;;  %v2402_v60 = vmul.f32 %v3475_v5, %v7115_v48  ;;  %v2326_v38 = vmul.f32 %v3476_v19, %v7119_v6  ;;  %v3477_v3 = vld [vmem:[%s7042_s3 + $0x3f8] sm:$0xff]  ;;  %v3486_v19 = vld [vmem:[%s7042_s3 + $0x4e8] sm:$0xff] }
 0x1f6   :  { %2282 = vadd.xlane.f32.xlu0 %v2281_v31  ;;  %v2511_v54 = vadd.f32 %v2510_v56, %v2478_v35  ;;  %v2327_v28 = vmul.f32 %v3477_v3, %v5485_v63  ;;  %v2358_v11 = vadd.f32 %v2357_v22, %v2324_v29  ;;  %v2557_v24 = vmul.f32 %v3478_v43, %v4610_v36  ;;  %v3480_v29 = vld [vmem:[%s7042_s3 + $0x780] sm:$0xff]  ;;  %v3481_v22 = vld [vmem:[%s7042_s3 + $0x788] sm:$0xff]  ;;  %v6507_v7 = vpop.xlane.xlu0 %583  ;;  %v3487_v43 = vld [vmem:[%s7042_s3 + $0x798] sm:$0xff] }
 0x1f7   :  { %v2588_v35 = vadd.f32 %v2587_v25, %v2555_v1  ;;  %v2403_v9 = vmul.f32 %v3479_v44, %v7116_v58  ;;  %v2435_v23 = vadd.f32 %v2401_v34, %v2400_v39  ;;  %v2632_v56 = vmul.f32 %v3480_v29, %v7108_v0  ;;  %v3483_v39 = vld [vmem:[%s7042_s3 + $0x790] sm:$0xff] }
 0x1f8   :  { %v2512_v27 = vadd.f32 %v2511_v54, %v2479_v14  ;;  %v2359_v31 = vadd.f32 %v2358_v11, %v2325_v33  ;;  %v2633_v1 = vmul.f32 %v3481_v22, %v7109_v8  ;;  %v2404_v14 = vmul.f32 %v3482_v16, %v7117_v42  ;;  %v3490_v22 = vld [vmem:[%s7042_s3 + $0x5c8] sm:$0xff]  ;;  %v3491_v16 = vld [vmem:[%s7042_s3 + $0x5d0] sm:$0xff] }
 0x1f9   :  { %v2589_v10 = vadd.f32 %v2588_v35, %v2556_v30  ;;  %v2436_v33 = vadd.f32 %v2435_v23, %v2402_v60  ;;  %v2634_v25 = vmul.f32 %v3483_v39, %v7110_v21  ;;  %v3484_v30 = vld [vmem:[%s7042_s3 + $0x6b0] sm:$0xff]  ;;  %v3485_v60 = vld [vmem:[%s7042_s3 + $0x6b8] sm:$0xff]  ;;  %v2405_v3 = vmul.f32 %v3486_v19, %v7118_v13  ;;  %v6525_v23 = vpop.xlane.xlu1 %1601 }
 0x1fa   :  { %2513 = vadd.xlane.f32.xlu1 %v2512_v27  ;;  %v2360_v34 = vadd.f32 %v2359_v31, %v2326_v38  ;;  %v2558_v5 = vmul.f32 %v3484_v30, %v4608_v32  ;;  %v2559_v54 = vmul.f32 %v3485_v60, %v7112_v55  ;;  %v2635_v35 = vmul.f32 %v3487_v43, %v7111_v20  ;;  %v3488_v31 = vld [vmem:[%s7042_s3 + $0x7a0] sm:$0xff]  ;;  %v3492_v39 = vld [vmem:[%s7042_s3 + $0x4f0] sm:$0xff]  ;;  %v3493_v30 = vld [vmem:[%s7042_s3 + $0x4f8] sm:$0xff] }
 0x1fb   :  { %v2590_v11 = vadd.f32 %v2589_v10, %v2557_v24  ;;  %v2437_v38 = vadd.f32 %v2436_v33, %v2403_v9  ;;  %v2666_v44 = vadd.f32 %v2633_v1, %v2632_v56  ;;  %v2636_v29 = vmul.f32 %v3488_v31, %v4599_v61  ;;  %v3489_v24 = vld [vmem:[%s7042_s3 + $0x5c0] sm:$0xff]  ;;  %v3495_v60 = vld [vmem:[%s7042_s3 + $0x5d8] sm:$0xff]  ;;  %v3496_v31 = vld [vmem:[%s7042_s3 + $0x7b0] sm:$0xff] }
 0x1fc   :  { %v2361_v27 = vadd.f32 %v2360_v34, %v2327_v28  ;;  %v2480_v9 = vmul.f32 %v3489_v24, %v7113_v53  ;;  %v2481_v56 = vmul.f32 %v3490_v22, %v7114_v26  ;;  %v2482_v33 = vmul.f32 %v3491_v16, %v7115_v48  ;;  %v3497_v22 = vld [vmem:[%s7042_s3 + $0x880] sm:$0xff] }
 0x1fd   :  { %v2591_v1 = vadd.f32 %v2590_v11, %v2558_v5  ;;  %v2438_v28 = vadd.f32 %v2437_v38, %v2404_v14  ;;  %v2667_v10 = vadd.f32 %v2666_v44, %v2634_v25  ;;  %v2406_v34 = vmul.f32 %v3492_v39, %v7119_v6  ;;  %v3494_v25 = vld [vmem:[%s7042_s3 + $0x7a8] sm:$0xff] }
 0x1fe   :  { %2362 = vadd.xlane.f32.xlu0 %v2361_v27  ;;  %v2407_v14 = vmul.f32 %v3493_v30, %v5485_v63  ;;  %v2637_v5 = vmul.f32 %v3494_v25, %v4610_v36  ;;  %v2483_v19 = vmul.f32 %v3495_v60, %v7116_v58  ;;  %v2515_v44 = vadd.f32 %v2481_v56, %v2480_v9  ;;  %v6559_v27 = vpop.xlane.xlu0 %592  ;;  %v6581_v30 = vpop.xlane.xlu1 %698  ;;  %v3501_v25 = vld [vmem:[%s7042_s3 + $0x7b8] sm:$0xff] }
 0x1ff   :  { %v2592_v11 = vadd.f32 %v2591_v1, %v2559_v54  ;;  %v2439_v38 = vadd.f32 %v2438_v28, %v2405_v3  ;;  %v2668_v43 = vadd.f32 %v2667_v10, %v2635_v35  ;;  %v2638_v24 = vmul.f32 %v3496_v31, %v4608_v32  ;;  %v3498_v54 = vld [vmem:[%s7042_s3 + $0x888] sm:$0xff]  ;;  %v3499_v35 = vld [vmem:[%s7042_s3 + $0x890] sm:$0xff]  ;;  %v3500_v28 = vld [vmem:[%s7042_s3 + $0x5e0] sm:$0xff] }
 0x200   :  { %v2712_v16 = vmul.f32 %v3497_v22, %v7108_v0  ;;  %v2713_v3 = vmul.f32 %v3498_v54, %v7109_v8  ;;  %v2714_v9 = vmul.f32 %v3499_v35, %v7110_v21  ;;  %v2484_v10 = vmul.f32 %v3500_v28, %v7117_v42  ;;  %v3504_v22 = vld [vmem:[%s7042_s3 + $0x6c0] sm:$0xff] }
 0x201   :  { %2593 = vadd.xlane.f32.xlu1 %v2592_v11  ;;  %v2440_v56 = vadd.f32 %v2439_v38, %v2406_v34  ;;  %v2669_v1 = vadd.f32 %v2668_v43, %v2636_v29  ;;  %v2516_v39 = vadd.f32 %v2515_v44, %v2482_v33  ;;  %v2639_v60 = vmul.f32 %v3501_v25, %v7112_v55  ;;  %v3502_v34 = vld [vmem:[%s7042_s3 + $0x5e8] sm:$0xff]  ;;  %v3503_v11 = vld [vmem:[%s7042_s3 + $0x898] sm:$0xff]  ;;  %v3505_v35 = vld [vmem:[%s7042_s3 + $0x8a0] sm:$0xff] }
 0x202   :  { %v2485_v29 = vmul.f32 %v3502_v34, %v7118_v13  ;;  %v2715_v33 = vmul.f32 %v3503_v11, %v7111_v20  ;;  %v2746_v38 = vadd.f32 %v2713_v3, %v2712_v16  ;;  %v2560_v54 = vmul.f32 %v3504_v22, %v7113_v53  ;;  %v3506_v16 = vld [vmem:[%s7042_s3 + $0x6c8] sm:$0xff]  ;;  %v6619_v11 = vpop.xlane.xlu0 %707 }
 0x203   :  { %v2441_v43 = vadd.f32 %v2440_v56, %v2407_v14  ;;  %v2670_v44 = vadd.f32 %v2669_v1, %v2637_v5  ;;  %v2517_v31 = vadd.f32 %v2516_v39, %v2483_v19  ;;  %v2716_v28 = vmul.f32 %v3505_v35, %v4599_v61  ;;  %v3507_v5 = vld [vmem:[%s7042_s3 + $0x6d0] sm:$0xff]  ;;  %v3509_v1 = vld [vmem:[%s7042_s3 + $0x5f8] sm:$0xff] }
 0x204   :  { %v2747_v25 = vadd.f32 %v2746_v38, %v2714_v9  ;;  %v2561_v14 = vmul.f32 %v3506_v16, %v7114_v26  ;;  %v2562_v19 = vmul.f32 %v3507_v5, %v7115_v48  ;;  %v3508_v56 = vld [vmem:[%s7042_s3 + $0x5f0] sm:$0xff]  ;;  %v2487_v39 = vmul.f32 %v3509_v1, %v5485_v63  ;;  %v3510_v38 = vld [vmem:[%s7042_s3 + $0x8a8] sm:$0xff] }
 0x205   :  { %2442 = vadd.xlane.f32.xlu0 %v2441_v43  ;;  %v2671_v3 = vadd.f32 %v2670_v44, %v2638_v24  ;;  %v2486_v9 = vmul.f32 %v3508_v56, %v7119_v6  ;;  %v2518_v34 = vadd.f32 %v2517_v31, %v2484_v10  ;;  %v2717_v24 = vmul.f32 %v3510_v38, %v4610_v36  ;;  %v3511_v44 = vld [vmem:[%s7042_s3 + $0x6d8] sm:$0xff]  ;;  %v3512_v10 = vld [vmem:[%s7042_s3 + $0x980] sm:$0xff]  ;;  %v3513_v56 = vld [vmem:[%s7042_s3 + $0x988] sm:$0xff] }
 0x206   :  { %v2748_v43 = vadd.f32 %v2747_v25, %v2715_v33  ;;  %v2563_v22 = vmul.f32 %v3511_v44, %v7116_v58  ;;  %v2595_v35 = vadd.f32 %v2561_v14, %v2560_v54  ;;  %v2792_v31 = vmul.f32 %v3512_v10, %v7108_v0  ;;  %v6637_v25 = vpop.xlane.xlu1 %812  ;;  %v3515_v0 = vld [vmem:[%s7042_s3 + $0x990] sm:$0xff]  ;;  %v3518_v38 = vld [vmem:[%s7042_s3 + $0x6e8] sm:$0xff]  ;;  %v3519_v44 = vld [vmem:[%s7042_s3 + $0x998] sm:$0xff] }
 0x207   :  { %v2672_v16 = vadd.f32 %v2671_v3, %v2639_v60  ;;  %v2519_v5 = vadd.f32 %v2518_v34, %v2485_v29  ;;  %v2793_v33 = vmul.f32 %v3513_v56, %v7109_v8  ;;  %v3514_v60 = vld [vmem:[%s7042_s3 + $0x6e0] sm:$0xff]  ;;  %v2794_v14 = vmul.f32 %v3515_v0, %v7110_v21  ;;  %v3516_v8 = vld [vmem:[%s7042_s3 + $0x8b0] sm:$0xff]  ;;  %v3517_v34 = vld [vmem:[%s7042_s3 + $0x8b8] sm:$0xff] }
 0x208   :  { %v2749_v1 = vadd.f32 %v2748_v43, %v2716_v28  ;;  %v2564_v29 = vmul.f32 %v3514_v60, %v7117_v42  ;;  %v2596_v54 = vadd.f32 %v2595_v35, %v2562_v19  ;;  %v2718_v28 = vmul.f32 %v3516_v8, %v4608_v32  ;;  %v3520_v10 = vld [vmem:[%s7042_s3 + $0x9a0] sm:$0xff]  ;;  %v3524_v0 = vld [vmem:[%s7042_s3 + $0x6f0] sm:$0xff]  ;;  %v3525_v8 = vld [vmem:[%s7042_s3 + $0x6f8] sm:$0xff] }
 0x209   :  { %2673 = vadd.xlane.f32.xlu1 %v2672_v16  ;;  %v2520_v3 = vadd.f32 %v2519_v5, %v2486_v9  ;;  %v2719_v19 = vmul.f32 %v3517_v34, %v7112_v55  ;;  %v2565_v21 = vmul.f32 %v3518_v38, %v7118_v13  ;;  %v2795_v35 = vmul.f32 %v3519_v44, %v7111_v20  ;;  %v3521_v60 = vld [vmem:[%s7042_s3 + $0x7c0] sm:$0xff]  ;;  %v3527_v34 = vld [vmem:[%s7042_s3 + $0x7d8] sm:$0xff] }
 0x20a   :  { %v2750_v43 = vadd.f32 %v2749_v1, %v2717_v24  ;;  %v2597_v9 = vadd.f32 %v2596_v54, %v2563_v22  ;;  %v2826_v16 = vadd.f32 %v2793_v33, %v2792_v31  ;;  %v2796_v56 = vmul.f32 %v3520_v10, %v4599_v61  ;;  %v3522_v22 = vld [vmem:[%s7042_s3 + $0x7c8] sm:$0xff]  ;;  %v6675_v31 = vpop.xlane.xlu0 %821  ;;  %v3523_v61 = vld [vmem:[%s7042_s3 + $0x7d0] sm:$0xff] }
 0x20b   :  { %v2521_v5 = vadd.f32 %v2520_v3, %v2487_v39  ;;  %v2640_v24 = vmul.f32 %v3521_v60, %v7113_v53  ;;  %v2641_v20 = vmul.f32 %v3522_v22, %v7114_v26  ;;  %v2642_v54 = vmul.f32 %v3523_v61, %v7115_v48  ;;  %v3528_v10 = vld [vmem:[%s7042_s3 + $0x9b0] sm:$0xff]  ;;  %v3530_v61 = vld [vmem:[%s7042_s3 + $0x8c8] sm:$0xff] }
 0x20c   :  { %v2751_v39 = vadd.f32 %v2750_v43, %v2718_v28  ;;  %v2598_v33 = vadd.f32 %v2597_v9, %v2564_v29  ;;  %v2827_v1 = vadd.f32 %v2826_v16, %v2794_v14  ;;  %v2566_v3 = vmul.f32 %v3524_v0, %v7119_v6  ;;  %v3526_v14 = vld [vmem:[%s7042_s3 + $0x9a8] sm:$0xff]  ;;  %v6697_v43 = vpop.xlane.xlu1 %926 }
 0x20d   :  { %2522 = vadd.xlane.f32.xlu0 %v2521_v5  ;;  %v2567_v29 = vmul.f32 %v3525_v8, %v5485_v63  ;;  %v2797_v28 = vmul.f32 %v3526_v14, %v4610_v36  ;;  %v2643_v38 = vmul.f32 %v3527_v34, %v7116_v58  ;;  %v2675_v5 = vadd.f32 %v2641_v20, %v2640_v24  ;;  %v3529_v36 = vld [vmem:[%s7042_s3 + $0x8c0] sm:$0xff]  ;;  %v3534_v8 = vld [vmem:[%s7042_s3 + $0x7e8] sm:$0xff] }
 0x20e   :  { %v2752_v9 = vadd.f32 %v2751_v39, %v2719_v19  ;;  %v2599_v44 = vadd.f32 %v2598_v33, %v2565_v21  ;;  %v2828_v16 = vadd.f32 %v2827_v1, %v2795_v35  ;;  %v2798_v60 = vmul.f32 %v3528_v10, %v4608_v32  ;;  %v3531_v21 = vld [vmem:[%s7042_s3 + $0x8d0] sm:$0xff]  ;;  %v3532_v20 = vld [vmem:[%s7042_s3 + $0x7e0] sm:$0xff]  ;;  %v3533_v1 = vld [vmem:[%s7042_s3 + $0x9b8] sm:$0xff] }
 0x20f   :  { %v2720_v22 = vmul.f32 %v3529_v36, %v7113_v53  ;;  %v2721_v19 = vmul.f32 %v3530_v61, %v7114_v26  ;;  %v2722_v35 = vmul.f32 %v3531_v21, %v7115_v48  ;;  %v2644_v39 = vmul.f32 %v3532_v20, %v7117_v42  ;;  %v3537_v10 = vld [vmem:[%s7042_s3 + $0x8e0] sm:$0xff] }
 0x210   :  { %2753 = vadd.xlane.f32.xlu1 %v2752_v9  ;;  %v2600_v32 = vadd.f32 %v2599_v44, %v2566_v3  ;;  %v2829_v24 = vadd.f32 %v2828_v16, %v2796_v56  ;;  %v2676_v33 = vadd.f32 %v2675_v5, %v2642_v54  ;;  %v2799_v0 = vmul.f32 %v3533_v1, %v7112_v55  ;;  %v3535_v56 = vld [vmem:[%s7042_s3 + $0x8d8] sm:$0xff]  ;;  %v6731_v54 = vpop.xlane.xlu0 %935  ;;  %v3536_v55 = vld [vmem:[%s7042_s3 + $0x7f0] sm:$0xff] }
 0x211   :  { %v2645_v3 = vmul.f32 %v3534_v8, %v7118_v13  ;;  %v2723_v14 = vmul.f32 %v3535_v56, %v7116_v58  ;;  %v2755_v34 = vadd.f32 %v2721_v19, %v2720_v22  ;;  %v2646_v16 = vmul.f32 %v3536_v55, %v7119_v6  ;;  %v3538_v22 = vld [vmem:[%s7042_s3 + $0x9c0] sm:$0xff] }
 0x212   :  { %v2601_v9 = vadd.f32 %v2600_v32, %v2567_v29  ;;  %v2830_v44 = vadd.f32 %v2829_v24, %v2797_v28  ;;  %v2677_v5 = vadd.f32 %v2676_v33, %v2643_v38  ;;  %v2724_v36 = vmul.f32 %v3537_v10, %v7117_v42  ;;  %v3539_v28 = vld [vmem:[%s7042_s3 + $0x9c8] sm:$0xff]  ;;  %v6749_v38 = vpop.xlane.xlu1 %1040 }
 0x213   :  { %v2756_v61 = vadd.f32 %v2755_v34, %v2722_v35  ;;  %v2800_v29 = vmul.f32 %v3538_v22, %v7113_v53  ;;  %v2801_v19 = vmul.f32 %v3539_v28, %v7114_v26  ;;  %v3540_v35 = vld [vmem:[%s7042_s3 + $0x7f8] sm:$0xff]  ;;  %v3541_v53 = vld [vmem:[%s7042_s3 + $0x9d0] sm:$0xff]  ;;  %v3542_v26 = vld [vmem:[%s7042_s3 + $0x8e8] sm:$0xff]  ;;  %v594_v10 = vadd.f32 %v6305_v50, %v5957_v18 }
 0x214   :  { %2602 = vadd.xlane.f32.xlu0 %v2601_v9  ;;  %v2831_v21 = vadd.f32 %v2830_v44, %v2798_v60  ;;  %v2647_v32 = vmul.f32 %v3540_v35, %v5485_v63  ;;  %v2678_v24 = vadd.f32 %v2677_v5, %v2644_v39  ;;  %v2802_v20 = vmul.f32 %v3541_v53, %v7115_v48  ;;  %v3543_v60 = vld [vmem:[%s7042_s3 + $0x8f0] sm:$0xff]  ;;  %v3544_v39 = vld [vmem:[%s7042_s3 + $0x8f8] sm:$0xff] }
 0x215   :  { %v2725_v33 = vmul.f32 %v3542_v26, %v7118_v13  ;;  %v2726_v1 = vmul.f32 %v3543_v60, %v7119_v6  ;;  %v2727_v8 = vmul.f32 %v3544_v39, %v5485_v63  ;;  %v2757_v56 = vadd.f32 %v2756_v61, %v2723_v14  ;;  %v3545_v9 = vld [vmem:[%s7042_s3 + $0x9d8] sm:$0xff]  ;;  %v3546_v14 = vld [vmem:[%s7042_s3 + $0x9e0] sm:$0xff]  ;;  %v3548_v18 = vld [vmem:[%s7042_s3 + $0x9f0] sm:$0xff] }
 0x216   :  { %v2832_v48 = vadd.f32 %v2831_v21, %v2799_v0  ;;  %v2679_v34 = vadd.f32 %v2678_v24, %v2645_v3  ;;  %v2803_v44 = vmul.f32 %v3545_v9, %v7116_v58  ;;  %v2835_v55 = vadd.f32 %v2801_v19, %v2800_v29  ;;  %v1050_v3 = vpop.xlane.xlu0 %1049  ;;  %v3547_v58 = vld [vmem:[%s7042_s3 + $0x9e8] sm:$0xff]  ;;  %v1155_v28 = vpop.xlane.xlu1 %1154 }
 0x217   :  { %v2758_v5 = vadd.f32 %v2757_v56, %v2724_v36  ;;  %v709_v22 = vadd.f32 %v6231_v12, %v6029_v59  ;;  %v2804_v0 = vmul.f32 %v3546_v14, %v7117_v42  ;;  %v2805_v36 = vmul.f32 %v3547_v58, %v7118_v13  ;;  %v3549_v42 = vld [vmem:[%s7042_s3 + $0x9f8] sm:$0xff] }
 0x218   :  { %2833 = vadd.xlane.f32.xlu1 %v2832_v48  ;;  %v2680_v61 = vadd.f32 %v2679_v34, %v2646_v16  ;;  %v2806_v59 = vmul.f32 %v3548_v18, %v7119_v6  ;;  %v2836_v12 = vadd.f32 %v2835_v55, %v2802_v20  ;;  %v2807_v16 = vmul.f32 %v3549_v42, %v5485_v63 }
 0x219   :  { %v2759_v50 = vadd.f32 %v2758_v5, %v2725_v33  ;;  %v1279_v29 = vadd.f32 %v6361_v15, %v6007_v40  ;;  %v823_v13 = vadd.f32 %v6283_v52, %v6085_v49  ;;  %v710_v35 = vadd.f32 %v709_v22, %v6581_v30 }
 0x21a   :  { %v2681_v19 = vadd.f32 %v2680_v61, %v2647_v32  ;;  %v2837_v21 = vadd.f32 %v2836_v12, %v2803_v44  ;;  %v595_v6 = vadd.f32 %v594_v10, %v6507_v7  ;;  %v937_v53 = vadd.f32 %v6343_v45, %v6145_v62  ;;  %v1164_v45 = vpop.xlane.xlu0 %1163 }
 0x21b   :  { %v2760_v24 = vadd.f32 %v2759_v50, %v2726_v1  ;;  %v824_v20 = vadd.f32 %v823_v13, %v6637_v25  ;;  %v21_v63 = vlaneseq  ;;  %v1051_v40 = vadd.f32 %v6399_v17, %v6197_v57 }
 0x21c   :  { %2682 = vadd.xlane.f32.xlu0 %v2681_v19  ;;  %v2838_v26 = vadd.f32 %v2837_v21, %v2804_v0  ;;  %v596_v49 = vadd.f32 %v595_v6, %v6559_v27  ;;  %v711_v52 = vadd.f32 %v710_v35, %v6619_v11  ;;  %v1165_v15 = vadd.f32 %v6455_v2, %v6249_v46  ;;  %v1269_v46 = vpop.xlane.xlu1 %1268 }
 0x21d   :  { %v6810_v7 = vshrl.u32 %v21_v63, 7  ;;  %v6812_v30 = vand.u32 127, %v21_v63  ;;  %v825_v62 = vadd.f32 %v824_v20, %v6675_v31  ;;  %v2761_v25 = vadd.f32 %v2760_v24, %v2727_v8 }
 0x21e   :  { %v2839_v32 = vadd.f32 %v2838_v26, %v2805_v36  ;;  %v597_v33 = vrot.slane %v596_v49, 4  ;;  %v712_v60 = vrot.slane %v711_v52, 4  ;;  %v1393_v57 = vadd.f32 %v6421_v51, %v6067_v4  ;;  %v1278_v9 = vpop.xlane.xlu0 %1277 }
 0x21f   :  { %v938_v17 = vadd.f32 %v937_v53, %v6697_v43  ;;  %v1052_v27 = vadd.f32 %v1051_v40, %v6749_v38  ;;  %v826_v11 = vrot.slane %v825_v62, 4  ;;  %v1166_v56 = vadd.f32 %v1165_v15, %v1155_v28 }
 0x220   :  { %2762 = vadd.xlane.f32.xlu0 %v2761_v25  ;;  %v2840_v2 = vadd.f32 %v2839_v32, %v2806_v59  ;;  %v598_v1 = vadd.f32 %v597_v33, %v596_v49  ;;  %v713_v39 = vadd.f32 %v712_v60, %v711_v52  ;;  %vm603_vm1 = vcmp.eq.s32.totalorder %v6810_v7, 0  ;;  %v1383_v0 = vpop.xlane.xlu1 %1382 }
 0x221   :  { %vm604_vm2 = vcmp.eq.s32.totalorder %v6812_v30, 0  ;;  %v827_v31 = vadd.f32 %v826_v11, %v825_v62  ;;  %v939_v8 = vadd.f32 %v938_v17, %v6731_v54  ;;  %v1053_v43 = vadd.f32 %v1052_v27, %v1050_v3 }
 0x222   :  { %v2841_v48 = vadd.f32 %v2840_v2, %v2807_v16  ;;  %v599_v4 = vrot.slane %v598_v1, 2  ;;  %v714_v51 = vrot.slane %v713_v39, 2  ;;  %vm718_vm3 = vcmp.eq.s32.totalorder %v6812_v30, 1  ;;  %vm6829_vm6 = vmand %vm603_vm1, %vm604_vm2  ;;  %v2872_v16 = vld [vmem:[%s7043_s4] ss:$0 sm:$0xff]  ;;  %v1392_v20 = vpop.xlane.xlu0 %1391  ;;  %s3574_s4 = smov [#allocation2]  }
 0x223   :  { %v828_v38 = vrot.slane %v827_v31, 2  ;;  %vm832_vm4 = vcmp.eq.s32.totalorder %v6812_v30, 2  ;;  %v940_v34 = vrot.slane %v939_v8, 4  ;;  %v1054_v5 = vrot.slane %v1053_v43, 4  ;;  %vm6837_vm7 = vmand %vm603_vm1, %vm718_vm3  ;;  %s2864_s27 = sshll.u32 %s3574_s4, 4  ;;  %s2865_s27 = int_to_ptr.vmem [resolvable:$true] %s2864_s27 }
 0x224   :  { %2842 = vadd.xlane.f32.xlu0 %v2841_v48  ;;  %v600_v44 = vadd.f32 %v599_v4, %v598_v1  ;;  %v715_v55 = vadd.f32 %v714_v51, %v713_v39  ;;  %v1167_v10 = vadd.f32 %v1166_v56, %v1164_v45  ;;  %vm946_vm5 = vcmp.eq.s32.totalorder %v6812_v30, 3  ;;  %vm6849_vm9 = vmand %vm603_vm1, %vm832_vm4  ;;  %v6858_v62 = vpop.xlane.xlu1 %1496  ;;  %s3550_s28 = scalar_lea.vmem %s2865_s27, 32  ;;  %p3555_p1 = scmp.lt.s32.totalorder %s2865_s27, %s2865_s27 }
 0x225   :  { %v829_v22 = vadd.f32 %v828_v38, %v827_v31  ;;  %v941_v14 = vadd.f32 %v940_v34, %v939_v8  ;;  %v1280_v54 = vadd.f32 %v1279_v29, %v1269_v46  ;;  %v1055_v36 = vadd.f32 %v1054_v5, %v1053_v43  ;;  %vm6866_vm11 = vmand %vm603_vm1, %vm946_vm5  ;;  %p3551_p0 = scmp.ne.s32.totalorder %s2865_s27, %s3550_s28  ;;  %p3556_p2 = scmp.lt.s32.totalorder %s3550_s28, %s3550_s28 }
 0x226   :  { %v601_v61 = vrot.slane %v600_v44, 1  ;;  %v716_v58 = vrot.slane %v715_v55, 1  ;;  %v1168_v18 = vrot.slane %v1167_v10, 4  ;;  %vm1060_vm8 = vcmp.eq.s32.totalorder %v6812_v30, 4  ;;  %v1506_v38 = vpop.xlane.xlu0 %1505 }
 0x227   :  { %v830_v12 = vrot.slane %v829_v22, 1  ;;  %v942_v50 = vrot.slane %v941_v14, 2  ;;  %v1281_v42 = vadd.f32 %v1280_v54, %v1278_v9  ;;  %v1056_v28 = vrot.slane %v1055_v36, 2  ;;  %vm6874_vm12 = vmand %vm603_vm1, %vm1060_vm8  ;;  %p3557_p3 = por %p3556_p2, %p3555_p1 }
 0x228   :  { %v602_v29 = vadd.f32 %v601_v61, %v600_v44  ;;  %v717_v13 = vadd.f32 %v716_v58, %v715_v55  ;;  %v1169_v19 = vadd.f32 %v1168_v18, %v1167_v10  ;;  %v1394_v24 = vadd.f32 %v1393_v57, %v1383_v0  ;;  %v1611_v44 = vpop.xlane.xlu1 %1610 }
 0x229   :  { %v831_v21 = vadd.f32 %v830_v12, %v829_v22  ;;  %v943_v6 = vadd.f32 %v942_v50, %v941_v14  ;;  %v1282_v53 = vrot.slane %v1281_v42, 4  ;;  %v1057_v40 = vadd.f32 %v1056_v28, %v1055_v36  ;;  %p3558_p4 = pnand %p3557_p3, %p3551_p0 }
 0x22a   :  { %v606_v63 = vsel %vm6829_vm6, %v602_v29, 0.0  ;;  %v720_v26 = vsel %vm6837_vm7, %v717_v13, 0.0  ;;  %v1170_v49 = vrot.slane %v1169_v19, 2  ;;  %vm1174_vm10 = vcmp.eq.s32.totalorder %v6812_v30, 5  ;;  %v1620_v3 = vpop.xlane.xlu0 %1619 }
 0x22b   :  { %v607_v52 = vadd.f32 %v2872_v16, %v606_v63  ;;  %v944_v15 = vrot.slane %v943_v6, 1  ;;  %v1283_v45 = vadd.f32 %v1282_v53, %v1281_v42  ;;  %v834_v25 = vsel %vm6849_vm9, %v831_v21, 0.0  ;;  %vm6884_vm13 = vmand %vm603_vm1, %vm1174_vm10 }
 0x22c   :  { %v1058_v33 = vrot.slane %v1057_v40, 1  ;;  %v1171_v60 = vadd.f32 %v1170_v49, %v1169_v19  ;;  %v1395_v57 = vadd.f32 %v1394_v24, %v1392_v20  ;;  %vm1288_vm14 = vcmp.eq.s32.totalorder %v6812_v30, 6  ;;  %v2104_v36 = vpop.xlane.xlu1 %2103 }
 0x22d   :  { %v721_v17 = vadd.f32 %v720_v26, %v607_v52  ;;  %v945_v27 = vadd.f32 %v944_v15, %v943_v6  ;;  %v1284_v46 = vrot.slane %v1283_v45, 2  ;;  %vm1289_vm15 = vmand %vm603_vm1, %vm1288_vm14  ;;  %vm1402_vm0 = vcmp.eq.s32.totalorder %v6812_v30, 7 }
 0x22e   :  { %v1059_v2 = vadd.f32 %v1058_v33, %v1057_v40  ;;  %v1172_v1 = vrot.slane %v1171_v60, 1  ;;  %v1396_v39 = vrot.slane %v1395_v57, 4  ;;  %vm1403_vm6 = vmand %vm603_vm1, %vm1402_vm0  ;;  %v2095_v50 = vpop.xlane.xlu0 %2094  ;;  %vm1516_vm7 = vcmp.eq.s32.totalorder %v6812_v30, 8 }
 0x22f   :  { %v835_v56 = vadd.f32 %v834_v25, %v721_v17  ;;  %v948_v31 = vsel %vm6866_vm11, %v945_v27, 0.0  ;;  %v1285_v48 = vadd.f32 %v1284_v46, %v1283_v45  ;;  %v1621_v27 = vadd.f32 %v6525_v23, %v6179_v41  ;;  %vm6930_vm11 = vmand %vm603_vm1, %vm1516_vm7 }
 0x230   :  { %v1062_v4 = vsel %vm6874_vm12, %v1059_v2, 0.0  ;;  %v1173_v51 = vadd.f32 %v1172_v1, %v1171_v60  ;;  %v1397_v43 = vadd.f32 %v1396_v39, %v1395_v57  ;;  %v2185_v42 = vpop.xlane.xlu1 %2184  ;;  %v1507_v57 = vadd.f32 %v6473_v37, %v6123_v47 }
 0x231   :  { %v949_v34 = vadd.f32 %v948_v31, %v835_v56  ;;  %v1286_v9 = vrot.slane %v1285_v48, 1  ;;  %v1622_v2 = vadd.f32 %v1621_v27, %v1611_v44  ;;  %v2123_v39 = vadd.f32 %v2104_v36, %v2095_v50 }
 0x232   :  { %v1176_v55 = vsel %vm6884_vm13, %v1173_v51, 0.0  ;;  %v1398_v5 = vrot.slane %v1397_v43, 2  ;;  %v2176_v16 = vpop.xlane.xlu0 %2175  ;;  %v1508_v46 = vadd.f32 %v1507_v57, %v6858_v62  ;;  %vm1630_vm9 = vcmp.eq.s32.totalorder %v6812_v30, 9 }
 0x233   :  { %v1063_v10 = vadd.f32 %v1062_v4, %v949_v34  ;;  %v1287_v22 = vadd.f32 %v1286_v9, %v1285_v48  ;;  %v1623_v56 = vadd.f32 %v1622_v2, %v1620_v3  ;;  %v2204_v31 = vadd.f32 %v2185_v42, %v2176_v16  ;;  %vm6941_vm13 = vmand %vm603_vm1, %vm1630_vm9 }
 0x234   :  { %v1399_v14 = vadd.f32 %v1398_v5, %v1397_v43  ;;  %v2265_v29 = vpop.xlane.xlu1 %2264  ;;  %v1509_v1 = vadd.f32 %v1508_v46, %v1506_v38  ;;  %vm2132_vm12 = vcmp.eq.s32.totalorder %v6810_v7, 1 }
 0x235   :  { %v1177_v54 = vadd.f32 %v1176_v55, %v1063_v10  ;;  %v1290_v0 = vsel %vm1289_vm15, %v1287_v22, 0.0  ;;  %v1624_v47 = vrot.slane %v1623_v56, 4  ;;  %vm6951_vm15 = vmand %vm2132_vm12, %vm604_vm2 }
 0x236   :  { %v1400_v61 = vrot.slane %v1399_v14, 1  ;;  %v2256_v13 = vpop.xlane.xlu0 %2255  ;;  %v1510_v43 = vrot.slane %v1509_v1, 4  ;;  %vm6964_vm1 = vmand %vm2132_vm12, %vm718_vm3 }
 0x237   :  { %v1291_v58 = vadd.f32 %v1290_v0, %v1177_v54  ;;  %v2284_v4 = vadd.f32 %v2265_v29, %v2256_v13  ;;  %v1625_v22 = vadd.f32 %v1624_v47, %v1623_v56  ;;  %vm6974_vm2 = vmand %vm2132_vm12, %vm832_vm4 }
 0x238   :  { %v1401_v18 = vadd.f32 %v1400_v61, %v1399_v14  ;;  %v2345_v28 = vpop.xlane.xlu1 %2344  ;;  %v1511_v62 = vadd.f32 %v1510_v43, %v1509_v1  ;;  %vm6986_vm3 = vmand %vm2132_vm12, %vm946_vm5 }
 0x239   :  { %v1626_v50 = vrot.slane %v1625_v22, 2  ;;  %vm6996_vm4 = vmand %vm2132_vm12, %vm1060_vm8 }
 0x23a   :  { %v1404_v59 = vsel %vm1403_vm6, %v1401_v18, 0.0  ;;  %v1512_v18 = vrot.slane %v1511_v62, 2  ;;  %vm7008_vm5 = vmand %vm2132_vm12, %vm1174_vm10  ;;  %vm2856_vm6 = vcmask 74752  }
 0x23b   :  { %v6902_v12 = vadd.f32 %v1404_v59, %v1291_v58  ;;  %vm7016_vm8 = vmand %vm2132_vm12, %vm1288_vm14 }
 0x23c   :  { %v2336_v19 = vpop.xlane.xlu0 %2335  ;;  %v2425_v21 = vpop.xlane.xlu1 %2424  ;;  %vm2693_vm10 = vmand %vm2132_vm12, %vm1402_vm0 }
 0x23d   :  { %v2364_v37 = vadd.f32 %v2345_v28, %v2336_v19  ;;  %vm2773_vm14 = vmand %vm2132_vm12, %vm1516_vm7 }
 0x23e   :  { %vm2853_vm0 = vmand %vm2132_vm12, %vm1630_vm9 }
 0x240   :  { %v2505_v6 = vpop.xlane.xlu1 %2504 }
 0x243   :  { %v2416_v35 = vpop.xlane.xlu0 %2415 }
 0x244   :  { %v6904_v53 = vpop.xlane.xlu1 %2584  ;;  %v2444_v41 = vadd.f32 %v2425_v21, %v2416_v35 }
 0x248   :  { %v6906_v63 = vpop.xlane.xlu1 %2664 }
 0x24b   :  { %v2496_v24 = vpop.xlane.xlu0 %2495 }
 0x24c   :  { %v2524_v3 = vadd.f32 %v2505_v6, %v2496_v24 }
 0x24e   :  { %v6910_v40 = vpop.xlane.xlu1 %2744 }
 0x252   :  { %v2576_v20 = vpop.xlane.xlu0 %2575 }
 0x256   :  { %v6914_v52 = vpop.xlane.xlu1 %2824 }
 0x25a   :  { %v6908_v26 = vpop.xlane.xlu0 %2655 }
 0x25d   :  { %v2113_v45 = vpop.xlane.xlu1 %2112 }
 0x25e   :  { %v2124_v8 = vadd.f32 %v2123_v39, %v2113_v45  ;;  %v1513_v45 = vadd.f32 %v1512_v18, %v1511_v62 }
 0x260   :  { %v1514_v27 = vrot.slane %v1513_v45, 1 }
 0x261   :  { %v6912_v49 = vpop.xlane.xlu0 %2735 }
 0x264   :  { %v2194_v32 = vpop.xlane.xlu1 %2193 }
 0x265   :  { %v2205_v34 = vadd.f32 %v2204_v31, %v2194_v32  ;;  %v1627_v32 = vadd.f32 %v1626_v50, %v1625_v22 }
 0x267   :  { %v1628_v2 = vrot.slane %v1627_v32, 1 }
 0x269   :  { %v6916_v15 = vpop.xlane.xlu0 %2815 }
 0x26c   :  { %v2274_v60 = vpop.xlane.xlu1 %2273 }
 0x26d   :  { %v2285_v55 = vadd.f32 %v2284_v4, %v2274_v60  ;;  %v2604_v60 = vadd.f32 %v6904_v53, %v2576_v20  ;;  %v1515_v53 = vadd.f32 %v1514_v27, %v1513_v45 }
 0x270   :  { %v2122_v25 = vpop.xlane.xlu0 %2121 }
 0x271   :  { %v2125_v9 = vadd.f32 %v2124_v8, %v2122_v25 }
 0x273   :  { %v2126_v44 = vrot.slane %v2125_v9, 4 }
 0x274   :  { %v2354_v11 = vpop.xlane.xlu1 %2353 }
 0x275   :  { %v2365_v23 = vadd.f32 %v2364_v37, %v2354_v11  ;;  %v2127_v59 = vadd.f32 %v2126_v44, %v2125_v9  ;;  %v1629_v9 = vadd.f32 %v1628_v2, %v1627_v32  ;;  %v2684_v37 = vadd.f32 %v6906_v63, %v6908_v26 }
 0x277   :  { %v2128_v25 = vrot.slane %v2127_v59, 2 }
 0x278   :  { %v2203_v33 = vpop.xlane.xlu0 %2202 }
 0x279   :  { %v2206_v5 = vadd.f32 %v2205_v34, %v2203_v33  ;;  %v2129_v11 = vadd.f32 %v2128_v25, %v2127_v59 }
 0x27b   :  { %v2434_v51 = vpop.xlane.xlu1 %2433  ;;  %v2207_v61 = vrot.slane %v2206_v5, 4  ;;  %v2130_v20 = vrot.slane %v2129_v11, 1 }
 0x27c   :  { %v2445_v14 = vadd.f32 %v2444_v41, %v2434_v51 }
 0x27d   :  { %v2208_v29 = vadd.f32 %v2207_v61, %v2206_v5  ;;  %v2131_v22 = vadd.f32 %v2130_v20, %v2129_v11  ;;  %v1632_v61 = vsel %vm6941_vm13, %v1629_v9, 0.0 }
 0x27f   :  { %v2283_v17 = vpop.xlane.xlu0 %2282  ;;  %v2209_v6 = vrot.slane %v2208_v29, 2 }
 0x280   :  { %v2286_v10 = vadd.f32 %v2285_v55, %v2283_v17 }
 0x281   :  { %v2210_v31 = vadd.f32 %v2209_v6, %v2208_v29  ;;  %v2134_v29 = vsel %vm6951_vm15, %v2131_v22, 0.0 }
 0x282   :  { %v2287_v58 = vrot.slane %v2286_v10, 4 }
 0x283   :  { %v2514_v54 = vpop.xlane.xlu1 %2513  ;;  %v2211_v55 = vrot.slane %v2210_v31, 1 }
 0x284   :  { %v2525_v42 = vadd.f32 %v2524_v3, %v2514_v54  ;;  %v2288_v28 = vadd.f32 %v2287_v58, %v2286_v10  ;;  %v2764_v3 = vadd.f32 %v6910_v40, %v6912_v49 }
 0x285   :  { %v2212_v58 = vadd.f32 %v2211_v55, %v2210_v31 }
 0x286   :  { %v2289_v57 = vrot.slane %v2288_v28, 2 }
 0x287   :  { %v2363_v48 = vpop.xlane.xlu0 %2362  ;;  %v2214_v25 = vsel %vm6964_vm1, %v2212_v58, 0.0 }
 0x288   :  { %v2366_v0 = vadd.f32 %v2365_v23, %v2363_v48  ;;  %v2290_v4 = vadd.f32 %v2289_v57, %v2288_v28  ;;  %v2844_v28 = vadd.f32 %v6914_v52, %v6916_v15 }
 0x28a   :  { %v2367_v16 = vrot.slane %v2366_v0, 4  ;;  %v2594_v19 = vpop.xlane.xlu1 %2593  ;;  %v2291_v10 = vrot.slane %v2290_v4, 1 }
 0x28b   :  { %v2605_v46 = vadd.f32 %v2604_v60, %v2594_v19 }
 0x28c   :  { %v2368_v33 = vadd.f32 %v2367_v16, %v2366_v0 }
 0x28e   :  { %v2443_v38 = vpop.xlane.xlu0 %2442  ;;  %v2369_v1 = vrot.slane %v2368_v33, 2 }
 0x28f   :  { %v2446_v36 = vadd.f32 %v2445_v14, %v2443_v38  ;;  %v1518_v38 = vsel %vm6930_vm11, %v1515_v53, 0.0 }
 0x290   :  { %v2370_v47 = vadd.f32 %v2369_v1, %v2368_v33  ;;  %v1519_v59 = vadd.f32 %v1518_v38, %v6902_v12 }
 0x291   :  { %v2447_v21 = vrot.slane %v2446_v36, 4 }
 0x292   :  { %v2674_v39 = vpop.xlane.xlu1 %2673  ;;  %v2371_v54 = vrot.slane %v2370_v47, 1  ;;  %v1633_v45 = vadd.f32 %v1632_v61, %v1519_v59 }
 0x293   :  { %v2448_v17 = vadd.f32 %v2447_v21, %v2446_v36  ;;  %v2685_v14 = vadd.f32 %v2684_v37, %v2674_v39 }
 0x294   :  { %v2372_v19 = vadd.f32 %v2371_v54, %v2370_v47 }
 0x295   :  { %v2449_v51 = vrot.slane %v2448_v17, 2 }
 0x296   :  { %v2523_v13 = vpop.xlane.xlu0 %2522  ;;  %v2374_v2 = vsel %vm6986_vm3, %v2372_v19, 0.0 }
 0x297   :  { %v2526_v35 = vadd.f32 %v2525_v42, %v2523_v13  ;;  %v2450_v62 = vadd.f32 %v2449_v51, %v2448_v17  ;;  %v2292_v42 = vadd.f32 %v2291_v10, %v2290_v4 }
 0x299   :  { %v2527_v24 = vrot.slane %v2526_v35, 4  ;;  %v2754_v44 = vpop.xlane.xlu1 %2753  ;;  %v2451_v16 = vrot.slane %v2450_v62, 1  ;;  %v2294_v52 = vsel %vm6974_vm2, %v2292_v42, 0.0 }
 0x29a   :  { %v2765_v12 = vadd.f32 %v2764_v3, %v2754_v44 }
 0x29b   :  { %v2528_v8 = vadd.f32 %v2527_v24, %v2526_v35  ;;  %v2452_v15 = vadd.f32 %v2451_v16, %v2450_v62  ;;  %v2135_v24 = vadd.f32 %v2134_v29, %v1633_v45 }
 0x29d   :  { %v2603_v56 = vpop.xlane.xlu0 %2602  ;;  %v2529_v5 = vrot.slane %v2528_v8, 2  ;;  %v2215_v39 = vadd.f32 %v2214_v25, %v2135_v24  ;;  %v2454_v4 = vsel %vm6996_vm4, %v2452_v15, 0.0 }
 0x29e   :  { %v2606_v48 = vadd.f32 %v2605_v46, %v2603_v56 }
 0x29f   :  { %v2530_v36 = vadd.f32 %v2529_v5, %v2528_v8  ;;  %v2295_v53 = vadd.f32 %v2294_v52, %v2215_v39 }
 0x2a0   :  { %v2607_v43 = vrot.slane %v2606_v48, 4 }
 0x2a1   :  { %v2834_v21 = vpop.xlane.xlu1 %2833  ;;  %v2531_v33 = vrot.slane %v2530_v36, 1  ;;  %v2375_v37 = vadd.f32 %v2374_v2, %v2295_v53 }
 0x2a2   :  { %v2608_v41 = vadd.f32 %v2607_v43, %v2606_v48  ;;  %v2845_v27 = vadd.f32 %v2844_v28, %v2834_v21 }
 0x2a3   :  { %v2532_v56 = vadd.f32 %v2531_v33, %v2530_v36  ;;  %v2455_v10 = vadd.f32 %v2454_v4, %v2375_v37 }
 0x2a4   :  { %v2609_v63 = vrot.slane %v2608_v41, 2 }
 0x2a5   :  { %v2683_v0 = vpop.xlane.xlu0 %2682  ;;  %v2534_v55 = vsel %vm7008_vm5, %v2532_v56, 0.0 }
 0x2a6   :  { %v2686_v18 = vadd.f32 %v2685_v14, %v2683_v0  ;;  %v2610_v49 = vadd.f32 %v2609_v63, %v2608_v41  ;;  %v2535_v22 = vadd.f32 %v2534_v55, %v2455_v10 }
 0x2a8   :  { %v2687_v13 = vrot.slane %v2686_v18, 4  ;;  %v2611_v17 = vrot.slane %v2610_v49, 1 }
 0x2a9   :  { %v2763_v35 = vpop.xlane.xlu0 %2762 }
 0x2aa   :  { %v2688_v60 = vadd.f32 %v2687_v13, %v2686_v18  ;;  %v2766_v6 = vadd.f32 %v2765_v12, %v2763_v35  ;;  %v2612_v20 = vadd.f32 %v2611_v17, %v2610_v49 }
 0x2ac   :  { %v2689_v11 = vrot.slane %v2688_v60, 2  ;;  %v2767_v46 = vrot.slane %v2766_v6, 4  ;;  %v2614_v62 = vsel %vm7016_vm8, %v2612_v20, 0.0 }
 0x2ad   :  { %v2843_v1 = vpop.xlane.xlu0 %2842  ;;  %v2615_v54 = vadd.f32 %v2614_v62, %v2535_v22 }
 0x2ae   :  { %v2690_v31 = vadd.f32 %v2689_v11, %v2688_v60  ;;  %v2768_v8 = vadd.f32 %v2767_v46, %v2766_v6  ;;  %v2846_v48 = vadd.f32 %v2845_v27, %v2843_v1 }
 0x2b0   :  { %v2691_v43 = vrot.slane %v2690_v31, 1  ;;  %v2769_v34 = vrot.slane %v2768_v8, 2  ;;  %v2847_v9 = vrot.slane %v2846_v48, 4 }
 0x2b2   :  { %v2692_v5 = vadd.f32 %v2691_v43, %v2690_v31  ;;  %v2770_v41 = vadd.f32 %v2769_v34, %v2768_v8  ;;  %v2848_v23 = vadd.f32 %v2847_v9, %v2846_v48 }
 0x2b4   :  { %v2771_v44 = vrot.slane %v2770_v41, 1  ;;  %v2849_v38 = vrot.slane %v2848_v23, 2  ;;  %v2694_v14 = vsel %vm2693_vm10, %v2692_v5, 0.0 }
 0x2b5   :  { %v2695_v3 = vadd.f32 %v2694_v14, %v2615_v54 }
 0x2b6   :  { %v2772_v63 = vadd.f32 %v2771_v44, %v2770_v41  ;;  %v2850_v26 = vadd.f32 %v2849_v38, %v2848_v23 }
 0x2b8   :  { %v2851_v0 = vrot.slane %v2850_v26, 1  ;;  %v2774_v61 = vsel %vm2773_vm14, %v2772_v63, 0.0 }
 0x2b9   :  { %v2775_v36 = vadd.f32 %v2774_v61, %v2695_v3 }
 0x2ba   :  { %v2852_v58 = vadd.f32 %v2851_v0, %v2850_v26 }
 0x2bc   :  { %v2854_v18 = vsel %vm2853_vm0, %v2852_v58, 0.0 }
 0x2bd   :  { %v2855_v59 = vadd.f32 %v2854_v18, %v2775_v36 }
 0x2bf   :  { %2857 = vst.msk [vmem:[#allocation2] sm:$0x3] %vm2856_vm6, %v2855_v59 }
 0x2c0   :  { %3561 = shalt.err (!%p3558_p4)
}
 0x2c1   :  { %2867 = dma.vmem_to_hbm [thread:$0]  %s2865_s27, 32, %s7044_s5, [#allocation3]  }
 0x2c2   :  { %3570 = dma.done.wait [#allocation3], 32  }
 0x2c3   :  { %3571 = vsyncadd [#allocation3], 4294967264 }
 0x2c4   :  { %2871 = vsyncpa [#allocation3], 1 }

</bundles_post_ra>
